<compile_context>
chip_gen: v7x
topology: tpu7x:2x2x1
jax: 0.10.0
libtpu: 0.0.40
codegen_flags: <defaults>
</compile_context>

<pallas_src>
import functools

import jax
import jax.numpy as jnp
import numpy as np
from jax.experimental import pallas as pl
from jax.experimental.pallas import tpu as pltpu


def _block_up_kernel(x_ref, w1p_ref, w2_ref, ws_ref, b1_ref, b2_ref, bs_ref,
                     out_ref, hbuf_ref):
    """One (row-tile, batch) grid step of the fused BasicBlockUp forward.

    x_ref    : (1, 1, TH+4, W+2, Cin)  this tile's input rows + 2-row halos,
                                       column-padded by 1 (zeros at borders)
    w1p_ref  : (16, Cin, Cout)         phase-combined conv1 weights,
                                       index ((a*2+b)*2+u)*2+v
    w2_ref   : (9, Cout, Cout)         conv2 weights, index r*3+s
    ws_ref   : (Cin, Cout)             1x1 shortcut weights
    b*_ref   : (1, Cout)               float32 biases
    out_ref  : (1, TH, 2, W, 2*Cout)   row phase a on dim 2, both column
                                       phases fused on the lane axis
    hbuf_ref : (2, 2, TH+2, W+2, Cout) VMEM scratch: padded conv1 phase output
    """
    TH = out_ref.shape[1]
    W = out_ref.shape[3]
    Cin = x_ref.shape[4]
    Cout = hbuf_ref.shape[4]
    cdt = hbuf_ref.dtype
    R1 = TH + 2                       # intermediate rows per tile (1-row halo)

    t = pl.program_id(0)
    n_tiles = pl.num_programs(0)

    x_all = x_ref[0, 0]                       # (TH+4, W+2, Cin), raw input
    x_act = jnp.maximum(x_all, 0)             # ReLU (relu(0)=0 keeps padding)

    # Three column-shifted copies of the activated block (x column offsets
    # -1, 0, +1), built once and reused by all conv1 taps.
    xs = [x_act[:, k:k + W, :] for k in range(3)]          # (TH+4, W, Cin)

    # ---- conv1 fused with the nearest upsample, in phase space -------------
    # intermediate phase (a,b), local row l (global phase row t*TH - 1 + l):
    #   h[a,b][l, j] = b1 + sum_{u,v in {0,1}} x[l+a+u-2, j+b+v-1] @ W1p[a,b,u,v]
    b1 = b1_ref[...].astype(jnp.float32)
    for a in range(2):
        for b in range(2):
            acc = jnp.zeros((R1 * W, Cout), jnp.float32)
            for u in range(2):
                for v in range(2):
                    w = w1p_ref[((a * 2 + b) * 2 + u) * 2 + v]
                    patch = xs[b + v][a + u:a + u + R1].reshape(R1 * W, Cin)
                    acc = acc + jnp.dot(patch, w,
                                        preferred_element_type=jnp.float32)
            acc = acc + b1
            hbuf_ref[a, b, :, 1:1 + W, :] = (
                acc.reshape(R1, W, Cout).astype(cdt))
            # conv2's zero padding in the column direction (columns are not
            # tiled, so this is always the true image border).
            hbuf_ref[a, b, :, 0:1, :] = jnp.zeros((R1, 1, Cout), cdt)
            hbuf_ref[a, b, :, W + 1:W + 2, :] = jnp.zeros((R1, 1, Cout), cdt)

    # conv2's zero padding in the row direction exists only at the global
    # image border; interior tiles keep true conv1 values in their halo rows.
    @pl.when(t == 0)
    def _zero_top():
        for a in range(2):
            for b in range(2):
                hbuf_ref[a, b, 0:1, :, :] = jnp.zeros((1, W + 2, Cout), cdt)

    @pl.when(t == n_tiles - 1)
    def _zero_bottom():
        for a in range(2):
            for b in range(2):
                hbuf_ref[a, b, R1 - 1:R1, :, :] = jnp.zeros((1, W + 2, Cout),
                                                            cdt)

    # ---- shortcut: upsample(x) -> 1x1 conv == x @ ws (shared by all phases) --
    x_sc = x_all[2:2 + TH, 1:1 + W, :].reshape(TH * W, Cin)   # raw, no ReLU
    sc_base = jnp.dot(x_sc, ws_ref[...], preferred_element_type=jnp.float32)
    sc_base = (sc_base + bs_ref[...].astype(jnp.float32)
               + b2_ref[...].astype(jnp.float32))

    # ---- conv2 in phase space + residual add --------------------------------
    # Pre-build the three column-shifted copies of every phase buffer once.
    hshift = {}
    for a_src in range(2):
        for b_src in range(2):
            for k in range(3):
                hshift[(a_src, b_src, k)] = hbuf_ref[a_src, b_src, :,
                                                     k:k + W, :]

    for a in range(2):
        cols = []
        for b in range(2):
            acc = jnp.zeros((TH * W, Cout), jnp.float32)
            for r in range(3):
                tr = a + r - 1
                a_src, di = tr % 2, tr // 2
                for s in range(3):
                    ts = b + s - 1
                    b_src, dj = ts % 2, ts // 2
                    patch = hshift[(a_src, b_src, dj + 1)][di + 1:di + 1 + TH]
                    acc = acc + jnp.dot(patch.reshape(TH * W, Cout),
                                        w2_ref[r * 3 + s],
                                        preferred_element_type=jnp.float32)
            cols.append((acc + sc_base).reshape(TH, W, Cout))
        # Fuse both column phases on the lane axis -> wider output store.
        out_ref[0, :, a, :, :] = jnp.concatenate(cols, axis=-1).astype(
            out_ref.dtype)


def _phase_combine_conv1(w1):
    """Fold nearest-2x-upsample + 3x3 conv into four 2x2 phase kernels."""
    # comb[a, u, r]: which rows r of the 3x3 kernel land on phase-a tap u.
    comb = jnp.array([[[1.0, 0.0, 0.0], [0.0, 1.0, 1.0]],
                      [[1.0, 1.0, 0.0], [0.0, 0.0, 1.0]]], dtype=jnp.float32)
    w1p = jnp.einsum("aur,bvs,rsio->abuvio", comb, comb,
                     w1.astype(jnp.float32))
    return w1p.reshape(16, w1.shape[2], w1.shape[3])


def _vmem_bytes_estimate(th, W, Cin, Cout, csize):
    """Rough per-grid-step VMEM footprint (for tile selection / vmem limit)."""
    return int(
        2 * (th + 4) * (W + 2) * Cin * csize          # input block (dbl buffered)
        + 2 * th * 2 * W * 2 * Cout * 4               # output block (f32, dbl buf)
        + 4 * (th + 2) * (W + 2) * Cout * csize       # phase-intermediate scratch
        + 12 * (th + 2) * W * Cout * csize            # column-shifted copies of it
        + 3 * (th + 4) * W * Cin * csize              # column-shifted copies of x
        + 2 * (17 * Cin + 9 * Cout) * Cout * csize    # weights (dbl buffered)
        + 6 * Cout * 4                                # biases
        + 8 * th * W * Cout * 4                       # f32 accumulators / temps
    )


@functools.partial(jax.jit, static_argnames=("tile_rows", "compute_dtype"))
def basic_block_up(x_nchw, params, *, tile_rows=None,
                   compute_dtype=jnp.bfloat16):
    """BasicBlockUp forward. x_nchw: (N, Cin, H, W) f32 -> (N, Cout, 2H, 2W)."""
    w1, b1 = params["w1"], params["b1"]      # (3,3,Cin,Cout), (Cout,)
    w2, b2 = params["w2"], params["b2"]      # (3,3,Cout,Cout), (Cout,)
    ws, bs = params["ws"], params["bs"]      # (Cin,Cout), (Cout,)
    Cout = w1.shape[-1]

    x = jnp.transpose(x_nchw, (0, 2, 3, 1))                  # NHWC, C -> lanes
    N, H, W, Cin = x.shape
    csize = np.dtype(compute_dtype).itemsize

    if tile_rows is None:
        # Largest divisor of H whose per-step footprint stays well under the
        # smallest default scoped-VMEM budget (v5e: 16 MiB).
        budget = 12 * 2**20
        tile_rows = 1
        for d in range(H, 0, -1):
            if H % d == 0 and _vmem_bytes_estimate(d, W, Cin, Cout,
                                                   csize) <= budget:
                tile_rows = d
                break
    assert H % tile_rows == 0, "tile_rows must divide H"
    TH = tile_rows
    num_tiles = H // TH

    # Original-resolution input, zero-padded by 2 rows / 1 column per side,
    # then split into per-tile row windows (TH + 4 rows, incl. 2-row halos).
    xg = jnp.pad(x, ((0, 0), (2, 2), (1, 1), (0, 0))).astype(compute_dtype)
    row0 = np.arange(num_tiles) * TH
    idx = row0[:, None] + np.arange(TH + 4)[None, :]          # (T, TH+4)
    xt = xg[:, idx]                                           # (N,T,TH+4,W+2,Cin)

    w1p = _phase_combine_conv1(w1).astype(compute_dtype)      # (16, Cin, Cout)
    w2r = w2.reshape(9, Cout, Cout).astype(compute_dtype)
    wsr = ws.astype(compute_dtype)
    b1r = b1.reshape(1, Cout).astype(jnp.float32)
    b2r = b2.reshape(1, Cout).astype(jnp.float32)
    bsr = bs.reshape(1, Cout).astype(jnp.float32)

    vmem_limit = int(min(64 * 2**20,
                         max(16 * 2**20,
                             2 * _vmem_bytes_estimate(TH, W, Cin, Cout,
                                                      csize))))

    out5 = pl.pallas_call(
        _block_up_kernel,
        out_shape=jax.ShapeDtypeStruct((N, H, 2, W, 2 * Cout), jnp.float32),
        grid=(num_tiles, N),
        in_specs=[
            pl.BlockSpec((1, 1, TH + 4, W + 2, Cin),
                         lambda t, n: (n, t, 0, 0, 0)),
            pl.BlockSpec((16, Cin, Cout), lambda t, n: (0, 0, 0)),
            pl.BlockSpec((9, Cout, Cout), lambda t, n: (0, 0, 0)),
            pl.BlockSpec((Cin, Cout), lambda t, n: (0, 0)),
            pl.BlockSpec((1, Cout), lambda t, n: (0, 0)),
            pl.BlockSpec((1, Cout), lambda t, n: (0, 0)),
            pl.BlockSpec((1, Cout), lambda t, n: (0, 0)),
        ],
        out_specs=pl.BlockSpec((1, TH, 2, W, 2 * Cout),
                               lambda t, n: (n, t, 0, 0, 0)),
        scratch_shapes=[
            pltpu.VMEM((2, 2, TH + 2, W + 2, Cout), compute_dtype),
        ],
        compiler_params=pltpu.CompilerParams(
            dimension_semantics=("parallel", "parallel"),
            vmem_limit_bytes=vmem_limit,
        ),
    )(xt, w1p, w2r, wsr, b1r, b2r, bsr)

    # (N, H, 2, W, 2*Cout) row-major == (N, 2H, 2W, Cout): interleave is free.
    out = out5.reshape(N, 2 * H, 2 * W, Cout)
    return jnp.transpose(out, (0, 3, 1, 2))                   # back to NCHW


def basic_block_up_ref(x_nchw, params):
    """Pure-JAX reference (mirrors the PyTorch forward) for verification."""
    x = jnp.transpose(x_nchw, (0, 2, 3, 1))
    Cin = x.shape[-1]
    Cout = params["w1"].shape[-1]
    up = lambda t: jnp.repeat(jnp.repeat(t, 2, axis=1), 2, axis=2)
    dn = ("NHWC", "HWIO", "NHWC")

    h = jax.lax.conv_general_dilated(up(jax.nn.relu(x)), params["w1"],
                                     (1, 1), [(1, 1), (1, 1)],
                                     dimension_numbers=dn) + params["b1"]
    h = jax.lax.conv_general_dilated(h, params["w2"],
                                     (1, 1), [(1, 1), (1, 1)],
                                     dimension_numbers=dn) + params["b2"]
    sc = jax.lax.conv_general_dilated(up(x),
                                      params["ws"].reshape(1, 1, Cin, Cout),
                                      (1, 1), [(0, 0), (0, 0)],
                                      dimension_numbers=dn) + params["bs"]
    return jnp.transpose(h + sc, (0, 3, 1, 2))


def init_params(key, inplanes, outplanes):
    k1, k2, k3, k4, k5, k6 = jax.random.split(key, 6)
    s1 = 1.0 / np.sqrt(inplanes * 9)
    s2 = 1.0 / np.sqrt(outplanes * 9)
    s3 = 1.0 / np.sqrt(inplanes)
    return {
        "w1": jax.random.uniform(k1, (3, 3, inplanes, outplanes), jnp.float32, -s1, s1),
        "b1": jax.random.uniform(k2, (outplanes,), jnp.float32, -s1, s1),
        "w2": jax.random.uniform(k3, (3, 3, outplanes, outplanes), jnp.float32, -s2, s2),
        "b2": jax.random.uniform(k4, (outplanes,), jnp.float32, -s2, s2),
        "ws": jax.random.uniform(k5, (inplanes, outplanes), jnp.float32, -s3, s3),
        "bs": jax.random.uniform(k6, (outplanes,), jnp.float32, -s3, s3),
    }


if __name__ == "__main__":
    key = jax.random.PRNGKey(0)
    kx, kp = jax.random.split(key)

    N, Cin, Cout, H, W = 2, 4, 8, 16, 16
    x = jax.random.normal(kx, (N, Cin, H, W), jnp.float32)
    params = init_params(kp, Cin, Cout)

    ref = jax.block_until_ready(basic_block_up_ref(x, params))

    # float32 compute, 4 row tiles (exercises interior + border halo logic).
    out_f32 = jax.block_until_ready(
        basic_block_up(x, params, tile_rows=4, compute_dtype=jnp.float32))
    np.testing.assert_allclose(np.asarray(out_f32), np.asarray(ref),
                               rtol=1e-4, atol=1e-4)

    # float32 compute, auto tile selection (single tile at this size).
    out_auto = jax.block_until_ready(
        basic_block_up(x, params, compute_dtype=jnp.float32))
    np.testing.assert_allclose(np.asarray(out_auto), np.asarray(ref),
                               rtol=1e-4, atol=1e-4)

    # default bf16 MXU path (looser tolerance: operand precision changes).
    out_bf16 = jax.block_until_ready(basic_block_up(x, params, tile_rows=8))
    np.testing.assert_allclose(np.asarray(out_bf16), np.asarray(ref),
                               rtol=5e-2, atol=8e-2)

    assert out_f32.shape == (N, Cout, 2 * H, 2 * W)
    print("KERNEL_OK")
</pallas_src>

<mosaic_0001>
module attributes {stable_mosaic.version = 11 : i64} {
  func.func @_block_up_kernel(%arg0: i32, %arg1: i32, %arg2: memref<1x1x8x18x4xf32, #tpu.memory_space<vmem>>, %arg3: memref<16x4x8xf32, #tpu.memory_space<vmem>>, %arg4: memref<9x8x8xf32, #tpu.memory_space<vmem>>, %arg5: memref<4x8xf32, #tpu.memory_space<vmem>>, %arg6: memref<1x8xf32, #tpu.memory_space<vmem>>, %arg7: memref<1x8xf32, #tpu.memory_space<vmem>>, %arg8: memref<1x8xf32, #tpu.memory_space<vmem>>, %arg9: memref<1x4x2x16x16xf32, #tpu.memory_space<vmem>>, %arg10: memref<2x2x6x18x8xf32, #tpu.memory_space<vmem>>) attributes {dimension_semantics = [#tpu.dimension_semantics<parallel>, #tpu.dimension_semantics<parallel>], iteration_bounds = array<i64: 4, 2>, scalar_prefetch = 0 : i64, scratch_operands = 1 : i64, tpu.core_type = #tpu.core_type<tc>, window_params = [{transform_indices = @transform_0, window_bounds = array<i64: 1, 1, 8, 18, 4>}, {pipeline_mode = #tpu.pipeline_mode<synchronous>, transform_indices = @transform_1, window_bounds = array<i64: 16, 4, 8>}, {pipeline_mode = #tpu.pipeline_mode<synchronous>, transform_indices = @transform_2, window_bounds = array<i64: 9, 8, 8>}, {pipeline_mode = #tpu.pipeline_mode<synchronous>, transform_indices = @transform_3, window_bounds = array<i64: 4, 8>}, {pipeline_mode = #tpu.pipeline_mode<synchronous>, transform_indices = @transform_4, window_bounds = array<i64: 1, 8>}, {pipeline_mode = #tpu.pipeline_mode<synchronous>, transform_indices = @transform_5, window_bounds = array<i64: 1, 8>}, {pipeline_mode = #tpu.pipeline_mode<synchronous>, transform_indices = @transform_6, window_bounds = array<i64: 1, 8>}, {transform_indices = @transform_7, window_bounds = array<i64: 1, 4, 2, 16, 16>}]} {
    %c0 = arith.constant 0 : index
    %c0_0 = arith.constant 0 : index
    %c0_1 = arith.constant 0 : index
    %c0_2 = arith.constant 0 : index
    %c0_3 = arith.constant 0 : index
    %0 = vector.load %arg2[%c0, %c0_0, %c0_1, %c0_2, %c0_3] : memref<1x1x8x18x4xf32, #tpu.memory_space<vmem>>, vector<1x1x8x18x4xf32>
    %1 = vector.shape_cast %0 : vector<1x1x8x18x4xf32> to vector<8x18x4xf32>
    %cst = arith.constant 0.000000e+00 : f32
    %2 = vector.broadcast %cst : f32 to vector<8x18x4xf32>
    %3 = arith.maximumf %1, %2 : vector<8x18x4xf32>
    %4 = vector.extract_strided_slice %3 {offsets = [0, 0, 0], sizes = [8, 16, 4], strides = [1, 1, 1]} : vector<8x18x4xf32> to vector<8x16x4xf32>
    %5 = vector.extract_strided_slice %3 {offsets = [0, 1, 0], sizes = [8, 16, 4], strides = [1, 1, 1]} : vector<8x18x4xf32> to vector<8x16x4xf32>
    %6 = vector.extract_strided_slice %3 {offsets = [0, 2, 0], sizes = [8, 16, 4], strides = [1, 1, 1]} : vector<8x18x4xf32> to vector<8x16x4xf32>
    %c0_4 = arith.constant 0 : index
    %c0_5 = arith.constant 0 : index
    %7 = vector.load %arg6[%c0_4, %c0_5] : memref<1x8xf32, #tpu.memory_space<vmem>>, vector<1x8xf32>
    %cst_6 = arith.constant 0.000000e+00 : f32
    %8 = vector.broadcast %cst_6 : f32 to vector<96x8xf32>
    %c0_7 = arith.constant 0 : index
    %c0_8 = arith.constant 0 : index
    %c0_9 = arith.constant 0 : index
    %9 = vector.load %arg3[%c0_7, %c0_8, %c0_9] : memref<16x4x8xf32, #tpu.memory_space<vmem>>, vector<1x4x8xf32>
    %10 = vector.shape_cast %9 : vector<1x4x8xf32> to vector<4x8xf32>
    %11 = vector.extract_strided_slice %4 {offsets = [0, 0, 0], sizes = [6, 16, 4], strides = [1, 1, 1]} : vector<8x16x4xf32> to vector<6x16x4xf32>
    %12 = vector.shape_cast %11 : vector<6x16x4xf32> to vector<96x4xf32>
    %cst_10 = arith.constant dense<0.000000e+00> : vector<96x8xf32>
    %13 = tpu.matmul %12, %10, %cst_10 {dimension_numbers = #tpu.dot_dimension_numbers<[1], [0], [0], [1], [0, 0, 1, 1], [], []>} : vector<96x4xf32>, vector<4x8xf32>, vector<96x8xf32> -> vector<96x8xf32>
    %14 = arith.addf %8, %13 : vector<96x8xf32>
    %c1 = arith.constant 1 : index
    %c0_11 = arith.constant 0 : index
    %c0_12 = arith.constant 0 : index
    %15 = vector.load %arg3[%c1, %c0_11, %c0_12] : memref<16x4x8xf32, #tpu.memory_space<vmem>>, vector<1x4x8xf32>
    %16 = vector.shape_cast %15 : vector<1x4x8xf32> to vector<4x8xf32>
    %17 = vector.extract_strided_slice %5 {offsets = [0, 0, 0], sizes = [6, 16, 4], strides = [1, 1, 1]} : vector<8x16x4xf32> to vector<6x16x4xf32>
    %18 = vector.shape_cast %17 : vector<6x16x4xf32> to vector<96x4xf32>
    %cst_13 = arith.constant dense<0.000000e+00> : vector<96x8xf32>
    %19 = tpu.matmul %18, %16, %cst_13 {dimension_numbers = #tpu.dot_dimension_numbers<[1], [0], [0], [1], [0, 0, 1, 1], [], []>} : vector<96x4xf32>, vector<4x8xf32>, vector<96x8xf32> -> vector<96x8xf32>
    %20 = arith.addf %14, %19 : vector<96x8xf32>
    %c2 = arith.constant 2 : index
    %c0_14 = arith.constant 0 : index
    %c0_15 = arith.constant 0 : index
    %21 = vector.load %arg3[%c2, %c0_14, %c0_15] : memref<16x4x8xf32, #tpu.memory_space<vmem>>, vector<1x4x8xf32>
    %22 = vector.shape_cast %21 : vector<1x4x8xf32> to vector<4x8xf32>
    %23 = vector.extract_strided_slice %4 {offsets = [1, 0, 0], sizes = [6, 16, 4], strides = [1, 1, 1]} : vector<8x16x4xf32> to vector<6x16x4xf32>
    %24 = vector.shape_cast %23 : vector<6x16x4xf32> to vector<96x4xf32>
    %cst_16 = arith.constant dense<0.000000e+00> : vector<96x8xf32>
    %25 = tpu.matmul %24, %22, %cst_16 {dimension_numbers = #tpu.dot_dimension_numbers<[1], [0], [0], [1], [0, 0, 1, 1], [], []>} : vector<96x4xf32>, vector<4x8xf32>, vector<96x8xf32> -> vector<96x8xf32>
    %26 = arith.addf %20, %25 : vector<96x8xf32>
    %c3 = arith.constant 3 : index
    %c0_17 = arith.constant 0 : index
    %c0_18 = arith.constant 0 : index
    %27 = vector.load %arg3[%c3, %c0_17, %c0_18] : memref<16x4x8xf32, #tpu.memory_space<vmem>>, vector<1x4x8xf32>
    %28 = vector.shape_cast %27 : vector<1x4x8xf32> to vector<4x8xf32>
    %29 = vector.extract_strided_slice %5 {offsets = [1, 0, 0], sizes = [6, 16, 4], strides = [1, 1, 1]} : vector<8x16x4xf32> to vector<6x16x4xf32>
    %30 = vector.shape_cast %29 : vector<6x16x4xf32> to vector<96x4xf32>
    %cst_19 = arith.constant dense<0.000000e+00> : vector<96x8xf32>
    %31 = tpu.matmul %30, %28, %cst_19 {dimension_numbers = #tpu.dot_dimension_numbers<[1], [0], [0], [1], [0, 0, 1, 1], [], []>} : vector<96x4xf32>, vector<4x8xf32>, vector<96x8xf32> -> vector<96x8xf32>
    %32 = arith.addf %26, %31 : vector<96x8xf32>
    %33 = vector.broadcast %7 : vector<1x8xf32> to vector<96x8xf32>
    %34 = arith.addf %32, %33 : vector<96x8xf32>
    %35 = vector.shape_cast %34 : vector<96x8xf32> to vector<6x16x8xf32>
    %c0_20 = arith.constant 0 : index
    %c0_21 = arith.constant 0 : index
    %c0_22 = arith.constant 0 : index
    %c1_23 = arith.constant 1 : index
    %c0_24 = arith.constant 0 : index
    %36 = vector.load %arg10[%c0_20, %c0_21, %c0_22, %c1_23, %c0_24] : memref<2x2x6x18x8xf32, #tpu.memory_space<vmem>>, vector<1x1x6x16x8xf32>
    %37 = vector.shape_cast %36 : vector<1x1x6x16x8xf32> to vector<6x16x8xf32>
    %38 = vector.shape_cast %35 : vector<6x16x8xf32> to vector<1x1x6x16x8xf32>
    tpu.vector_store %arg10[%c0_20, %c0_21, %c0_22, %c1_23, %c0_24], %38 {strides = array<i32>} : memref<2x2x6x18x8xf32, #tpu.memory_space<vmem>>, vector<1x1x6x16x8xf32>,
    %cst_25 = arith.constant 0.000000e+00 : f32
    %39 = vector.broadcast %cst_25 : f32 to vector<6x1x8xf32>
    %c0_26 = arith.constant 0 : index
    %c0_27 = arith.constant 0 : index
    %c0_28 = arith.constant 0 : index
    %c0_29 = arith.constant 0 : index
    %c0_30 = arith.constant 0 : index
    %40 = vector.load %arg10[%c0_26, %c0_27, %c0_28, %c0_29, %c0_30] : memref<2x2x6x18x8xf32, #tpu.memory_space<vmem>>, vector<1x1x6x1x8xf32>
    %41 = vector.shape_cast %40 : vector<1x1x6x1x8xf32> to vector<6x1x8xf32>
    %42 = vector.shape_cast %39 : vector<6x1x8xf32> to vector<1x1x6x1x8xf32>
    tpu.vector_store %arg10[%c0_26, %c0_27, %c0_28, %c0_29, %c0_30], %42 {strides = array<i32>} : memref<2x2x6x18x8xf32, #tpu.memory_space<vmem>>, vector<1x1x6x1x8xf32>,
    %cst_31 = arith.constant 0.000000e+00 : f32
    %43 = vector.broadcast %cst_31 : f32 to vector<6x1x8xf32>
    %c0_32 = arith.constant 0 : index
    %c0_33 = arith.constant 0 : index
    %c0_34 = arith.constant 0 : index
    %c17 = arith.constant 17 : index
    %c0_35 = arith.constant 0 : index
    %44 = vector.load %arg10[%c0_32, %c0_33, %c0_34, %c17, %c0_35] : memref<2x2x6x18x8xf32, #tpu.memory_space<vmem>>, vector<1x1x6x1x8xf32>
    %45 = vector.shape_cast %44 : vector<1x1x6x1x8xf32> to vector<6x1x8xf32>
    %46 = vector.shape_cast %43 : vector<6x1x8xf32> to vector<1x1x6x1x8xf32>
    tpu.vector_store %arg10[%c0_32, %c0_33, %c0_34, %c17, %c0_35], %46 {strides = array<i32>} : memref<2x2x6x18x8xf32, #tpu.memory_space<vmem>>, vector<1x1x6x1x8xf32>,
    %cst_36 = arith.constant 0.000000e+00 : f32
    %47 = vector.broadcast %cst_36 : f32 to vector<96x8xf32>
    %c4 = arith.constant 4 : index
    %c0_37 = arith.constant 0 : index
    %c0_38 = arith.constant 0 : index
    %48 = vector.load %arg3[%c4, %c0_37, %c0_38] : memref<16x4x8xf32, #tpu.memory_space<vmem>>, vector<1x4x8xf32>
    %49 = vector.shape_cast %48 : vector<1x4x8xf32> to vector<4x8xf32>
    %50 = vector.extract_strided_slice %5 {offsets = [0, 0, 0], sizes = [6, 16, 4], strides = [1, 1, 1]} : vector<8x16x4xf32> to vector<6x16x4xf32>
    %51 = vector.shape_cast %50 : vector<6x16x4xf32> to vector<96x4xf32>
    %cst_39 = arith.constant dense<0.000000e+00> : vector<96x8xf32>
    %52 = tpu.matmul %51, %49, %cst_39 {dimension_numbers = #tpu.dot_dimension_numbers<[1], [0], [0], [1], [0, 0, 1, 1], [], []>} : vector<96x4xf32>, vector<4x8xf32>, vector<96x8xf32> -> vector<96x8xf32>
    %53 = arith.addf %47, %52 : vector<96x8xf32>
    %c5 = arith.constant 5 : index
    %c0_40 = arith.constant 0 : index
    %c0_41 = arith.constant 0 : index
    %54 = vector.load %arg3[%c5, %c0_40, %c0_41] : memref<16x4x8xf32, #tpu.memory_space<vmem>>, vector<1x4x8xf32>
    %55 = vector.shape_cast %54 : vector<1x4x8xf32> to vector<4x8xf32>
    %56 = vector.extract_strided_slice %6 {offsets = [0, 0, 0], sizes = [6, 16, 4], strides = [1, 1, 1]} : vector<8x16x4xf32> to vector<6x16x4xf32>
    %57 = vector.shape_cast %56 : vector<6x16x4xf32> to vector<96x4xf32>
    %cst_42 = arith.constant dense<0.000000e+00> : vector<96x8xf32>
    %58 = tpu.matmul %57, %55, %cst_42 {dimension_numbers = #tpu.dot_dimension_numbers<[1], [0], [0], [1], [0, 0, 1, 1], [], []>} : vector<96x4xf32>, vector<4x8xf32>, vector<96x8xf32> -> vector<96x8xf32>
    %59 = arith.addf %53, %58 : vector<96x8xf32>
    %c6 = arith.constant 6 : index
    %c0_43 = arith.constant 0 : index
    %c0_44 = arith.constant 0 : index
    %60 = vector.load %arg3[%c6, %c0_43, %c0_44] : memref<16x4x8xf32, #tpu.memory_space<vmem>>, vector<1x4x8xf32>
    %61 = vector.shape_cast %60 : vector<1x4x8xf32> to vector<4x8xf32>
    %62 = vector.extract_strided_slice %5 {offsets = [1, 0, 0], sizes = [6, 16, 4], strides = [1, 1, 1]} : vector<8x16x4xf32> to vector<6x16x4xf32>
    %63 = vector.shape_cast %62 : vector<6x16x4xf32> to vector<96x4xf32>
    %cst_45 = arith.constant dense<0.000000e+00> : vector<96x8xf32>
    %64 = tpu.matmul %63, %61, %cst_45 {dimension_numbers = #tpu.dot_dimension_numbers<[1], [0], [0], [1], [0, 0, 1, 1], [], []>} : vector<96x4xf32>, vector<4x8xf32>, vector<96x8xf32> -> vector<96x8xf32>
    %65 = arith.addf %59, %64 : vector<96x8xf32>
    %c7 = arith.constant 7 : index
    %c0_46 = arith.constant 0 : index
    %c0_47 = arith.constant 0 : index
    %66 = vector.load %arg3[%c7, %c0_46, %c0_47] : memref<16x4x8xf32, #tpu.memory_space<vmem>>, vector<1x4x8xf32>
    %67 = vector.shape_cast %66 : vector<1x4x8xf32> to vector<4x8xf32>
    %68 = vector.extract_strided_slice %6 {offsets = [1, 0, 0], sizes = [6, 16, 4], strides = [1, 1, 1]} : vector<8x16x4xf32> to vector<6x16x4xf32>
    %69 = vector.shape_cast %68 : vector<6x16x4xf32> to vector<96x4xf32>
    %cst_48 = arith.constant dense<0.000000e+00> : vector<96x8xf32>
    %70 = tpu.matmul %69, %67, %cst_48 {dimension_numbers = #tpu.dot_dimension_numbers<[1], [0], [0], [1], [0, 0, 1, 1], [], []>} : vector<96x4xf32>, vector<4x8xf32>, vector<96x8xf32> -> vector<96x8xf32>
    %71 = arith.addf %65, %70 : vector<96x8xf32>
    %72 = vector.broadcast %7 : vector<1x8xf32> to vector<96x8xf32>
    %73 = arith.addf %71, %72 : vector<96x8xf32>
    %74 = vector.shape_cast %73 : vector<96x8xf32> to vector<6x16x8xf32>
    %c0_49 = arith.constant 0 : index
    %c1_50 = arith.constant 1 : index
    %c0_51 = arith.constant 0 : index
    %c1_52 = arith.constant 1 : index
    %c0_53 = arith.constant 0 : index
    %75 = vector.load %arg10[%c0_49, %c1_50, %c0_51, %c1_52, %c0_53] : memref<2x2x6x18x8xf32, #tpu.memory_space<vmem>>, vector<1x1x6x16x8xf32>
    %76 = vector.shape_cast %75 : vector<1x1x6x16x8xf32> to vector<6x16x8xf32>
    %77 = vector.shape_cast %74 : vector<6x16x8xf32> to vector<1x1x6x16x8xf32>
    tpu.vector_store %arg10[%c0_49, %c1_50, %c0_51, %c1_52, %c0_53], %77 {strides = array<i32>} : memref<2x2x6x18x8xf32, #tpu.memory_space<vmem>>, vector<1x1x6x16x8xf32>,
    %cst_54 = arith.constant 0.000000e+00 : f32
    %78 = vector.broadcast %cst_54 : f32 to vector<6x1x8xf32>
    %c0_55 = arith.constant 0 : index
    %c1_56 = arith.constant 1 : index
    %c0_57 = arith.constant 0 : index
    %c0_58 = arith.constant 0 : index
    %c0_59 = arith.constant 0 : index
    %79 = vector.load %arg10[%c0_55, %c1_56, %c0_57, %c0_58, %c0_59] : memref<2x2x6x18x8xf32, #tpu.memory_space<vmem>>, vector<1x1x6x1x8xf32>
    %80 = vector.shape_cast %79 : vector<1x1x6x1x8xf32> to vector<6x1x8xf32>
    %81 = vector.shape_cast %78 : vector<6x1x8xf32> to vector<1x1x6x1x8xf32>
    tpu.vector_store %arg10[%c0_55, %c1_56, %c0_57, %c0_58, %c0_59], %81 {strides = array<i32>} : memref<2x2x6x18x8xf32, #tpu.memory_space<vmem>>, vector<1x1x6x1x8xf32>,
    %cst_60 = arith.constant 0.000000e+00 : f32
    %82 = vector.broadcast %cst_60 : f32 to vector<6x1x8xf32>
    %c0_61 = arith.constant 0 : index
    %c1_62 = arith.constant 1 : index
    %c0_63 = arith.constant 0 : index
    %c17_64 = arith.constant 17 : index
    %c0_65 = arith.constant 0 : index
    %83 = vector.load %arg10[%c0_61, %c1_62, %c0_63, %c17_64, %c0_65] : memref<2x2x6x18x8xf32, #tpu.memory_space<vmem>>, vector<1x1x6x1x8xf32>
    %84 = vector.shape_cast %83 : vector<1x1x6x1x8xf32> to vector<6x1x8xf32>
    %85 = vector.shape_cast %82 : vector<6x1x8xf32> to vector<1x1x6x1x8xf32>
    tpu.vector_store %arg10[%c0_61, %c1_62, %c0_63, %c17_64, %c0_65], %85 {strides = array<i32>} : memref<2x2x6x18x8xf32, #tpu.memory_space<vmem>>, vector<1x1x6x1x8xf32>,
    %cst_66 = arith.constant 0.000000e+00 : f32
    %86 = vector.broadcast %cst_66 : f32 to vector<96x8xf32>
    %c8 = arith.constant 8 : index
    %c0_67 = arith.constant 0 : index
    %c0_68 = arith.constant 0 : index
    %87 = vector.load %arg3[%c8, %c0_67, %c0_68] : memref<16x4x8xf32, #tpu.memory_space<vmem>>, vector<1x4x8xf32>
    %88 = vector.shape_cast %87 : vector<1x4x8xf32> to vector<4x8xf32>
    %89 = vector.extract_strided_slice %4 {offsets = [1, 0, 0], sizes = [6, 16, 4], strides = [1, 1, 1]} : vector<8x16x4xf32> to vector<6x16x4xf32>
    %90 = vector.shape_cast %89 : vector<6x16x4xf32> to vector<96x4xf32>
    %cst_69 = arith.constant dense<0.000000e+00> : vector<96x8xf32>
    %91 = tpu.matmul %90, %88, %cst_69 {dimension_numbers = #tpu.dot_dimension_numbers<[1], [0], [0], [1], [0, 0, 1, 1], [], []>} : vector<96x4xf32>, vector<4x8xf32>, vector<96x8xf32> -> vector<96x8xf32>
    %92 = arith.addf %86, %91 : vector<96x8xf32>
    %c9 = arith.constant 9 : index
    %c0_70 = arith.constant 0 : index
    %c0_71 = arith.constant 0 : index
    %93 = vector.load %arg3[%c9, %c0_70, %c0_71] : memref<16x4x8xf32, #tpu.memory_space<vmem>>, vector<1x4x8xf32>
    %94 = vector.shape_cast %93 : vector<1x4x8xf32> to vector<4x8xf32>
    %95 = vector.extract_strided_slice %5 {offsets = [1, 0, 0], sizes = [6, 16, 4], strides = [1, 1, 1]} : vector<8x16x4xf32> to vector<6x16x4xf32>
    %96 = vector.shape_cast %95 : vector<6x16x4xf32> to vector<96x4xf32>
    %cst_72 = arith.constant dense<0.000000e+00> : vector<96x8xf32>
    %97 = tpu.matmul %96, %94, %cst_72 {dimension_numbers = #tpu.dot_dimension_numbers<[1], [0], [0], [1], [0, 0, 1, 1], [], []>} : vector<96x4xf32>, vector<4x8xf32>, vector<96x8xf32> -> vector<96x8xf32>
    %98 = arith.addf %92, %97 : vector<96x8xf32>
    %c10 = arith.constant 10 : index
    %c0_73 = arith.constant 0 : index
    %c0_74 = arith.constant 0 : index
    %99 = vector.load %arg3[%c10, %c0_73, %c0_74] : memref<16x4x8xf32, #tpu.memory_space<vmem>>, vector<1x4x8xf32>
    %100 = vector.shape_cast %99 : vector<1x4x8xf32> to vector<4x8xf32>
    %101 = vector.extract_strided_slice %4 {offsets = [2, 0, 0], sizes = [6, 16, 4], strides = [1, 1, 1]} : vector<8x16x4xf32> to vector<6x16x4xf32>
    %102 = vector.shape_cast %101 : vector<6x16x4xf32> to vector<96x4xf32>
    %cst_75 = arith.constant dense<0.000000e+00> : vector<96x8xf32>
    %103 = tpu.matmul %102, %100, %cst_75 {dimension_numbers = #tpu.dot_dimension_numbers<[1], [0], [0], [1], [0, 0, 1, 1], [], []>} : vector<96x4xf32>, vector<4x8xf32>, vector<96x8xf32> -> vector<96x8xf32>
    %104 = arith.addf %98, %103 : vector<96x8xf32>
    %c11 = arith.constant 11 : index
    %c0_76 = arith.constant 0 : index
    %c0_77 = arith.constant 0 : index
    %105 = vector.load %arg3[%c11, %c0_76, %c0_77] : memref<16x4x8xf32, #tpu.memory_space<vmem>>, vector<1x4x8xf32>
    %106 = vector.shape_cast %105 : vector<1x4x8xf32> to vector<4x8xf32>
    %107 = vector.extract_strided_slice %5 {offsets = [2, 0, 0], sizes = [6, 16, 4], strides = [1, 1, 1]} : vector<8x16x4xf32> to vector<6x16x4xf32>
    %108 = vector.shape_cast %107 : vector<6x16x4xf32> to vector<96x4xf32>
    %cst_78 = arith.constant dense<0.000000e+00> : vector<96x8xf32>
    %109 = tpu.matmul %108, %106, %cst_78 {dimension_numbers = #tpu.dot_dimension_numbers<[1], [0], [0], [1], [0, 0, 1, 1], [], []>} : vector<96x4xf32>, vector<4x8xf32>, vector<96x8xf32> -> vector<96x8xf32>
    %110 = arith.addf %104, %109 : vector<96x8xf32>
    %111 = vector.broadcast %7 : vector<1x8xf32> to vector<96x8xf32>
    %112 = arith.addf %110, %111 : vector<96x8xf32>
    %113 = vector.shape_cast %112 : vector<96x8xf32> to vector<6x16x8xf32>
    %c1_79 = arith.constant 1 : index
    %c0_80 = arith.constant 0 : index
    %c0_81 = arith.constant 0 : index
    %c1_82 = arith.constant 1 : index
    %c0_83 = arith.constant 0 : index
    %114 = vector.load %arg10[%c1_79, %c0_80, %c0_81, %c1_82, %c0_83] : memref<2x2x6x18x8xf32, #tpu.memory_space<vmem>>, vector<1x1x6x16x8xf32>
    %115 = vector.shape_cast %114 : vector<1x1x6x16x8xf32> to vector<6x16x8xf32>
    %116 = vector.shape_cast %113 : vector<6x16x8xf32> to vector<1x1x6x16x8xf32>
    tpu.vector_store %arg10[%c1_79, %c0_80, %c0_81, %c1_82, %c0_83], %116 {strides = array<i32>} : memref<2x2x6x18x8xf32, #tpu.memory_space<vmem>>, vector<1x1x6x16x8xf32>,
    %cst_84 = arith.constant 0.000000e+00 : f32
    %117 = vector.broadcast %cst_84 : f32 to vector<6x1x8xf32>
    %c1_85 = arith.constant 1 : index
    %c0_86 = arith.constant 0 : index
    %c0_87 = arith.constant 0 : index
    %c0_88 = arith.constant 0 : index
    %c0_89 = arith.constant 0 : index
    %118 = vector.load %arg10[%c1_85, %c0_86, %c0_87, %c0_88, %c0_89] : memref<2x2x6x18x8xf32, #tpu.memory_space<vmem>>, vector<1x1x6x1x8xf32>
    %119 = vector.shape_cast %118 : vector<1x1x6x1x8xf32> to vector<6x1x8xf32>
    %120 = vector.shape_cast %117 : vector<6x1x8xf32> to vector<1x1x6x1x8xf32>
    tpu.vector_store %arg10[%c1_85, %c0_86, %c0_87, %c0_88, %c0_89], %120 {strides = array<i32>} : memref<2x2x6x18x8xf32, #tpu.memory_space<vmem>>, vector<1x1x6x1x8xf32>,
    %cst_90 = arith.constant 0.000000e+00 : f32
    %121 = vector.broadcast %cst_90 : f32 to vector<6x1x8xf32>
    %c1_91 = arith.constant 1 : index
    %c0_92 = arith.constant 0 : index
    %c0_93 = arith.constant 0 : index
    %c17_94 = arith.constant 17 : index
    %c0_95 = arith.constant 0 : index
    %122 = vector.load %arg10[%c1_91, %c0_92, %c0_93, %c17_94, %c0_95] : memref<2x2x6x18x8xf32, #tpu.memory_space<vmem>>, vector<1x1x6x1x8xf32>
    %123 = vector.shape_cast %122 : vector<1x1x6x1x8xf32> to vector<6x1x8xf32>
    %124 = vector.shape_cast %121 : vector<6x1x8xf32> to vector<1x1x6x1x8xf32>
    tpu.vector_store %arg10[%c1_91, %c0_92, %c0_93, %c17_94, %c0_95], %124 {strides = array<i32>} : memref<2x2x6x18x8xf32, #tpu.memory_space<vmem>>, vector<1x1x6x1x8xf32>,
    %cst_96 = arith.constant 0.000000e+00 : f32
    %125 = vector.broadcast %cst_96 : f32 to vector<96x8xf32>
    %c12 = arith.constant 12 : index
    %c0_97 = arith.constant 0 : index
    %c0_98 = arith.constant 0 : index
    %126 = vector.load %arg3[%c12, %c0_97, %c0_98] : memref<16x4x8xf32, #tpu.memory_space<vmem>>, vector<1x4x8xf32>
    %127 = vector.shape_cast %126 : vector<1x4x8xf32> to vector<4x8xf32>
    %128 = vector.extract_strided_slice %5 {offsets = [1, 0, 0], sizes = [6, 16, 4], strides = [1, 1, 1]} : vector<8x16x4xf32> to vector<6x16x4xf32>
    %129 = vector.shape_cast %128 : vector<6x16x4xf32> to vector<96x4xf32>
    %cst_99 = arith.constant dense<0.000000e+00> : vector<96x8xf32>
    %130 = tpu.matmul %129, %127, %cst_99 {dimension_numbers = #tpu.dot_dimension_numbers<[1], [0], [0], [1], [0, 0, 1, 1], [], []>} : vector<96x4xf32>, vector<4x8xf32>, vector<96x8xf32> -> vector<96x8xf32>
    %131 = arith.addf %125, %130 : vector<96x8xf32>
    %c13 = arith.constant 13 : index
    %c0_100 = arith.constant 0 : index
    %c0_101 = arith.constant 0 : index
    %132 = vector.load %arg3[%c13, %c0_100, %c0_101] : memref<16x4x8xf32, #tpu.memory_space<vmem>>, vector<1x4x8xf32>
    %133 = vector.shape_cast %132 : vector<1x4x8xf32> to vector<4x8xf32>
    %134 = vector.extract_strided_slice %6 {offsets = [1, 0, 0], sizes = [6, 16, 4], strides = [1, 1, 1]} : vector<8x16x4xf32> to vector<6x16x4xf32>
    %135 = vector.shape_cast %134 : vector<6x16x4xf32> to vector<96x4xf32>
    %cst_102 = arith.constant dense<0.000000e+00> : vector<96x8xf32>
    %136 = tpu.matmul %135, %133, %cst_102 {dimension_numbers = #tpu.dot_dimension_numbers<[1], [0], [0], [1], [0, 0, 1, 1], [], []>} : vector<96x4xf32>, vector<4x8xf32>, vector<96x8xf32> -> vector<96x8xf32>
    %137 = arith.addf %131, %136 : vector<96x8xf32>
    %c14 = arith.constant 14 : index
    %c0_103 = arith.constant 0 : index
    %c0_104 = arith.constant 0 : index
    %138 = vector.load %arg3[%c14, %c0_103, %c0_104] : memref<16x4x8xf32, #tpu.memory_space<vmem>>, vector<1x4x8xf32>
    %139 = vector.shape_cast %138 : vector<1x4x8xf32> to vector<4x8xf32>
    %140 = vector.extract_strided_slice %5 {offsets = [2, 0, 0], sizes = [6, 16, 4], strides = [1, 1, 1]} : vector<8x16x4xf32> to vector<6x16x4xf32>
    %141 = vector.shape_cast %140 : vector<6x16x4xf32> to vector<96x4xf32>
    %cst_105 = arith.constant dense<0.000000e+00> : vector<96x8xf32>
    %142 = tpu.matmul %141, %139, %cst_105 {dimension_numbers = #tpu.dot_dimension_numbers<[1], [0], [0], [1], [0, 0, 1, 1], [], []>} : vector<96x4xf32>, vector<4x8xf32>, vector<96x8xf32> -> vector<96x8xf32>
    %143 = arith.addf %137, %142 : vector<96x8xf32>
    %c15 = arith.constant 15 : index
    %c0_106 = arith.constant 0 : index
    %c0_107 = arith.constant 0 : index
    %144 = vector.load %arg3[%c15, %c0_106, %c0_107] : memref<16x4x8xf32, #tpu.memory_space<vmem>>, vector<1x4x8xf32>
    %145 = vector.shape_cast %144 : vector<1x4x8xf32> to vector<4x8xf32>
    %146 = vector.extract_strided_slice %6 {offsets = [2, 0, 0], sizes = [6, 16, 4], strides = [1, 1, 1]} : vector<8x16x4xf32> to vector<6x16x4xf32>
    %147 = vector.shape_cast %146 : vector<6x16x4xf32> to vector<96x4xf32>
    %cst_108 = arith.constant dense<0.000000e+00> : vector<96x8xf32>
    %148 = tpu.matmul %147, %145, %cst_108 {dimension_numbers = #tpu.dot_dimension_numbers<[1], [0], [0], [1], [0, 0, 1, 1], [], []>} : vector<96x4xf32>, vector<4x8xf32>, vector<96x8xf32> -> vector<96x8xf32>
    %149 = arith.addf %143, %148 : vector<96x8xf32>
    %150 = vector.broadcast %7 : vector<1x8xf32> to vector<96x8xf32>
    %151 = arith.addf %149, %150 : vector<96x8xf32>
    %152 = vector.shape_cast %151 : vector<96x8xf32> to vector<6x16x8xf32>
    %c1_109 = arith.constant 1 : index
    %c1_110 = arith.constant 1 : index
    %c0_111 = arith.constant 0 : index
    %c1_112 = arith.constant 1 : index
    %c0_113 = arith.constant 0 : index
    %153 = vector.load %arg10[%c1_109, %c1_110, %c0_111, %c1_112, %c0_113] : memref<2x2x6x18x8xf32, #tpu.memory_space<vmem>>, vector<1x1x6x16x8xf32>
    %154 = vector.shape_cast %153 : vector<1x1x6x16x8xf32> to vector<6x16x8xf32>
    %155 = vector.shape_cast %152 : vector<6x16x8xf32> to vector<1x1x6x16x8xf32>
    tpu.vector_store %arg10[%c1_109, %c1_110, %c0_111, %c1_112, %c0_113], %155 {strides = array<i32>} : memref<2x2x6x18x8xf32, #tpu.memory_space<vmem>>, vector<1x1x6x16x8xf32>,
    %cst_114 = arith.constant 0.000000e+00 : f32
    %156 = vector.broadcast %cst_114 : f32 to vector<6x1x8xf32>
    %c1_115 = arith.constant 1 : index
    %c1_116 = arith.constant 1 : index
    %c0_117 = arith.constant 0 : index
    %c0_118 = arith.constant 0 : index
    %c0_119 = arith.constant 0 : index
    %157 = vector.load %arg10[%c1_115, %c1_116, %c0_117, %c0_118, %c0_119] : memref<2x2x6x18x8xf32, #tpu.memory_space<vmem>>, vector<1x1x6x1x8xf32>
    %158 = vector.shape_cast %157 : vector<1x1x6x1x8xf32> to vector<6x1x8xf32>
    %159 = vector.shape_cast %156 : vector<6x1x8xf32> to vector<1x1x6x1x8xf32>
    tpu.vector_store %arg10[%c1_115, %c1_116, %c0_117, %c0_118, %c0_119], %159 {strides = array<i32>} : memref<2x2x6x18x8xf32, #tpu.memory_space<vmem>>, vector<1x1x6x1x8xf32>,
    %cst_120 = arith.constant 0.000000e+00 : f32
    %160 = vector.broadcast %cst_120 : f32 to vector<6x1x8xf32>
    %c1_121 = arith.constant 1 : index
    %c1_122 = arith.constant 1 : index
    %c0_123 = arith.constant 0 : index
    %c17_124 = arith.constant 17 : index
    %c0_125 = arith.constant 0 : index
    %161 = vector.load %arg10[%c1_121, %c1_122, %c0_123, %c17_124, %c0_125] : memref<2x2x6x18x8xf32, #tpu.memory_space<vmem>>, vector<1x1x6x1x8xf32>
    %162 = vector.shape_cast %161 : vector<1x1x6x1x8xf32> to vector<6x1x8xf32>
    %163 = vector.shape_cast %160 : vector<6x1x8xf32> to vector<1x1x6x1x8xf32>
    tpu.vector_store %arg10[%c1_121, %c1_122, %c0_123, %c17_124, %c0_125], %163 {strides = array<i32>} : memref<2x2x6x18x8xf32, #tpu.memory_space<vmem>>, vector<1x1x6x1x8xf32>,
    %c0_i32 = arith.constant 0 : i32
    %164 = arith.cmpi eq, %arg0, %c0_i32 : i32
    %165 = arith.extui %164 : i1 to i32
    %c0_i32_126 = arith.constant 0 : i32
    %166 = arith.cmpi ne, %165, %c0_i32_126 : i32
    scf.if %166 {
      %cst_333 = arith.constant 0.000000e+00 : f32
      %432 = vector.broadcast %cst_333 : f32 to vector<1x18x8xf32>
      %c0_334 = arith.constant 0 : index
      %c0_335 = arith.constant 0 : index
      %c0_336 = arith.constant 0 : index
      %c0_337 = arith.constant 0 : index
      %c0_338 = arith.constant 0 : index
      %433 = vector.load %arg10[%c0_334, %c0_335, %c0_336, %c0_337, %c0_338] : memref<2x2x6x18x8xf32, #tpu.memory_space<vmem>>, vector<1x1x1x18x8xf32>
      %434 = vector.shape_cast %433 : vector<1x1x1x18x8xf32> to vector<1x18x8xf32>
      %435 = vector.shape_cast %432 : vector<1x18x8xf32> to vector<1x1x1x18x8xf32>
      tpu.vector_store %arg10[%c0_334, %c0_335, %c0_336, %c0_337, %c0_338], %435 {strides = array<i32>} : memref<2x2x6x18x8xf32, #tpu.memory_space<vmem>>, vector<1x1x1x18x8xf32>,
      %cst_339 = arith.constant 0.000000e+00 : f32
      %436 = vector.broadcast %cst_339 : f32 to vector<1x18x8xf32>
      %c0_340 = arith.constant 0 : index
      %c1_341 = arith.constant 1 : index
      %c0_342 = arith.constant 0 : index
      %c0_343 = arith.constant 0 : index
      %c0_344 = arith.constant 0 : index
      %437 = vector.load %arg10[%c0_340, %c1_341, %c0_342, %c0_343, %c0_344] : memref<2x2x6x18x8xf32, #tpu.memory_space<vmem>>, vector<1x1x1x18x8xf32>
      %438 = vector.shape_cast %437 : vector<1x1x1x18x8xf32> to vector<1x18x8xf32>
      %439 = vector.shape_cast %436 : vector<1x18x8xf32> to vector<1x1x1x18x8xf32>
      tpu.vector_store %arg10[%c0_340, %c1_341, %c0_342, %c0_343, %c0_344], %439 {strides = array<i32>} : memref<2x2x6x18x8xf32, #tpu.memory_space<vmem>>, vector<1x1x1x18x8xf32>,
      %cst_345 = arith.constant 0.000000e+00 : f32
      %440 = vector.broadcast %cst_345 : f32 to vector<1x18x8xf32>
      %c1_346 = arith.constant 1 : index
      %c0_347 = arith.constant 0 : index
      %c0_348 = arith.constant 0 : index
      %c0_349 = arith.constant 0 : index
      %c0_350 = arith.constant 0 : index
      %441 = vector.load %arg10[%c1_346, %c0_347, %c0_348, %c0_349, %c0_350] : memref<2x2x6x18x8xf32, #tpu.memory_space<vmem>>, vector<1x1x1x18x8xf32>
      %442 = vector.shape_cast %441 : vector<1x1x1x18x8xf32> to vector<1x18x8xf32>
      %443 = vector.shape_cast %440 : vector<1x18x8xf32> to vector<1x1x1x18x8xf32>
      tpu.vector_store %arg10[%c1_346, %c0_347, %c0_348, %c0_349, %c0_350], %443 {strides = array<i32>} : memref<2x2x6x18x8xf32, #tpu.memory_space<vmem>>, vector<1x1x1x18x8xf32>,
      %cst_351 = arith.constant 0.000000e+00 : f32
      %444 = vector.broadcast %cst_351 : f32 to vector<1x18x8xf32>
      %c1_352 = arith.constant 1 : index
      %c1_353 = arith.constant 1 : index
      %c0_354 = arith.constant 0 : index
      %c0_355 = arith.constant 0 : index
      %c0_356 = arith.constant 0 : index
      %445 = vector.load %arg10[%c1_352, %c1_353, %c0_354, %c0_355, %c0_356] : memref<2x2x6x18x8xf32, #tpu.memory_space<vmem>>, vector<1x1x1x18x8xf32>
      %446 = vector.shape_cast %445 : vector<1x1x1x18x8xf32> to vector<1x18x8xf32>
      %447 = vector.shape_cast %444 : vector<1x18x8xf32> to vector<1x1x1x18x8xf32>
      tpu.vector_store %arg10[%c1_352, %c1_353, %c0_354, %c0_355, %c0_356], %447 {strides = array<i32>} : memref<2x2x6x18x8xf32, #tpu.memory_space<vmem>>, vector<1x1x1x18x8xf32>,
    } else {
    }
    %c3_i32 = arith.constant 3 : i32
    %167 = arith.cmpi eq, %arg0, %c3_i32 : i32
    %168 = arith.extui %167 : i1 to i32
    %c0_i32_127 = arith.constant 0 : i32
    %169 = arith.cmpi ne, %168, %c0_i32_127 : i32
    scf.if %169 {
      %cst_333 = arith.constant 0.000000e+00 : f32
      %432 = vector.broadcast %cst_333 : f32 to vector<1x18x8xf32>
      %c0_334 = arith.constant 0 : index
      %c0_335 = arith.constant 0 : index
      %c5_336 = arith.constant 5 : index
      %c0_337 = arith.constant 0 : index
      %c0_338 = arith.constant 0 : index
      %433 = vector.load %arg10[%c0_334, %c0_335, %c5_336, %c0_337, %c0_338] : memref<2x2x6x18x8xf32, #tpu.memory_space<vmem>>, vector<1x1x1x18x8xf32>
      %434 = vector.shape_cast %433 : vector<1x1x1x18x8xf32> to vector<1x18x8xf32>
      %435 = vector.shape_cast %432 : vector<1x18x8xf32> to vector<1x1x1x18x8xf32>
      tpu.vector_store %arg10[%c0_334, %c0_335, %c5_336, %c0_337, %c0_338], %435 {strides = array<i32>} : memref<2x2x6x18x8xf32, #tpu.memory_space<vmem>>, vector<1x1x1x18x8xf32>,
      %cst_339 = arith.constant 0.000000e+00 : f32
      %436 = vector.broadcast %cst_339 : f32 to vector<1x18x8xf32>
      %c0_340 = arith.constant 0 : index
      %c1_341 = arith.constant 1 : index
      %c5_342 = arith.constant 5 : index
      %c0_343 = arith.constant 0 : index
      %c0_344 = arith.constant 0 : index
      %437 = vector.load %arg10[%c0_340, %c1_341, %c5_342, %c0_343, %c0_344] : memref<2x2x6x18x8xf32, #tpu.memory_space<vmem>>, vector<1x1x1x18x8xf32>
      %438 = vector.shape_cast %437 : vector<1x1x1x18x8xf32> to vector<1x18x8xf32>
      %439 = vector.shape_cast %436 : vector<1x18x8xf32> to vector<1x1x1x18x8xf32>
      tpu.vector_store %arg10[%c0_340, %c1_341, %c5_342, %c0_343, %c0_344], %439 {strides = array<i32>} : memref<2x2x6x18x8xf32, #tpu.memory_space<vmem>>, vector<1x1x1x18x8xf32>,
      %cst_345 = arith.constant 0.000000e+00 : f32
      %440 = vector.broadcast %cst_345 : f32 to vector<1x18x8xf32>
      %c1_346 = arith.constant 1 : index
      %c0_347 = arith.constant 0 : index
      %c5_348 = arith.constant 5 : index
      %c0_349 = arith.constant 0 : index
      %c0_350 = arith.constant 0 : index
      %441 = vector.load %arg10[%c1_346, %c0_347, %c5_348, %c0_349, %c0_350] : memref<2x2x6x18x8xf32, #tpu.memory_space<vmem>>, vector<1x1x1x18x8xf32>
      %442 = vector.shape_cast %441 : vector<1x1x1x18x8xf32> to vector<1x18x8xf32>
      %443 = vector.shape_cast %440 : vector<1x18x8xf32> to vector<1x1x1x18x8xf32>
      tpu.vector_store %arg10[%c1_346, %c0_347, %c5_348, %c0_349, %c0_350], %443 {strides = array<i32>} : memref<2x2x6x18x8xf32, #tpu.memory_space<vmem>>, vector<1x1x1x18x8xf32>,
      %cst_351 = arith.constant 0.000000e+00 : f32
      %444 = vector.broadcast %cst_351 : f32 to vector<1x18x8xf32>
      %c1_352 = arith.constant 1 : index
      %c1_353 = arith.constant 1 : index
      %c5_354 = arith.constant 5 : index
      %c0_355 = arith.constant 0 : index
      %c0_356 = arith.constant 0 : index
      %445 = vector.load %arg10[%c1_352, %c1_353, %c5_354, %c0_355, %c0_356] : memref<2x2x6x18x8xf32, #tpu.memory_space<vmem>>, vector<1x1x1x18x8xf32>
      %446 = vector.shape_cast %445 : vector<1x1x1x18x8xf32> to vector<1x18x8xf32>
      %447 = vector.shape_cast %444 : vector<1x18x8xf32> to vector<1x1x1x18x8xf32>
      tpu.vector_store %arg10[%c1_352, %c1_353, %c5_354, %c0_355, %c0_356], %447 {strides = array<i32>} : memref<2x2x6x18x8xf32, #tpu.memory_space<vmem>>, vector<1x1x1x18x8xf32>,
    } else {
    }
    %170 = vector.extract_strided_slice %1 {offsets = [2, 1, 0], sizes = [4, 16, 4], strides = [1, 1, 1]} : vector<8x18x4xf32> to vector<4x16x4xf32>
    %171 = vector.shape_cast %170 : vector<4x16x4xf32> to vector<64x4xf32>
    %c0_128 = arith.constant 0 : index
    %c0_129 = arith.constant 0 : index
    %172 = vector.load %arg5[%c0_128, %c0_129] : memref<4x8xf32, #tpu.memory_space<vmem>>, vector<4x8xf32>
    %cst_130 = arith.constant dense<0.000000e+00> : vector<64x8xf32>
    %173 = tpu.matmul %171, %172, %cst_130 {dimension_numbers = #tpu.dot_dimension_numbers<[1], [0], [0], [1], [0, 0, 1, 1], [], []>} : vector<64x4xf32>, vector<4x8xf32>, vector<64x8xf32> -> vector<64x8xf32>
    %c0_131 = arith.constant 0 : index
    %c0_132 = arith.constant 0 : index
    %174 = vector.load %arg8[%c0_131, %c0_132] : memref<1x8xf32, #tpu.memory_space<vmem>>, vector<1x8xf32>
    %175 = vector.broadcast %174 : vector<1x8xf32> to vector<64x8xf32>
    %176 = arith.addf %173, %175 : vector<64x8xf32>
    %c0_133 = arith.constant 0 : index
    %c0_134 = arith.constant 0 : index
    %177 = vector.load %arg7[%c0_133, %c0_134] : memref<1x8xf32, #tpu.memory_space<vmem>>, vector<1x8xf32>
    %178 = vector.broadcast %177 : vector<1x8xf32> to vector<64x8xf32>
    %179 = arith.addf %176, %178 : vector<64x8xf32>
    %c0_135 = arith.constant 0 : index
    %c0_136 = arith.constant 0 : index
    %c0_137 = arith.constant 0 : index
    %c1_138 = arith.constant 1 : index
    %c0_139 = arith.constant 0 : index
    %180 = vector.load %arg10[%c0_135, %c0_136, %c0_137, %c1_138, %c0_139] : memref<2x2x6x18x8xf32, #tpu.memory_space<vmem>>, vector<1x1x6x16x8xf32>
    %181 = vector.shape_cast %180 : vector<1x1x6x16x8xf32> to vector<6x16x8xf32>
    %c0_140 = arith.constant 0 : index
    %c0_141 = arith.constant 0 : index
    %c0_142 = arith.constant 0 : index
    %c2_143 = arith.constant 2 : index
    %c0_144 = arith.constant 0 : index
    %182 = vector.load %arg10[%c0_140, %c0_141, %c0_142, %c2_143, %c0_144] : memref<2x2x6x18x8xf32, #tpu.memory_space<vmem>>, vector<1x1x6x16x8xf32>
    %183 = vector.shape_cast %182 : vector<1x1x6x16x8xf32> to vector<6x16x8xf32>
    %c0_145 = arith.constant 0 : index
    %c1_146 = arith.constant 1 : index
    %c0_147 = arith.constant 0 : index
    %c0_148 = arith.constant 0 : index
    %c0_149 = arith.constant 0 : index
    %184 = vector.load %arg10[%c0_145, %c1_146, %c0_147, %c0_148, %c0_149] : memref<2x2x6x18x8xf32, #tpu.memory_space<vmem>>, vector<1x1x6x16x8xf32>
    %185 = vector.shape_cast %184 : vector<1x1x6x16x8xf32> to vector<6x16x8xf32>
    %c0_150 = arith.constant 0 : index
    %c1_151 = arith.constant 1 : index
    %c0_152 = arith.constant 0 : index
    %c1_153 = arith.constant 1 : index
    %c0_154 = arith.constant 0 : index
    %186 = vector.load %arg10[%c0_150, %c1_151, %c0_152, %c1_153, %c0_154] : memref<2x2x6x18x8xf32, #tpu.memory_space<vmem>>, vector<1x1x6x16x8xf32>
    %187 = vector.shape_cast %186 : vector<1x1x6x16x8xf32> to vector<6x16x8xf32>
    %c1_155 = arith.constant 1 : index
    %c0_156 = arith.constant 0 : index
    %c0_157 = arith.constant 0 : index
    %c1_158 = arith.constant 1 : index
    %c0_159 = arith.constant 0 : index
    %188 = vector.load %arg10[%c1_155, %c0_156, %c0_157, %c1_158, %c0_159] : memref<2x2x6x18x8xf32, #tpu.memory_space<vmem>>, vector<1x1x6x16x8xf32>
    %189 = vector.shape_cast %188 : vector<1x1x6x16x8xf32> to vector<6x16x8xf32>
    %c1_160 = arith.constant 1 : index
    %c0_161 = arith.constant 0 : index
    %c0_162 = arith.constant 0 : index
    %c2_163 = arith.constant 2 : index
    %c0_164 = arith.constant 0 : index
    %190 = vector.load %arg10[%c1_160, %c0_161, %c0_162, %c2_163, %c0_164] : memref<2x2x6x18x8xf32, #tpu.memory_space<vmem>>, vector<1x1x6x16x8xf32>
    %191 = vector.shape_cast %190 : vector<1x1x6x16x8xf32> to vector<6x16x8xf32>
    %c1_165 = arith.constant 1 : index
    %c1_166 = arith.constant 1 : index
    %c0_167 = arith.constant 0 : index
    %c0_168 = arith.constant 0 : index
    %c0_169 = arith.constant 0 : index
    %192 = vector.load %arg10[%c1_165, %c1_166, %c0_167, %c0_168, %c0_169] : memref<2x2x6x18x8xf32, #tpu.memory_space<vmem>>, vector<1x1x6x16x8xf32>
    %193 = vector.shape_cast %192 : vector<1x1x6x16x8xf32> to vector<6x16x8xf32>
    %c1_170 = arith.constant 1 : index
    %c1_171 = arith.constant 1 : index
    %c0_172 = arith.constant 0 : index
    %c1_173 = arith.constant 1 : index
    %c0_174 = arith.constant 0 : index
    %194 = vector.load %arg10[%c1_170, %c1_171, %c0_172, %c1_173, %c0_174] : memref<2x2x6x18x8xf32, #tpu.memory_space<vmem>>, vector<1x1x6x16x8xf32>
    %195 = vector.shape_cast %194 : vector<1x1x6x16x8xf32> to vector<6x16x8xf32>
    %cst_175 = arith.constant 0.000000e+00 : f32
    %196 = vector.broadcast %cst_175 : f32 to vector<64x8xf32>
    %197 = vector.extract_strided_slice %193 {offsets = [0, 0, 0], sizes = [4, 16, 8], strides = [1, 1, 1]} : vector<6x16x8xf32> to vector<4x16x8xf32>
    %198 = vector.shape_cast %197 : vector<4x16x8xf32> to vector<64x8xf32>
    %c0_176 = arith.constant 0 : index
    %c0_177 = arith.constant 0 : index
    %c0_178 = arith.constant 0 : index
    %199 = vector.load %arg4[%c0_176, %c0_177, %c0_178] : memref<9x8x8xf32, #tpu.memory_space<vmem>>, vector<1x8x8xf32>
    %200 = vector.shape_cast %199 : vector<1x8x8xf32> to vector<8x8xf32>
    %cst_179 = arith.constant dense<0.000000e+00> : vector<64x8xf32>
    %201 = tpu.matmul %198, %200, %cst_179 {dimension_numbers = #tpu.dot_dimension_numbers<[1], [0], [0], [1], [0, 0, 1, 1], [], []>} : vector<64x8xf32>, vector<8x8xf32>, vector<64x8xf32> -> vector<64x8xf32>
    %202 = arith.addf %196, %201 : vector<64x8xf32>
    %203 = vector.extract_strided_slice %189 {offsets = [0, 0, 0], sizes = [4, 16, 8], strides = [1, 1, 1]} : vector<6x16x8xf32> to vector<4x16x8xf32>
    %204 = vector.shape_cast %203 : vector<4x16x8xf32> to vector<64x8xf32>
    %c1_180 = arith.constant 1 : index
    %c0_181 = arith.constant 0 : index
    %c0_182 = arith.constant 0 : index
    %205 = vector.load %arg4[%c1_180, %c0_181, %c0_182] : memref<9x8x8xf32, #tpu.memory_space<vmem>>, vector<1x8x8xf32>
    %206 = vector.shape_cast %205 : vector<1x8x8xf32> to vector<8x8xf32>
    %cst_183 = arith.constant dense<0.000000e+00> : vector<64x8xf32>
    %207 = tpu.matmul %204, %206, %cst_183 {dimension_numbers = #tpu.dot_dimension_numbers<[1], [0], [0], [1], [0, 0, 1, 1], [], []>} : vector<64x8xf32>, vector<8x8xf32>, vector<64x8xf32> -> vector<64x8xf32>
    %208 = arith.addf %202, %207 : vector<64x8xf32>
    %209 = vector.extract_strided_slice %195 {offsets = [0, 0, 0], sizes = [4, 16, 8], strides = [1, 1, 1]} : vector<6x16x8xf32> to vector<4x16x8xf32>
    %210 = vector.shape_cast %209 : vector<4x16x8xf32> to vector<64x8xf32>
    %c2_184 = arith.constant 2 : index
    %c0_185 = arith.constant 0 : index
    %c0_186 = arith.constant 0 : index
    %211 = vector.load %arg4[%c2_184, %c0_185, %c0_186] : memref<9x8x8xf32, #tpu.memory_space<vmem>>, vector<1x8x8xf32>
    %212 = vector.shape_cast %211 : vector<1x8x8xf32> to vector<8x8xf32>
    %cst_187 = arith.constant dense<0.000000e+00> : vector<64x8xf32>
    %213 = tpu.matmul %210, %212, %cst_187 {dimension_numbers = #tpu.dot_dimension_numbers<[1], [0], [0], [1], [0, 0, 1, 1], [], []>} : vector<64x8xf32>, vector<8x8xf32>, vector<64x8xf32> -> vector<64x8xf32>
    %214 = arith.addf %208, %213 : vector<64x8xf32>
    %215 = vector.extract_strided_slice %185 {offsets = [1, 0, 0], sizes = [4, 16, 8], strides = [1, 1, 1]} : vector<6x16x8xf32> to vector<4x16x8xf32>
    %216 = vector.shape_cast %215 : vector<4x16x8xf32> to vector<64x8xf32>
    %c3_188 = arith.constant 3 : index
    %c0_189 = arith.constant 0 : index
    %c0_190 = arith.constant 0 : index
    %217 = vector.load %arg4[%c3_188, %c0_189, %c0_190] : memref<9x8x8xf32, #tpu.memory_space<vmem>>, vector<1x8x8xf32>
    %218 = vector.shape_cast %217 : vector<1x8x8xf32> to vector<8x8xf32>
    %cst_191 = arith.constant dense<0.000000e+00> : vector<64x8xf32>
    %219 = tpu.matmul %216, %218, %cst_191 {dimension_numbers = #tpu.dot_dimension_numbers<[1], [0], [0], [1], [0, 0, 1, 1], [], []>} : vector<64x8xf32>, vector<8x8xf32>, vector<64x8xf32> -> vector<64x8xf32>
    %220 = arith.addf %214, %219 : vector<64x8xf32>
    %221 = vector.extract_strided_slice %181 {offsets = [1, 0, 0], sizes = [4, 16, 8], strides = [1, 1, 1]} : vector<6x16x8xf32> to vector<4x16x8xf32>
    %222 = vector.shape_cast %221 : vector<4x16x8xf32> to vector<64x8xf32>
    %c4_192 = arith.constant 4 : index
    %c0_193 = arith.constant 0 : index
    %c0_194 = arith.constant 0 : index
    %223 = vector.load %arg4[%c4_192, %c0_193, %c0_194] : memref<9x8x8xf32, #tpu.memory_space<vmem>>, vector<1x8x8xf32>
    %224 = vector.shape_cast %223 : vector<1x8x8xf32> to vector<8x8xf32>
    %cst_195 = arith.constant dense<0.000000e+00> : vector<64x8xf32>
    %225 = tpu.matmul %222, %224, %cst_195 {dimension_numbers = #tpu.dot_dimension_numbers<[1], [0], [0], [1], [0, 0, 1, 1], [], []>} : vector<64x8xf32>, vector<8x8xf32>, vector<64x8xf32> -> vector<64x8xf32>
    %226 = arith.addf %220, %225 : vector<64x8xf32>
    %227 = vector.extract_strided_slice %187 {offsets = [1, 0, 0], sizes = [4, 16, 8], strides = [1, 1, 1]} : vector<6x16x8xf32> to vector<4x16x8xf32>
    %228 = vector.shape_cast %227 : vector<4x16x8xf32> to vector<64x8xf32>
    %c5_196 = arith.constant 5 : index
    %c0_197 = arith.constant 0 : index
    %c0_198 = arith.constant 0 : index
    %229 = vector.load %arg4[%c5_196, %c0_197, %c0_198] : memref<9x8x8xf32, #tpu.memory_space<vmem>>, vector<1x8x8xf32>
    %230 = vector.shape_cast %229 : vector<1x8x8xf32> to vector<8x8xf32>
    %cst_199 = arith.constant dense<0.000000e+00> : vector<64x8xf32>
    %231 = tpu.matmul %228, %230, %cst_199 {dimension_numbers = #tpu.dot_dimension_numbers<[1], [0], [0], [1], [0, 0, 1, 1], [], []>} : vector<64x8xf32>, vector<8x8xf32>, vector<64x8xf32> -> vector<64x8xf32>
    %232 = arith.addf %226, %231 : vector<64x8xf32>
    %233 = vector.extract_strided_slice %193 {offsets = [1, 0, 0], sizes = [4, 16, 8], strides = [1, 1, 1]} : vector<6x16x8xf32> to vector<4x16x8xf32>
    %234 = vector.shape_cast %233 : vector<4x16x8xf32> to vector<64x8xf32>
    %c6_200 = arith.constant 6 : index
    %c0_201 = arith.constant 0 : index
    %c0_202 = arith.constant 0 : index
    %235 = vector.load %arg4[%c6_200, %c0_201, %c0_202] : memref<9x8x8xf32, #tpu.memory_space<vmem>>, vector<1x8x8xf32>
    %236 = vector.shape_cast %235 : vector<1x8x8xf32> to vector<8x8xf32>
    %cst_203 = arith.constant dense<0.000000e+00> : vector<64x8xf32>
    %237 = tpu.matmul %234, %236, %cst_203 {dimension_numbers = #tpu.dot_dimension_numbers<[1], [0], [0], [1], [0, 0, 1, 1], [], []>} : vector<64x8xf32>, vector<8x8xf32>, vector<64x8xf32> -> vector<64x8xf32>
    %238 = arith.addf %232, %237 : vector<64x8xf32>
    %239 = vector.extract_strided_slice %189 {offsets = [1, 0, 0], sizes = [4, 16, 8], strides = [1, 1, 1]} : vector<6x16x8xf32> to vector<4x16x8xf32>
    %240 = vector.shape_cast %239 : vector<4x16x8xf32> to vector<64x8xf32>
    %c7_204 = arith.constant 7 : index
    %c0_205 = arith.constant 0 : index
    %c0_206 = arith.constant 0 : index
    %241 = vector.load %arg4[%c7_204, %c0_205, %c0_206] : memref<9x8x8xf32, #tpu.memory_space<vmem>>, vector<1x8x8xf32>
    %242 = vector.shape_cast %241 : vector<1x8x8xf32> to vector<8x8xf32>
    %cst_207 = arith.constant dense<0.000000e+00> : vector<64x8xf32>
    %243 = tpu.matmul %240, %242, %cst_207 {dimension_numbers = #tpu.dot_dimension_numbers<[1], [0], [0], [1], [0, 0, 1, 1], [], []>} : vector<64x8xf32>, vector<8x8xf32>, vector<64x8xf32> -> vector<64x8xf32>
    %244 = arith.addf %238, %243 : vector<64x8xf32>
    %245 = vector.extract_strided_slice %195 {offsets = [1, 0, 0], sizes = [4, 16, 8], strides = [1, 1, 1]} : vector<6x16x8xf32> to vector<4x16x8xf32>
    %246 = vector.shape_cast %245 : vector<4x16x8xf32> to vector<64x8xf32>
    %c8_208 = arith.constant 8 : index
    %c0_209 = arith.constant 0 : index
    %c0_210 = arith.constant 0 : index
    %247 = vector.load %arg4[%c8_208, %c0_209, %c0_210] : memref<9x8x8xf32, #tpu.memory_space<vmem>>, vector<1x8x8xf32>
    %248 = vector.shape_cast %247 : vector<1x8x8xf32> to vector<8x8xf32>
    %cst_211 = arith.constant dense<0.000000e+00> : vector<64x8xf32>
    %249 = tpu.matmul %246, %248, %cst_211 {dimension_numbers = #tpu.dot_dimension_numbers<[1], [0], [0], [1], [0, 0, 1, 1], [], []>} : vector<64x8xf32>, vector<8x8xf32>, vector<64x8xf32> -> vector<64x8xf32>
    %250 = arith.addf %244, %249 : vector<64x8xf32>
    %251 = arith.addf %250, %179 : vector<64x8xf32>
    %252 = vector.shape_cast %251 : vector<64x8xf32> to vector<4x16x8xf32>
    %cst_212 = arith.constant 0.000000e+00 : f32
    %253 = vector.broadcast %cst_212 : f32 to vector<64x8xf32>
    %254 = vector.extract_strided_slice %189 {offsets = [0, 0, 0], sizes = [4, 16, 8], strides = [1, 1, 1]} : vector<6x16x8xf32> to vector<4x16x8xf32>
    %255 = vector.shape_cast %254 : vector<4x16x8xf32> to vector<64x8xf32>
    %c0_213 = arith.constant 0 : index
    %c0_214 = arith.constant 0 : index
    %c0_215 = arith.constant 0 : index
    %256 = vector.load %arg4[%c0_213, %c0_214, %c0_215] : memref<9x8x8xf32, #tpu.memory_space<vmem>>, vector<1x8x8xf32>
    %257 = vector.shape_cast %256 : vector<1x8x8xf32> to vector<8x8xf32>
    %cst_216 = arith.constant dense<0.000000e+00> : vector<64x8xf32>
    %258 = tpu.matmul %255, %257, %cst_216 {dimension_numbers = #tpu.dot_dimension_numbers<[1], [0], [0], [1], [0, 0, 1, 1], [], []>} : vector<64x8xf32>, vector<8x8xf32>, vector<64x8xf32> -> vector<64x8xf32>
    %259 = arith.addf %253, %258 : vector<64x8xf32>
    %260 = vector.extract_strided_slice %195 {offsets = [0, 0, 0], sizes = [4, 16, 8], strides = [1, 1, 1]} : vector<6x16x8xf32> to vector<4x16x8xf32>
    %261 = vector.shape_cast %260 : vector<4x16x8xf32> to vector<64x8xf32>
    %c1_217 = arith.constant 1 : index
    %c0_218 = arith.constant 0 : index
    %c0_219 = arith.constant 0 : index
    %262 = vector.load %arg4[%c1_217, %c0_218, %c0_219] : memref<9x8x8xf32, #tpu.memory_space<vmem>>, vector<1x8x8xf32>
    %263 = vector.shape_cast %262 : vector<1x8x8xf32> to vector<8x8xf32>
    %cst_220 = arith.constant dense<0.000000e+00> : vector<64x8xf32>
    %264 = tpu.matmul %261, %263, %cst_220 {dimension_numbers = #tpu.dot_dimension_numbers<[1], [0], [0], [1], [0, 0, 1, 1], [], []>} : vector<64x8xf32>, vector<8x8xf32>, vector<64x8xf32> -> vector<64x8xf32>
    %265 = arith.addf %259, %264 : vector<64x8xf32>
    %266 = vector.extract_strided_slice %191 {offsets = [0, 0, 0], sizes = [4, 16, 8], strides = [1, 1, 1]} : vector<6x16x8xf32> to vector<4x16x8xf32>
    %267 = vector.shape_cast %266 : vector<4x16x8xf32> to vector<64x8xf32>
    %c2_221 = arith.constant 2 : index
    %c0_222 = arith.constant 0 : index
    %c0_223 = arith.constant 0 : index
    %268 = vector.load %arg4[%c2_221, %c0_222, %c0_223] : memref<9x8x8xf32, #tpu.memory_space<vmem>>, vector<1x8x8xf32>
    %269 = vector.shape_cast %268 : vector<1x8x8xf32> to vector<8x8xf32>
    %cst_224 = arith.constant dense<0.000000e+00> : vector<64x8xf32>
    %270 = tpu.matmul %267, %269, %cst_224 {dimension_numbers = #tpu.dot_dimension_numbers<[1], [0], [0], [1], [0, 0, 1, 1], [], []>} : vector<64x8xf32>, vector<8x8xf32>, vector<64x8xf32> -> vector<64x8xf32>
    %271 = arith.addf %265, %270 : vector<64x8xf32>
    %272 = vector.extract_strided_slice %181 {offsets = [1, 0, 0], sizes = [4, 16, 8], strides = [1, 1, 1]} : vector<6x16x8xf32> to vector<4x16x8xf32>
    %273 = vector.shape_cast %272 : vector<4x16x8xf32> to vector<64x8xf32>
    %c3_225 = arith.constant 3 : index
    %c0_226 = arith.constant 0 : index
    %c0_227 = arith.constant 0 : index
    %274 = vector.load %arg4[%c3_225, %c0_226, %c0_227] : memref<9x8x8xf32, #tpu.memory_space<vmem>>, vector<1x8x8xf32>
    %275 = vector.shape_cast %274 : vector<1x8x8xf32> to vector<8x8xf32>
    %cst_228 = arith.constant dense<0.000000e+00> : vector<64x8xf32>
    %276 = tpu.matmul %273, %275, %cst_228 {dimension_numbers = #tpu.dot_dimension_numbers<[1], [0], [0], [1], [0, 0, 1, 1], [], []>} : vector<64x8xf32>, vector<8x8xf32>, vector<64x8xf32> -> vector<64x8xf32>
    %277 = arith.addf %271, %276 : vector<64x8xf32>
    %278 = vector.extract_strided_slice %187 {offsets = [1, 0, 0], sizes = [4, 16, 8], strides = [1, 1, 1]} : vector<6x16x8xf32> to vector<4x16x8xf32>
    %279 = vector.shape_cast %278 : vector<4x16x8xf32> to vector<64x8xf32>
    %c4_229 = arith.constant 4 : index
    %c0_230 = arith.constant 0 : index
    %c0_231 = arith.constant 0 : index
    %280 = vector.load %arg4[%c4_229, %c0_230, %c0_231] : memref<9x8x8xf32, #tpu.memory_space<vmem>>, vector<1x8x8xf32>
    %281 = vector.shape_cast %280 : vector<1x8x8xf32> to vector<8x8xf32>
    %cst_232 = arith.constant dense<0.000000e+00> : vector<64x8xf32>
    %282 = tpu.matmul %279, %281, %cst_232 {dimension_numbers = #tpu.dot_dimension_numbers<[1], [0], [0], [1], [0, 0, 1, 1], [], []>} : vector<64x8xf32>, vector<8x8xf32>, vector<64x8xf32> -> vector<64x8xf32>
    %283 = arith.addf %277, %282 : vector<64x8xf32>
    %284 = vector.extract_strided_slice %183 {offsets = [1, 0, 0], sizes = [4, 16, 8], strides = [1, 1, 1]} : vector<6x16x8xf32> to vector<4x16x8xf32>
    %285 = vector.shape_cast %284 : vector<4x16x8xf32> to vector<64x8xf32>
    %c5_233 = arith.constant 5 : index
    %c0_234 = arith.constant 0 : index
    %c0_235 = arith.constant 0 : index
    %286 = vector.load %arg4[%c5_233, %c0_234, %c0_235] : memref<9x8x8xf32, #tpu.memory_space<vmem>>, vector<1x8x8xf32>
    %287 = vector.shape_cast %286 : vector<1x8x8xf32> to vector<8x8xf32>
    %cst_236 = arith.constant dense<0.000000e+00> : vector<64x8xf32>
    %288 = tpu.matmul %285, %287, %cst_236 {dimension_numbers = #tpu.dot_dimension_numbers<[1], [0], [0], [1], [0, 0, 1, 1], [], []>} : vector<64x8xf32>, vector<8x8xf32>, vector<64x8xf32> -> vector<64x8xf32>
    %289 = arith.addf %283, %288 : vector<64x8xf32>
    %290 = vector.extract_strided_slice %189 {offsets = [1, 0, 0], sizes = [4, 16, 8], strides = [1, 1, 1]} : vector<6x16x8xf32> to vector<4x16x8xf32>
    %291 = vector.shape_cast %290 : vector<4x16x8xf32> to vector<64x8xf32>
    %c6_237 = arith.constant 6 : index
    %c0_238 = arith.constant 0 : index
    %c0_239 = arith.constant 0 : index
    %292 = vector.load %arg4[%c6_237, %c0_238, %c0_239] : memref<9x8x8xf32, #tpu.memory_space<vmem>>, vector<1x8x8xf32>
    %293 = vector.shape_cast %292 : vector<1x8x8xf32> to vector<8x8xf32>
    %cst_240 = arith.constant dense<0.000000e+00> : vector<64x8xf32>
    %294 = tpu.matmul %291, %293, %cst_240 {dimension_numbers = #tpu.dot_dimension_numbers<[1], [0], [0], [1], [0, 0, 1, 1], [], []>} : vector<64x8xf32>, vector<8x8xf32>, vector<64x8xf32> -> vector<64x8xf32>
    %295 = arith.addf %289, %294 : vector<64x8xf32>
    %296 = vector.extract_strided_slice %195 {offsets = [1, 0, 0], sizes = [4, 16, 8], strides = [1, 1, 1]} : vector<6x16x8xf32> to vector<4x16x8xf32>
    %297 = vector.shape_cast %296 : vector<4x16x8xf32> to vector<64x8xf32>
    %c7_241 = arith.constant 7 : index
    %c0_242 = arith.constant 0 : index
    %c0_243 = arith.constant 0 : index
    %298 = vector.load %arg4[%c7_241, %c0_242, %c0_243] : memref<9x8x8xf32, #tpu.memory_space<vmem>>, vector<1x8x8xf32>
    %299 = vector.shape_cast %298 : vector<1x8x8xf32> to vector<8x8xf32>
    %cst_244 = arith.constant dense<0.000000e+00> : vector<64x8xf32>
    %300 = tpu.matmul %297, %299, %cst_244 {dimension_numbers = #tpu.dot_dimension_numbers<[1], [0], [0], [1], [0, 0, 1, 1], [], []>} : vector<64x8xf32>, vector<8x8xf32>, vector<64x8xf32> -> vector<64x8xf32>
    %301 = arith.addf %295, %300 : vector<64x8xf32>
    %302 = vector.extract_strided_slice %191 {offsets = [1, 0, 0], sizes = [4, 16, 8], strides = [1, 1, 1]} : vector<6x16x8xf32> to vector<4x16x8xf32>
    %303 = vector.shape_cast %302 : vector<4x16x8xf32> to vector<64x8xf32>
    %c8_245 = arith.constant 8 : index
    %c0_246 = arith.constant 0 : index
    %c0_247 = arith.constant 0 : index
    %304 = vector.load %arg4[%c8_245, %c0_246, %c0_247] : memref<9x8x8xf32, #tpu.memory_space<vmem>>, vector<1x8x8xf32>
    %305 = vector.shape_cast %304 : vector<1x8x8xf32> to vector<8x8xf32>
    %cst_248 = arith.constant dense<0.000000e+00> : vector<64x8xf32>
    %306 = tpu.matmul %303, %305, %cst_248 {dimension_numbers = #tpu.dot_dimension_numbers<[1], [0], [0], [1], [0, 0, 1, 1], [], []>} : vector<64x8xf32>, vector<8x8xf32>, vector<64x8xf32> -> vector<64x8xf32>
    %307 = arith.addf %301, %306 : vector<64x8xf32>
    %308 = arith.addf %307, %179 : vector<64x8xf32>
    %309 = vector.shape_cast %308 : vector<64x8xf32> to vector<4x16x8xf32>
    %310 = tpu.concatenate %252, %309 in 2 : vector<4x16x8xf32>, vector<4x16x8xf32> -> vector<4x16x16xf32>
    %c0_249 = arith.constant 0 : index
    %c0_250 = arith.constant 0 : index
    %c0_251 = arith.constant 0 : index
    %c0_252 = arith.constant 0 : index
    %c0_253 = arith.constant 0 : index
    %311 = vector.load %arg9[%c0_249, %c0_250, %c0_251, %c0_252, %c0_253] : memref<1x4x2x16x16xf32, #tpu.memory_space<vmem>>, vector<1x4x1x16x16xf32>
    %312 = vector.shape_cast %311 : vector<1x4x1x16x16xf32> to vector<4x16x16xf32>
    %313 = vector.shape_cast %310 : vector<4x16x16xf32> to vector<1x4x1x16x16xf32>
    tpu.vector_store %arg9[%c0_249, %c0_250, %c0_251, %c0_252, %c0_253], %313 {strides = array<i32>} : memref<1x4x2x16x16xf32, #tpu.memory_space<vmem>>, vector<1x4x1x16x16xf32>,
    %cst_254 = arith.constant 0.000000e+00 : f32
    %314 = vector.broadcast %cst_254 : f32 to vector<64x8xf32>
    %315 = vector.extract_strided_slice %185 {offsets = [1, 0, 0], sizes = [4, 16, 8], strides = [1, 1, 1]} : vector<6x16x8xf32> to vector<4x16x8xf32>
    %316 = vector.shape_cast %315 : vector<4x16x8xf32> to vector<64x8xf32>
    %c0_255 = arith.constant 0 : index
    %c0_256 = arith.constant 0 : index
    %c0_257 = arith.constant 0 : index
    %317 = vector.load %arg4[%c0_255, %c0_256, %c0_257] : memref<9x8x8xf32, #tpu.memory_space<vmem>>, vector<1x8x8xf32>
    %318 = vector.shape_cast %317 : vector<1x8x8xf32> to vector<8x8xf32>
    %cst_258 = arith.constant dense<0.000000e+00> : vector<64x8xf32>
    %319 = tpu.matmul %316, %318, %cst_258 {dimension_numbers = #tpu.dot_dimension_numbers<[1], [0], [0], [1], [0, 0, 1, 1], [], []>} : vector<64x8xf32>, vector<8x8xf32>, vector<64x8xf32> -> vector<64x8xf32>
    %320 = arith.addf %314, %319 : vector<64x8xf32>
    %321 = vector.extract_strided_slice %181 {offsets = [1, 0, 0], sizes = [4, 16, 8], strides = [1, 1, 1]} : vector<6x16x8xf32> to vector<4x16x8xf32>
    %322 = vector.shape_cast %321 : vector<4x16x8xf32> to vector<64x8xf32>
    %c1_259 = arith.constant 1 : index
    %c0_260 = arith.constant 0 : index
    %c0_261 = arith.constant 0 : index
    %323 = vector.load %arg4[%c1_259, %c0_260, %c0_261] : memref<9x8x8xf32, #tpu.memory_space<vmem>>, vector<1x8x8xf32>
    %324 = vector.shape_cast %323 : vector<1x8x8xf32> to vector<8x8xf32>
    %cst_262 = arith.constant dense<0.000000e+00> : vector<64x8xf32>
    %325 = tpu.matmul %322, %324, %cst_262 {dimension_numbers = #tpu.dot_dimension_numbers<[1], [0], [0], [1], [0, 0, 1, 1], [], []>} : vector<64x8xf32>, vector<8x8xf32>, vector<64x8xf32> -> vector<64x8xf32>
    %326 = arith.addf %320, %325 : vector<64x8xf32>
    %327 = vector.extract_strided_slice %187 {offsets = [1, 0, 0], sizes = [4, 16, 8], strides = [1, 1, 1]} : vector<6x16x8xf32> to vector<4x16x8xf32>
    %328 = vector.shape_cast %327 : vector<4x16x8xf32> to vector<64x8xf32>
    %c2_263 = arith.constant 2 : index
    %c0_264 = arith.constant 0 : index
    %c0_265 = arith.constant 0 : index
    %329 = vector.load %arg4[%c2_263, %c0_264, %c0_265] : memref<9x8x8xf32, #tpu.memory_space<vmem>>, vector<1x8x8xf32>
    %330 = vector.shape_cast %329 : vector<1x8x8xf32> to vector<8x8xf32>
    %cst_266 = arith.constant dense<0.000000e+00> : vector<64x8xf32>
    %331 = tpu.matmul %328, %330, %cst_266 {dimension_numbers = #tpu.dot_dimension_numbers<[1], [0], [0], [1], [0, 0, 1, 1], [], []>} : vector<64x8xf32>, vector<8x8xf32>, vector<64x8xf32> -> vector<64x8xf32>
    %332 = arith.addf %326, %331 : vector<64x8xf32>
    %333 = vector.extract_strided_slice %193 {offsets = [1, 0, 0], sizes = [4, 16, 8], strides = [1, 1, 1]} : vector<6x16x8xf32> to vector<4x16x8xf32>
    %334 = vector.shape_cast %333 : vector<4x16x8xf32> to vector<64x8xf32>
    %c3_267 = arith.constant 3 : index
    %c0_268 = arith.constant 0 : index
    %c0_269 = arith.constant 0 : index
    %335 = vector.load %arg4[%c3_267, %c0_268, %c0_269] : memref<9x8x8xf32, #tpu.memory_space<vmem>>, vector<1x8x8xf32>
    %336 = vector.shape_cast %335 : vector<1x8x8xf32> to vector<8x8xf32>
    %cst_270 = arith.constant dense<0.000000e+00> : vector<64x8xf32>
    %337 = tpu.matmul %334, %336, %cst_270 {dimension_numbers = #tpu.dot_dimension_numbers<[1], [0], [0], [1], [0, 0, 1, 1], [], []>} : vector<64x8xf32>, vector<8x8xf32>, vector<64x8xf32> -> vector<64x8xf32>
    %338 = arith.addf %332, %337 : vector<64x8xf32>
    %339 = vector.extract_strided_slice %189 {offsets = [1, 0, 0], sizes = [4, 16, 8], strides = [1, 1, 1]} : vector<6x16x8xf32> to vector<4x16x8xf32>
    %340 = vector.shape_cast %339 : vector<4x16x8xf32> to vector<64x8xf32>
    %c4_271 = arith.constant 4 : index
    %c0_272 = arith.constant 0 : index
    %c0_273 = arith.constant 0 : index
    %341 = vector.load %arg4[%c4_271, %c0_272, %c0_273] : memref<9x8x8xf32, #tpu.memory_space<vmem>>, vector<1x8x8xf32>
    %342 = vector.shape_cast %341 : vector<1x8x8xf32> to vector<8x8xf32>
    %cst_274 = arith.constant dense<0.000000e+00> : vector<64x8xf32>
    %343 = tpu.matmul %340, %342, %cst_274 {dimension_numbers = #tpu.dot_dimension_numbers<[1], [0], [0], [1], [0, 0, 1, 1], [], []>} : vector<64x8xf32>, vector<8x8xf32>, vector<64x8xf32> -> vector<64x8xf32>
    %344 = arith.addf %338, %343 : vector<64x8xf32>
    %345 = vector.extract_strided_slice %195 {offsets = [1, 0, 0], sizes = [4, 16, 8], strides = [1, 1, 1]} : vector<6x16x8xf32> to vector<4x16x8xf32>
    %346 = vector.shape_cast %345 : vector<4x16x8xf32> to vector<64x8xf32>
    %c5_275 = arith.constant 5 : index
    %c0_276 = arith.constant 0 : index
    %c0_277 = arith.constant 0 : index
    %347 = vector.load %arg4[%c5_275, %c0_276, %c0_277] : memref<9x8x8xf32, #tpu.memory_space<vmem>>, vector<1x8x8xf32>
    %348 = vector.shape_cast %347 : vector<1x8x8xf32> to vector<8x8xf32>
    %cst_278 = arith.constant dense<0.000000e+00> : vector<64x8xf32>
    %349 = tpu.matmul %346, %348, %cst_278 {dimension_numbers = #tpu.dot_dimension_numbers<[1], [0], [0], [1], [0, 0, 1, 1], [], []>} : vector<64x8xf32>, vector<8x8xf32>, vector<64x8xf32> -> vector<64x8xf32>
    %350 = arith.addf %344, %349 : vector<64x8xf32>
    %351 = vector.extract_strided_slice %185 {offsets = [2, 0, 0], sizes = [4, 16, 8], strides = [1, 1, 1]} : vector<6x16x8xf32> to vector<4x16x8xf32>
    %352 = vector.shape_cast %351 : vector<4x16x8xf32> to vector<64x8xf32>
    %c6_279 = arith.constant 6 : index
    %c0_280 = arith.constant 0 : index
    %c0_281 = arith.constant 0 : index
    %353 = vector.load %arg4[%c6_279, %c0_280, %c0_281] : memref<9x8x8xf32, #tpu.memory_space<vmem>>, vector<1x8x8xf32>
    %354 = vector.shape_cast %353 : vector<1x8x8xf32> to vector<8x8xf32>
    %cst_282 = arith.constant dense<0.000000e+00> : vector<64x8xf32>
    %355 = tpu.matmul %352, %354, %cst_282 {dimension_numbers = #tpu.dot_dimension_numbers<[1], [0], [0], [1], [0, 0, 1, 1], [], []>} : vector<64x8xf32>, vector<8x8xf32>, vector<64x8xf32> -> vector<64x8xf32>
    %356 = arith.addf %350, %355 : vector<64x8xf32>
    %357 = vector.extract_strided_slice %181 {offsets = [2, 0, 0], sizes = [4, 16, 8], strides = [1, 1, 1]} : vector<6x16x8xf32> to vector<4x16x8xf32>
    %358 = vector.shape_cast %357 : vector<4x16x8xf32> to vector<64x8xf32>
    %c7_283 = arith.constant 7 : index
    %c0_284 = arith.constant 0 : index
    %c0_285 = arith.constant 0 : index
    %359 = vector.load %arg4[%c7_283, %c0_284, %c0_285] : memref<9x8x8xf32, #tpu.memory_space<vmem>>, vector<1x8x8xf32>
    %360 = vector.shape_cast %359 : vector<1x8x8xf32> to vector<8x8xf32>
    %cst_286 = arith.constant dense<0.000000e+00> : vector<64x8xf32>
    %361 = tpu.matmul %358, %360, %cst_286 {dimension_numbers = #tpu.dot_dimension_numbers<[1], [0], [0], [1], [0, 0, 1, 1], [], []>} : vector<64x8xf32>, vector<8x8xf32>, vector<64x8xf32> -> vector<64x8xf32>
    %362 = arith.addf %356, %361 : vector<64x8xf32>
    %363 = vector.extract_strided_slice %187 {offsets = [2, 0, 0], sizes = [4, 16, 8], strides = [1, 1, 1]} : vector<6x16x8xf32> to vector<4x16x8xf32>
    %364 = vector.shape_cast %363 : vector<4x16x8xf32> to vector<64x8xf32>
    %c8_287 = arith.constant 8 : index
    %c0_288 = arith.constant 0 : index
    %c0_289 = arith.constant 0 : index
    %365 = vector.load %arg4[%c8_287, %c0_288, %c0_289] : memref<9x8x8xf32, #tpu.memory_space<vmem>>, vector<1x8x8xf32>
    %366 = vector.shape_cast %365 : vector<1x8x8xf32> to vector<8x8xf32>
    %cst_290 = arith.constant dense<0.000000e+00> : vector<64x8xf32>
    %367 = tpu.matmul %364, %366, %cst_290 {dimension_numbers = #tpu.dot_dimension_numbers<[1], [0], [0], [1], [0, 0, 1, 1], [], []>} : vector<64x8xf32>, vector<8x8xf32>, vector<64x8xf32> -> vector<64x8xf32>
    %368 = arith.addf %362, %367 : vector<64x8xf32>
    %369 = arith.addf %368, %179 : vector<64x8xf32>
    %370 = vector.shape_cast %369 : vector<64x8xf32> to vector<4x16x8xf32>
    %cst_291 = arith.constant 0.000000e+00 : f32
    %371 = vector.broadcast %cst_291 : f32 to vector<64x8xf32>
    %372 = vector.extract_strided_slice %181 {offsets = [1, 0, 0], sizes = [4, 16, 8], strides = [1, 1, 1]} : vector<6x16x8xf32> to vector<4x16x8xf32>
    %373 = vector.shape_cast %372 : vector<4x16x8xf32> to vector<64x8xf32>
    %c0_292 = arith.constant 0 : index
    %c0_293 = arith.constant 0 : index
    %c0_294 = arith.constant 0 : index
    %374 = vector.load %arg4[%c0_292, %c0_293, %c0_294] : memref<9x8x8xf32, #tpu.memory_space<vmem>>, vector<1x8x8xf32>
    %375 = vector.shape_cast %374 : vector<1x8x8xf32> to vector<8x8xf32>
    %cst_295 = arith.constant dense<0.000000e+00> : vector<64x8xf32>
    %376 = tpu.matmul %373, %375, %cst_295 {dimension_numbers = #tpu.dot_dimension_numbers<[1], [0], [0], [1], [0, 0, 1, 1], [], []>} : vector<64x8xf32>, vector<8x8xf32>, vector<64x8xf32> -> vector<64x8xf32>
    %377 = arith.addf %371, %376 : vector<64x8xf32>
    %378 = vector.extract_strided_slice %187 {offsets = [1, 0, 0], sizes = [4, 16, 8], strides = [1, 1, 1]} : vector<6x16x8xf32> to vector<4x16x8xf32>
    %379 = vector.shape_cast %378 : vector<4x16x8xf32> to vector<64x8xf32>
    %c1_296 = arith.constant 1 : index
    %c0_297 = arith.constant 0 : index
    %c0_298 = arith.constant 0 : index
    %380 = vector.load %arg4[%c1_296, %c0_297, %c0_298] : memref<9x8x8xf32, #tpu.memory_space<vmem>>, vector<1x8x8xf32>
    %381 = vector.shape_cast %380 : vector<1x8x8xf32> to vector<8x8xf32>
    %cst_299 = arith.constant dense<0.000000e+00> : vector<64x8xf32>
    %382 = tpu.matmul %379, %381, %cst_299 {dimension_numbers = #tpu.dot_dimension_numbers<[1], [0], [0], [1], [0, 0, 1, 1], [], []>} : vector<64x8xf32>, vector<8x8xf32>, vector<64x8xf32> -> vector<64x8xf32>
    %383 = arith.addf %377, %382 : vector<64x8xf32>
    %384 = vector.extract_strided_slice %183 {offsets = [1, 0, 0], sizes = [4, 16, 8], strides = [1, 1, 1]} : vector<6x16x8xf32> to vector<4x16x8xf32>
    %385 = vector.shape_cast %384 : vector<4x16x8xf32> to vector<64x8xf32>
    %c2_300 = arith.constant 2 : index
    %c0_301 = arith.constant 0 : index
    %c0_302 = arith.constant 0 : index
    %386 = vector.load %arg4[%c2_300, %c0_301, %c0_302] : memref<9x8x8xf32, #tpu.memory_space<vmem>>, vector<1x8x8xf32>
    %387 = vector.shape_cast %386 : vector<1x8x8xf32> to vector<8x8xf32>
    %cst_303 = arith.constant dense<0.000000e+00> : vector<64x8xf32>
    %388 = tpu.matmul %385, %387, %cst_303 {dimension_numbers = #tpu.dot_dimension_numbers<[1], [0], [0], [1], [0, 0, 1, 1], [], []>} : vector<64x8xf32>, vector<8x8xf32>, vector<64x8xf32> -> vector<64x8xf32>
    %389 = arith.addf %383, %388 : vector<64x8xf32>
    %390 = vector.extract_strided_slice %189 {offsets = [1, 0, 0], sizes = [4, 16, 8], strides = [1, 1, 1]} : vector<6x16x8xf32> to vector<4x16x8xf32>
    %391 = vector.shape_cast %390 : vector<4x16x8xf32> to vector<64x8xf32>
    %c3_304 = arith.constant 3 : index
    %c0_305 = arith.constant 0 : index
    %c0_306 = arith.constant 0 : index
    %392 = vector.load %arg4[%c3_304, %c0_305, %c0_306] : memref<9x8x8xf32, #tpu.memory_space<vmem>>, vector<1x8x8xf32>
    %393 = vector.shape_cast %392 : vector<1x8x8xf32> to vector<8x8xf32>
    %cst_307 = arith.constant dense<0.000000e+00> : vector<64x8xf32>
    %394 = tpu.matmul %391, %393, %cst_307 {dimension_numbers = #tpu.dot_dimension_numbers<[1], [0], [0], [1], [0, 0, 1, 1], [], []>} : vector<64x8xf32>, vector<8x8xf32>, vector<64x8xf32> -> vector<64x8xf32>
    %395 = arith.addf %389, %394 : vector<64x8xf32>
    %396 = vector.extract_strided_slice %195 {offsets = [1, 0, 0], sizes = [4, 16, 8], strides = [1, 1, 1]} : vector<6x16x8xf32> to vector<4x16x8xf32>
    %397 = vector.shape_cast %396 : vector<4x16x8xf32> to vector<64x8xf32>
    %c4_308 = arith.constant 4 : index
    %c0_309 = arith.constant 0 : index
    %c0_310 = arith.constant 0 : index
    %398 = vector.load %arg4[%c4_308, %c0_309, %c0_310] : memref<9x8x8xf32, #tpu.memory_space<vmem>>, vector<1x8x8xf32>
    %399 = vector.shape_cast %398 : vector<1x8x8xf32> to vector<8x8xf32>
    %cst_311 = arith.constant dense<0.000000e+00> : vector<64x8xf32>
    %400 = tpu.matmul %397, %399, %cst_311 {dimension_numbers = #tpu.dot_dimension_numbers<[1], [0], [0], [1], [0, 0, 1, 1], [], []>} : vector<64x8xf32>, vector<8x8xf32>, vector<64x8xf32> -> vector<64x8xf32>
    %401 = arith.addf %395, %400 : vector<64x8xf32>
    %402 = vector.extract_strided_slice %191 {offsets = [1, 0, 0], sizes = [4, 16, 8], strides = [1, 1, 1]} : vector<6x16x8xf32> to vector<4x16x8xf32>
    %403 = vector.shape_cast %402 : vector<4x16x8xf32> to vector<64x8xf32>
    %c5_312 = arith.constant 5 : index
    %c0_313 = arith.constant 0 : index
    %c0_314 = arith.constant 0 : index
    %404 = vector.load %arg4[%c5_312, %c0_313, %c0_314] : memref<9x8x8xf32, #tpu.memory_space<vmem>>, vector<1x8x8xf32>
    %405 = vector.shape_cast %404 : vector<1x8x8xf32> to vector<8x8xf32>
    %cst_315 = arith.constant dense<0.000000e+00> : vector<64x8xf32>
    %406 = tpu.matmul %403, %405, %cst_315 {dimension_numbers = #tpu.dot_dimension_numbers<[1], [0], [0], [1], [0, 0, 1, 1], [], []>} : vector<64x8xf32>, vector<8x8xf32>, vector<64x8xf32> -> vector<64x8xf32>
    %407 = arith.addf %401, %406 : vector<64x8xf32>
    %408 = vector.extract_strided_slice %181 {offsets = [2, 0, 0], sizes = [4, 16, 8], strides = [1, 1, 1]} : vector<6x16x8xf32> to vector<4x16x8xf32>
    %409 = vector.shape_cast %408 : vector<4x16x8xf32> to vector<64x8xf32>
    %c6_316 = arith.constant 6 : index
    %c0_317 = arith.constant 0 : index
    %c0_318 = arith.constant 0 : index
    %410 = vector.load %arg4[%c6_316, %c0_317, %c0_318] : memref<9x8x8xf32, #tpu.memory_space<vmem>>, vector<1x8x8xf32>
    %411 = vector.shape_cast %410 : vector<1x8x8xf32> to vector<8x8xf32>
    %cst_319 = arith.constant dense<0.000000e+00> : vector<64x8xf32>
    %412 = tpu.matmul %409, %411, %cst_319 {dimension_numbers = #tpu.dot_dimension_numbers<[1], [0], [0], [1], [0, 0, 1, 1], [], []>} : vector<64x8xf32>, vector<8x8xf32>, vector<64x8xf32> -> vector<64x8xf32>
    %413 = arith.addf %407, %412 : vector<64x8xf32>
    %414 = vector.extract_strided_slice %187 {offsets = [2, 0, 0], sizes = [4, 16, 8], strides = [1, 1, 1]} : vector<6x16x8xf32> to vector<4x16x8xf32>
    %415 = vector.shape_cast %414 : vector<4x16x8xf32> to vector<64x8xf32>
    %c7_320 = arith.constant 7 : index
    %c0_321 = arith.constant 0 : index
    %c0_322 = arith.constant 0 : index
    %416 = vector.load %arg4[%c7_320, %c0_321, %c0_322] : memref<9x8x8xf32, #tpu.memory_space<vmem>>, vector<1x8x8xf32>
    %417 = vector.shape_cast %416 : vector<1x8x8xf32> to vector<8x8xf32>
    %cst_323 = arith.constant dense<0.000000e+00> : vector<64x8xf32>
    %418 = tpu.matmul %415, %417, %cst_323 {dimension_numbers = #tpu.dot_dimension_numbers<[1], [0], [0], [1], [0, 0, 1, 1], [], []>} : vector<64x8xf32>, vector<8x8xf32>, vector<64x8xf32> -> vector<64x8xf32>
    %419 = arith.addf %413, %418 : vector<64x8xf32>
    %420 = vector.extract_strided_slice %183 {offsets = [2, 0, 0], sizes = [4, 16, 8], strides = [1, 1, 1]} : vector<6x16x8xf32> to vector<4x16x8xf32>
    %421 = vector.shape_cast %420 : vector<4x16x8xf32> to vector<64x8xf32>
    %c8_324 = arith.constant 8 : index
    %c0_325 = arith.constant 0 : index
    %c0_326 = arith.constant 0 : index
    %422 = vector.load %arg4[%c8_324, %c0_325, %c0_326] : memref<9x8x8xf32, #tpu.memory_space<vmem>>, vector<1x8x8xf32>
    %423 = vector.shape_cast %422 : vector<1x8x8xf32> to vector<8x8xf32>
    %cst_327 = arith.constant dense<0.000000e+00> : vector<64x8xf32>
    %424 = tpu.matmul %421, %423, %cst_327 {dimension_numbers = #tpu.dot_dimension_numbers<[1], [0], [0], [1], [0, 0, 1, 1], [], []>} : vector<64x8xf32>, vector<8x8xf32>, vector<64x8xf32> -> vector<64x8xf32>
    %425 = arith.addf %419, %424 : vector<64x8xf32>
    %426 = arith.addf %425, %179 : vector<64x8xf32>
    %427 = vector.shape_cast %426 : vector<64x8xf32> to vector<4x16x8xf32>
    %428 = tpu.concatenate %370, %427 in 2 : vector<4x16x8xf32>, vector<4x16x8xf32> -> vector<4x16x16xf32>
    %c0_328 = arith.constant 0 : index
    %c0_329 = arith.constant 0 : index
    %c1_330 = arith.constant 1 : index
    %c0_331 = arith.constant 0 : index
    %c0_332 = arith.constant 0 : index
    %429 = vector.load %arg9[%c0_328, %c0_329, %c1_330, %c0_331, %c0_332] : memref<1x4x2x16x16xf32, #tpu.memory_space<vmem>>, vector<1x4x1x16x16xf32>
    %430 = vector.shape_cast %429 : vector<1x4x1x16x16xf32> to vector<4x16x16xf32>
    %431 = vector.shape_cast %428 : vector<4x16x16xf32> to vector<1x4x1x16x16xf32>
    tpu.vector_store %arg9[%c0_328, %c0_329, %c1_330, %c0_331, %c0_332], %431 {strides = array<i32>} : memref<1x4x2x16x16xf32, #tpu.memory_space<vmem>>, vector<1x4x1x16x16xf32>,
    return
  }
  func.func @transform_0(%arg0: i32, %arg1: i32) -> (i32, i32, i32, i32, i32) {
    %c0_i32 = arith.constant 0 : i32
    %c0_i32_0 = arith.constant 0 : i32
    %c0_i32_1 = arith.constant 0 : i32
    %c0_i32_2 = arith.constant 0 : i32
    return %arg1, %arg0, %c0_i32, %c0_i32_0, %c0_i32_1 : i32, i32, i32, i32, i32
  }
  func.func @transform_1(%arg0: i32, %arg1: i32) -> (i32, i32, i32) {
    %c0_i32 = arith.constant 0 : i32
    %c0_i32_0 = arith.constant 0 : i32
    %c0_i32_1 = arith.constant 0 : i32
    %c0_i32_2 = arith.constant 0 : i32
    return %c0_i32, %c0_i32_0, %c0_i32_1 : i32, i32, i32
  }
  func.func @transform_2(%arg0: i32, %arg1: i32) -> (i32, i32, i32) {
    %c0_i32 = arith.constant 0 : i32
    %c0_i32_0 = arith.constant 0 : i32
    %c0_i32_1 = arith.constant 0 : i32
    %c0_i32_2 = arith.constant 0 : i32
    return %c0_i32, %c0_i32_0, %c0_i32_1 : i32, i32, i32
  }
  func.func @transform_3(%arg0: i32, %arg1: i32) -> (i32, i32) {
    %c0_i32 = arith.constant 0 : i32
    %c0_i32_0 = arith.constant 0 : i32
    %c0_i32_1 = arith.constant 0 : i32
    return %c0_i32, %c0_i32_0 : i32, i32
  }
  func.func @transform_4(%arg0: i32, %arg1: i32) -> (i32, i32) {
    %c0_i32 = arith.constant 0 : i32
    %c0_i32_0 = arith.constant 0 : i32
    %c0_i32_1 = arith.constant 0 : i32
    return %c0_i32, %c0_i32_0 : i32, i32
  }
  func.func @transform_5(%arg0: i32, %arg1: i32) -> (i32, i32) {
    %c0_i32 = arith.constant 0 : i32
    %c0_i32_0 = arith.constant 0 : i32
    %c0_i32_1 = arith.constant 0 : i32
    return %c0_i32, %c0_i32_0 : i32, i32
  }
  func.func @transform_6(%arg0: i32, %arg1: i32) -> (i32, i32) {
    %c0_i32 = arith.constant 0 : i32
    %c0_i32_0 = arith.constant 0 : i32
    %c0_i32_1 = arith.constant 0 : i32
    return %c0_i32, %c0_i32_0 : i32, i32
  }
  func.func @transform_7(%arg0: i32, %arg1: i32) -> (i32, i32, i32, i32, i32) {
    %c0_i32 = arith.constant 0 : i32
    %c0_i32_0 = arith.constant 0 : i32
    %c0_i32_1 = arith.constant 0 : i32
    %c0_i32_2 = arith.constant 0 : i32
    return %arg1, %arg0, %c0_i32, %c0_i32_0, %c0_i32_1 : i32, i32, i32, i32, i32
  }
}

</mosaic_0001>

<bundles_post_ra>
// kernel: basic_block_up.1
= control target key start
LH: loop header
LB: loop body
LE: loop exit
PB: predicated region body
PF: predicated region fallthrough
CT: control target
= control target key end

     0   :  { %s10169_s24 = smov 0   ;;  %s10171_s25 = smov 0   ;;  %s12055_s0 = inlined_call_operand.vmem [shape: f32[2,4,8,18,4], index: 0, kind: input, shape index: {}]   ;;  %s12056_s1 = inlined_call_operand.vmem [shape: f32[16,4,8], index: 1, kind: input, shape index: {}]   ;;  %s12057_s2 = inlined_call_operand.vmem [shape: f32[9,8,8], index: 2, kind: input, shape index: {}]   ;;  %s12058_s3 = inlined_call_operand.vmem [shape: f32[4,8], index: 3, kind: input, shape index: {}]   ;;  %s12059_s4 = inlined_call_operand.vmem [shape: f32[1,8], index: 4, kind: input, shape index: {}]   ;;  %s12060_s5 = inlined_call_operand.vmem [shape: f32[1,8], index: 5, kind: input, shape index: {}]   ;;  %s12061_s6 = inlined_call_operand.vmem [shape: f32[1,8], index: 6, kind: input, shape index: {}]   ;;  %s12062_s7 = inlined_call_operand.vmem [shape: f32[2,16,2,16,16], index: 7, kind: output, shape index: {}]  }
   0x1   :  { %s10173_s26 = smov 0   ;;  %s10175_s27 = smov 0  }
   0x2   :  { %s10177_s28 = smov 0  }
   0x3 LB: > { %s26_s29 = sadd.s32 1, %s10115_s26  ;;  %s29_s30 = sadd.s32 1, %s10119_s27  ;;  %s10123_s28 = sphi %s10177_s28, %s17_s28   ;;  %s10119_s27 = sphi %s10175_s27, %s12097_s27   ;;  %s10115_s26 = sphi %s10173_s26, %s12096_s26   ;;  %s10111_s25 = sphi %s10171_s25, %s12095_s25   ;;  %s10107_s24 = sphi %s10169_s24, %s12094_s24  }
   0x4   : > { %p27_p0 = scmp.ge.s32.totalorder %s26_s29, 2  ;;  %p7701_p1 = scmp.ge.s32.totalorder %s10123_s28, 1 }
   0x5   : > { %p257_p2 = scmp.lt.s32.totalorder %s10123_s28, 9 }
   0x6   : > { %s12099_s29 = smov (%p27_p0, %s26_s29), 0  ;;  %s12101_s30 = smov (!%p27_p0, %s29_s30), %s10119_s27 }
   0x7   : > { %p258_p3 = pnand %p7701_p1, %p257_p2  ;;  %p31_p4 = scmp.ge.s32.totalorder %s12101_s30, 4 }
   0x9   : > { %s12103_s30 = smov (%p31_p4, %s12101_s30), 0  ;;  %261 = sbr.rel (%p258_p3) target bundleno = 1090 (0x442), region = 48 }
  0x10   : > { %v7707_v0 = vld [vmem:[%s12056_s1 + $0x4] sm:$0xf]  ;;  %vm444_vm0 = vcmask 1043456   ;;  %p298_p5 = scmp.lt.s32.totalorder %s10107_s24, 1  ;;  %p300_p6 = scmp.lt.s32.totalorder %s10111_s25, 3  ;;  %vm1056_vm1 = vcmask 57344  }
  0x11   : > { %9637 = vmatprep.subr.msk.mxu1 %vm444_vm0, %v7707_v0  ;;  %8799 = vmatprep.subr.msk.mxu0 %vm444_vm0, %v7707_v0  ;;  %s7703_s10 = sshll.u32 %s10111_s25, 2  ;;  %v10211_v1 = vld [vmem:[%s12056_s1 + $0x14] sm:$0xf]  ;;  %v10125_v2 = vmov 0.0   ;;  %v10240_v3 = vld [vmem:[%s12056_s1] sm:$0xf] }
  0x12   : > { %9638 = vmatpush3.msk.msra.mxu1 %vm444_vm0, %v7707_v0  ;;  %8800 = vmatpush3.msk.msra.mxu0 %vm444_vm0, %v7707_v0  ;;  %s12105_s24 = smov (!%p298_p5, %s10107_s24), 1  ;;  %1064 = vst.msk [vmem:[#allocation2 + $0x29] sm:$0x1] %vm1056_vm1, %v10125_v2  ;;  %1065 = vst.msk [vmem:[#allocation2 + $0x41] sm:$0x1] %vm1056_vm1, %v10125_v2  ;;  %p310_p7 = scmp.lt.s32.totalorder %s7703_s10, 15 }
  0x13   : > { %1066 = vst.msk [vmem:[#allocation2 + $0x59] sm:$0x1] %vm1056_vm1, %v10125_v2  ;;  %1067 = vst.msk [vmem:[#allocation2 + $0x71] sm:$0x1] %vm1056_vm1, %v10125_v2  ;;  %s301_s15 = scalar_select %p300_p6, %s10111_s25, 3  ;;  %8879 = vmatprep.subr.msk.mxu1 %vm444_vm0, %v10211_v1  ;;  %8819 = vmatprep.subr.msk.mxu0 %vm444_vm0, %v10240_v3  ;;  %vm388_vm2 = vcmask 1046528  }
  0x14   : > { %1068 = vst.msk [vmem:[#allocation2 + $0x89] sm:$0x1] %vm1056_vm1, %v10125_v2  ;;  %1703 = vst.msk [vmem:[#allocation2 + $0xa8] sm:$0x1] %vm1056_vm1, %v10125_v2  ;;  %s10040_s16 = smul.u32 96, %s12105_s24  ;;  %s7705_s18 = sshll.u32 %s12105_s24, 6 }
  0x15   : > { %1704 = vst.msk [vmem:[#allocation2 + $0xc0] sm:$0x1] %vm1056_vm1, %v10125_v2  ;;  %1705 = vst.msk [vmem:[#allocation2 + $0xd8] sm:$0x1] %vm1056_vm1, %v10125_v2  ;;  %s10039_s17 = smul.u32 24, %s301_s15  ;;  %s12107_s10 = smov (!%p310_p7, %s7703_s10), 15 }
  0x16   : > { %1706 = vst.msk [vmem:[#allocation2 + $0xf0] sm:$0x1] %vm1056_vm1, %v10125_v2  ;;  %1707 = vst.msk [vmem:[#allocation2 + $0x108] sm:$0x1] %vm1056_vm1, %v10125_v2  ;;  %s7704_s21 = sshll.u32 %s12107_s10, 2  ;;  %vm419_vm3 = vcmask 31744  }
  0x17   : > { %2305 = vst.msk [vmem:[#allocation2 + $0x131] sm:$0x1] %vm1056_vm1, %v10125_v2  ;;  %2306 = vst.msk [vmem:[#allocation2 + $0x149] sm:$0x1] %vm1056_vm1, %v10125_v2  ;;  %s304_s19 = sadd.s32 %s10040_s16, %s10039_s17  ;;  %s314_s9 = sadd.s32 %s7705_s18, %s7704_s21  ;;  %vm1073_vm4 = vcmask 1045504   ;;  %vm1043_vm5 = vcmask 64512  }
  0x18   : > { %2307 = vst.msk [vmem:[#allocation2 + $0x161] sm:$0x1] %vm1056_vm1, %v10125_v2  ;;  %2308 = vst.msk [vmem:[#allocation2 + $0x179] sm:$0x1] %vm1056_vm1, %v10125_v2  ;;  %s7702_s20 = sshll.u32 %s304_s19, 3  ;;  %s7706_s24 = sshll.u32 %s314_s9, 3 }
  0x19   : > { %2309 = vst.msk [vmem:[#allocation2 + $0x191] sm:$0x1] %vm1056_vm1, %v10125_v2  ;;  %2889 = vst.msk [vmem:[#allocation2 + $0x1b0] sm:$0x1] %vm1056_vm1, %v10125_v2  ;;  %s10258_s8 = scalar_lea.vmem %s12055_s0, %s7702_s20  ;;  %s10268_s12 = scalar_lea.vmem %s12062_s7, %s7706_s24  ;;  %v10337_v39 = vld [vmem:[%s12056_s1 + $0x8] sm:$0xf] }
  0x1a   : > { %2890 = vst.msk [vmem:[#allocation2 + $0x1c8] sm:$0x1] %vm1056_vm1, %v10125_v2  ;;  %2891 = vst.msk [vmem:[#allocation2 + $0x1e0] sm:$0x1] %vm1056_vm1, %v10125_v2  ;;  %v318_v4 = vld [vmem:[%s10258_s8] sm:$0xff]  ;;  %v319_v5 = vld [vmem:[%s10258_s8 + $0x8] sm:$0xff] }
  0x1b   : > { %2892 = vst.msk [vmem:[#allocation2 + $0x1f8] sm:$0x1] %vm1056_vm1, %v10125_v2  ;;  %2893 = vst.msk [vmem:[#allocation2 + $0x210] sm:$0x1] %vm1056_vm1, %v10125_v2  ;;  %v10263_v6 = vld [vmem:[%s10258_s8 + $0x60] sm:$0xff]  ;;  %v10270_v7 = vmax.f32 %v318_v4, 0.0 }
  0x1c   : > { %v10272_v8 = vmax.f32 %v319_v5, 0.0  ;;  %v10275_v9 = vld [vmem:[%s10258_s8 + $0x68] sm:$0xff]  ;;  %v10278_v10 = vmax.f32 %v10263_v6, 0.0  ;;  %v320_v11 = vld [vmem:[%s10258_s8 + $0x10] sm:$0x3]  ;;  %v321_v15 = vld [vmem:[%s10258_s8 + $0x18] sm:$0xff] }
  0x1d   : > { %v10282_v12 = vmax.f32 %v10275_v9, 0.0  ;;  %v344_v13 = vmax.f32 %v320_v11, 0.0  ;;  %v10285_v14 = vld [vmem:[%s10258_s8 + $0x70] sm:$0x3]  ;;  %v322_v16 = vld [vmem:[%s10258_s8 + $0x20] sm:$0xff]  ;;  %v389_v17 = vrot.slane %v10270_v7, 1 }
  0x1e   : > { %v390_v18 = vrot.slane %v10272_v8, 1  ;;  %v409_v19 = vrot.slane %v10278_v10, 1  ;;  %v356_v20 = vmax.f32 %v10285_v14, 0.0  ;;  %v10294_v21 = vld [vmem:[%s10258_s8 + $0x78] sm:$0xff]  ;;  %v10297_v22 = vld [vmem:[%s10258_s8 + $0x80] sm:$0xff]  ;;  %v10300_v26 = vmax.f32 %v321_v15, 0.0 }
  0x1f   : > { %v410_v23 = vrot.slane %v10282_v12, 1  ;;  %v392_v24 = vrot.slane %v344_v13, 1  ;;  %v1077_v25 = vrot.slane %v344_v13, 2  ;;  %v323_v27 = vld [vmem:[%s10258_s8 + $0x28] sm:$0x3]  ;;  %v10308_v30 = vmax.f32 %v322_v16, 0.0 }
  0x20   : > { %v10304_v28 = vsel %vm388_vm2, %v389_v17, %v390_v18  ;;  %v412_v29 = vrot.slane %v356_v20, 1  ;;  %v10311_v31 = vmax.f32 %v10294_v21, 0.0  ;;  %v10314_v32 = vld [vmem:[%s10258_s8 + $0x88] sm:$0x3]  ;;  %v10317_v33 = vld [vmem:[%s10258_s8 + $0x30] sm:$0xff]  ;;  %v394_v36 = vrot.slane %v10300_v26, 1 }
  0x21   : > { %8801 = vmatprep.mubr.msk.f32.mxu0 %vm419_vm3, %v10304_v28  ;;  %v10322_v34 = vsel %vm388_vm2, %v409_v19, %v410_v23  ;;  %v10325_v35 = vsel %vm388_vm2, %v390_v18, %v392_v24  ;;  %v10329_v37 = vmax.f32 %v10297_v22, 0.0  ;;  %v10332_v38 = vld [vmem:[%s10258_s8 + $0x38] sm:$0xff]  ;;  %v395_v41 = vrot.slane %v10308_v30, 1  ;;  %v7763_v44 = vld [vmem:[%s12056_s1 + $0x10] sm:$0xf]  ;;  %v10374_v54 = vld [vmem:[%s10258_s8 + $0x48] sm:$0xff] }
  0x22   : > { %8813 = vmatprep.mubr.msk.f32.mxu1 %vm419_vm3, %v10322_v34  ;;  %8802 = vmatmul.mubr.msk.f32.vlgmr.msra.gmra.mrb[0].mxu0 %vm419_vm3, %v10325_v35  ;;  %v10344_v40 = vsel %vm388_vm2, %v410_v23, %v412_v29  ;;  %v414_v42 = vrot.slane %v10311_v31, 1  ;;  %v347_v43 = vmax.f32 %v323_v27, 0.0  ;;  %v359_v46 = vmax.f32 %v10314_v32, 0.0  ;;  %v10362_v49 = vld [vmem:[%s10258_s8 + $0x40] sm:$0x3]  ;;  %v10377_v55 = vld [vmem:[%s10258_s8 + $0x50] sm:$0xff] }
  0x23   : > { %8814 = vmatmul.mubr.msk.f32.vlgmr.msra.gmra.mrb[0].mxu1 %vm419_vm3, %v10344_v40  ;;  %v415_v45 = vrot.slane %v10329_v37, 1  ;;  %v10356_v47 = vmax.f32 %v10317_v33, 0.0  ;;  %v10359_v48 = vmax.f32 %v10332_v38, 0.0  ;;  %8820 = vmatpush3.msk.msra.mxu0 %vm444_vm0, %v10240_v3  ;;  %v10369_v50 = vsel %vm388_vm2, %v394_v36, %v395_v41  ;;  %v10392_v60 = vld [vmem:[%s10258_s8 + $0x58] sm:$0x3]  ;;  %p7931_p8 = scmp.ne.s32.totalorder %s10111_s25, 0 }
  0x24   : > { %8880 = vmatpush3.msk.msra.mxu1 %vm444_vm0, %v10211_v1  ;;  %v397_v51 = vrot.slane %v347_v43, 1  ;;  %v1074_v52 = vrot.slane %v10270_v7, 2  ;;  %v1075_v53 = vrot.slane %v10272_v8, 2  ;;  %8839 = vmatprep.subr.msk.mxu0 %vm444_vm0, %v10337_v39  ;;  %v417_v57 = vrot.slane %v359_v46, 1  ;;  %v7791_v36 = vld [vmem:[%s12056_s1 + $0x18] sm:$0xf] }
  0x25   : > { %8804 = vmatprep.mubr.msk.f32.mxu0 %vm419_vm3, %v10369_v50  ;;  %v10384_v56 = vsel %vm388_vm2, %v414_v42, %v415_v45  ;;  %v399_v58 = vrot.slane %v10356_v47, 1  ;;  %v400_v59 = vrot.slane %v10359_v48, 1  ;;  %8899 = vmatprep.subr.msk.mxu1 %vm444_vm0, %v7763_v44  ;;  %v350_v63 = vmax.f32 %v10362_v49, 0.0 }
  0x26   : > { %8816 = vmatprep.mubr.msk.f32.mxu1 %vm419_vm3, %v10384_v56  ;;  %v10397_v61 = vsel %vm388_vm2, %v395_v41, %v397_v51  ;;  %v1076_v62 = vsel %vm1073_vm4, %v1074_v52, %v1075_v53  ;;  %v1078_v0 = vsel %vm1073_vm4, %v1075_v53, %v1077_v25  ;;  %v10405_v1 = vsel %vm388_vm2, %v415_v45, %v417_v57  ;;  %v337_v45 = vld [vmem:[%s10258_s8 + $0x98] sm:$0xff]  ;;  %v10456_v51 = vld [vmem:[%s10258_s8 + $0xa0] sm:$0x3] }
  0x27   : > { %8805 = vmatmul.mubr.msk.f32.gmra.mrb[2].mxu0 %vm419_vm3, %v10397_v61  ;;  %v10408_v2 = vsel %vm388_vm2, %v399_v58, %v400_v59  ;;  %v10411_v3 = vmax.f32 %v10374_v54, 0.0  ;;  %v10414_v4 = vmax.f32 %v10377_v55, 0.0  ;;  %8817 = vmatmul.mubr.msk.f32.gmra.mrb[2].mxu1 %vm419_vm3, %v10405_v1  ;;  %v402_v5 = vrot.slane %v350_v63, 1 }
  0x28   : > { %8807 = vmatprep.mubr.msk.f32.mxu0 %vm419_vm3, %v10408_v2  ;;  %v1079_v11 = vrot.slane %v10300_v26, 2  ;;  %v1080_v13 = vrot.slane %v10308_v30, 2  ;;  %v353_v15 = vmax.f32 %v10392_v60, 0.0  ;;  %8881 = vmatprep.mubr.msk.f32.mxu1 %vm419_vm3, %v1076_v62  ;;  %v1082_v18 = vrot.slane %v347_v43, 2 }
  0x29   : > { %v404_v16 = vrot.slane %v10411_v3, 1  ;;  %v405_v17 = vrot.slane %v10414_v4, 1  ;;  %v1084_v19 = vrot.slane %v10356_v47, 2  ;;  %v10428_v23 = vsel %vm388_vm2, %v400_v59, %v402_v5 }
  0x2a   : > { %v10431_v24 = vsel %vm1073_vm4, %v1079_v11, %v1080_v13  ;;  %v407_v25 = vrot.slane %v353_v15, 1  ;;  %v1085_v27 = vrot.slane %v10359_v48, 2  ;;  %v10452_v42 = vsel %vm1073_vm4, %v1080_v13, %v1082_v18  ;;  %v7748_v13 = vld [vmem:[%s12056_s1 + $0xc] sm:$0xf] }
  0x2b   : > { %8808 = vmatmul.mubr.msk.f32.gmra.mrb[4].mxu0 %vm419_vm3, %v10428_v23  ;;  %v10437_v29 = vsel %vm388_vm2, %v404_v16, %v405_v17  ;;  %8882 = vmatmul.mubr.msk.f32.vlgmr.msra.gmra.mrb[4].mxu1 %vm419_vm3, %v1078_v0  ;;  %v1087_v43 = vrot.slane %v350_v63, 2  ;;  %v1089_v53 = vrot.slane %v10411_v3, 2  ;;  %v1090_v57 = vrot.slane %v10414_v4, 2 }
  0x2c   : > { %8810 = vmatprep.mubr.msk.f32.mxu0 %vm419_vm3, %v10437_v29  ;;  %v10446_v41 = vsel %vm388_vm2, %v405_v17, %v407_v25  ;;  %8900 = vmatpush3.msk.msra.mxu1 %vm444_vm0, %v7763_v44  ;;  %v10459_v52 = vsel %vm1073_vm4, %v1084_v19, %v1085_v27  ;;  %v10470_v44 = vmax.f32 %v337_v45, 0.0  ;;  %v362_v58 = vmax.f32 %v10456_v51, 0.0  ;;  %v10578_v45 = vld [vmem:[%s10258_s8 + $0xb8] sm:$0x3] }
  0x2d   : > { %8884 = vmatprep.mubr.msk.f32.mxu1 %vm419_vm3, %v10431_v24  ;;  %8919 = vmatprep.subr.msk.mxu1 %vm444_vm0, %v7791_v36  ;;  %v10476_v59 = vsel %vm1073_vm4, %v1085_v27, %v1087_v43  ;;  %v1092_v62 = vrot.slane %v353_v15, 2  ;;  %v1094_v63 = vrot.slane %v10278_v10, 2  ;;  %v10480_v0 = vsel %vm1073_vm4, %v1089_v53, %v1090_v57  ;;  %v340_v43 = vld [vmem:[%s10258_s8 + $0xb0] sm:$0xff]  ;;  %v7820_v53 = vld [vmem:[%s12056_s1 + $0x24] sm:$0xf] }
  0x2e   : > { %v1095_v5 = vrot.slane %v10282_v12, 2  ;;  %v879_v11 = vrot.slane %v362_v58, 1  ;;  %v1097_v16 = vrot.slane %v356_v20, 2  ;;  %v1099_v18 = vrot.slane %v10311_v31, 2  ;;  %v7903_v51 = vld [vmem:[%s12056_s1 + $0x38] sm:$0xf] }
  0x2f   : > { %8811 = vmatmul.mubr.msk.f32.gmra.mrb[6].mxu0 %vm419_vm3, %v10446_v41  ;;  %8885 = vmatmul.mubr.msk.f32.gmra.mrb[6].mxu1 %vm419_vm3, %v10452_v42  ;;  %v1100_v19 = vrot.slane %v10329_v37, 2  ;;  %vm2907_vm6 = vcmask (!%p7931_p8), 58368  }
  0x30   : > { %8821 = vmatprep.mubr.msk.f32.mxu0 %vm419_vm3, %v10270_v7  ;;  %8887 = vmatprep.mubr.msk.f32.mxu1 %vm419_vm3, %v10459_v52  ;;  %v877_v7 = vrot.slane %v10470_v44, 1  ;;  %v10510_v17 = vsel %vm1073_vm4, %v1094_v63, %v1095_v5  ;;  %v10524_v20 = vsel %vm1073_vm4, %v1095_v5, %v1097_v16 }
  0x31   : > { %v10529_v25 = vsel %vm1073_vm4, %v1099_v18, %v1100_v19 }
  0x32   : > { %v10498_v15 = vsel %vm388_vm2, %v877_v7, %v879_v11 }
  0x33   : > { %8822 = vmatmul.mubr.msk.f32.vlgmr.msra.gmra.mrb[0].mxu0 %vm419_vm3, %v10272_v8  ;;  %8888 = vmatmul.mubr.msk.f32.gmra.mrb[8].mxu1 %vm419_vm3, %v10476_v59  ;;  %v10503_v8 = vsel %vm1073_vm4, %v1090_v57, %v1092_v62  ;;  %v365_v57 = vmax.f32 %v10578_v45, 0.0 }
  0x34   : > { %8824 = vmatprep.mubr.msk.f32.mxu0 %vm419_vm3, %v10300_v26  ;;  %8890 = vmatprep.mubr.msk.f32.mxu1 %vm419_vm3, %v10480_v0 }
  0x35   : > { %8840 = vmatpush3.msk.msra.mxu0 %vm444_vm0, %v10337_v39  ;;  %v1102_v39 = vrot.slane %v359_v46, 2  ;;  %v7805_v46 = vld [vmem:[%s12056_s1 + $0x1c] sm:$0xf]  ;;  %v2128_v5 = vrot.slane %v365_v57, 1 }
  0x36   : > { %8859 = vmatprep.subr.msk.mxu0 %vm444_vm0, %v7748_v13 }
  0x37   : > { %8825 = vmatmul.mubr.msk.f32.gmra.mrb[2].mxu0 %vm419_vm3, %v10308_v30  ;;  %8891 = vmatmul.mubr.msk.f32.gmra.mrb[10].mxu1 %vm419_vm3, %v10503_v8  ;;  %v10540_v27 = vsel %vm1073_vm4, %v1100_v19, %v1102_v39  ;;  %v7876_v19 = vld [vmem:[%s12056_s1 + $0x34] sm:$0xf]  ;;  %v7819_v39 = vld [vmem:[%s12056_s1 + $0x20] sm:$0xf] }
  0x38   : > { %8827 = vmatprep.mubr.msk.f32.mxu0 %vm419_vm3, %v10356_v47  ;;  %8893 = vmatprep.mubr.msk.f32.mxu1 %vm419_vm3, %v10510_v17 }
  0x3b   : > { %8828 = vmatmul.mubr.msk.f32.gmra.mrb[4].mxu0 %vm419_vm3, %v10359_v48  ;;  %8894 = vmatmul.mubr.msk.f32.gmra.mrb[12].mxu1 %vm419_vm3, %v10524_v20 }
  0x3c   : > { %8830 = vmatprep.mubr.msk.f32.mxu0 %vm419_vm3, %v10411_v3  ;;  %8896 = vmatprep.mubr.msk.f32.mxu1 %vm419_vm3, %v10529_v25 }
  0x3f   : > { %8831 = vmatmul.mubr.msk.f32.gmra.mrb[6].mxu0 %vm419_vm3, %v10414_v4  ;;  %8897 = vmatmul.mubr.msk.f32.gmra.mrb[14].mxu1 %vm419_vm3, %v10540_v27 }
  0x40   : > { %8833 = vmatprep.mubr.msk.f32.mxu0 %vm419_vm3, %v10278_v10  ;;  %8901 = vmatprep.mubr.msk.f32.mxu1 %vm419_vm3, %v10304_v28  ;;  %v339_v28 = vld [vmem:[%s10258_s8 + $0xa8] sm:$0xff] }
  0x43   : > { %8834 = vmatmul.mubr.msk.f32.gmra.mrb[8].mxu0 %vm419_vm3, %v10282_v12  ;;  %8902 = vmatmul.mubr.msk.f32.vlgmr.msra.gmra.mrb[4].mxu1 %vm419_vm3, %v10325_v35  ;;  %v10573_v35 = vmax.f32 %v339_v28, 0.0 }
  0x44   : > { %8836 = vmatprep.mubr.msk.f32.mxu0 %vm419_vm3, %v10311_v31  ;;  %8920 = vmatpush3.msk.msra.mxu1 %vm444_vm0, %v7791_v36  ;;  %v10575_v36 = vmax.f32 %v340_v43, 0.0  ;;  %v7847_v43 = vld [vmem:[%s12056_s1 + $0x28] sm:$0xf] }
  0x45   : > { %8904 = vmatprep.mubr.msk.f32.mxu1 %vm419_vm3, %v10369_v50  ;;  %8939 = vmatprep.subr.msk.mxu1 %vm444_vm0, %v7805_v46  ;;  %v2125_v62 = vrot.slane %v10573_v35, 1 }
  0x46   : > { %v2126_v63 = vrot.slane %v10575_v36, 1 }
  0x47   : > { %8837 = vmatmul.mubr.msk.f32.gmra.mrb[10].mxu0 %vm419_vm3, %v10329_v37  ;;  %8905 = vmatmul.mubr.msk.f32.gmra.mrb[6].mxu1 %vm419_vm3, %v10397_v61 }
  0x48   : > { %8841 = vmatprep.mubr.msk.f32.mxu0 %vm419_vm3, %v10300_v26  ;;  %8907 = vmatprep.mubr.msk.f32.mxu1 %vm419_vm3, %v10408_v2  ;;  %v10599_v11 = vsel %vm388_vm2, %v2125_v62, %v2126_v63  ;;  %v10604_v16 = vsel %vm388_vm2, %v2126_v63, %v2128_v5  ;;  %v1529_v62 = vrot.slane %v10470_v44, 2  ;;  %v1531_v63 = vrot.slane %v362_v58, 2 }
  0x4b   : > { %8842 = vmatmul.mubr.msk.f32.vlgmr.msra.gmra.mrb[0].mxu0 %vm419_vm3, %v10308_v30  ;;  %8908 = vmatmul.mubr.msk.f32.gmra.mrb[8].mxu1 %vm419_vm3, %v10428_v23 }
  0x4c   : > { %8844 = vmatprep.mubr.msk.f32.mxu0 %vm419_vm3, %v10356_v47  ;;  %8910 = vmatprep.mubr.msk.f32.mxu1 %vm419_vm3, %v10437_v29 }
  0x4d   : > { %8860 = vmatpush3.msk.msra.mxu0 %vm444_vm0, %v7748_v13  ;;  %v336_v13 = vld [vmem:[%s10258_s8 + $0x90] sm:$0xff] }
  0x4e   : > { %8959 = vmatprep.subr.msk.mxu0 %vm444_vm0, %v7820_v53  ;;  %v10627_v18 = vmax.f32 %v336_v13, 0.0  ;;  %v10753_v13 = vsel %vm1073_vm4, %v1529_v62, %v1531_v63 }
  0x4f   : > { %8845 = vmatmul.mubr.msk.f32.gmra.mrb[2].mxu0 %vm419_vm3, %v10359_v48  ;;  %8911 = vmatmul.mubr.msk.f32.gmra.mrb[10].mxu1 %vm419_vm3, %v10446_v41 }
  0x50   : > { %8847 = vmatprep.mubr.msk.f32.mxu0 %vm419_vm3, %v10411_v3  ;;  %8913 = vmatprep.mubr.msk.f32.mxu1 %vm419_vm3, %v10322_v34 }
  0x53   : > { %8848 = vmatmul.mubr.msk.f32.gmra.mrb[4].mxu0 %vm419_vm3, %v10414_v4  ;;  %8914 = vmatmul.mubr.msk.f32.gmra.mrb[12].mxu1 %vm419_vm3, %v10344_v40 }
  0x54   : > { %8850 = vmatprep.mubr.msk.f32.mxu0 %vm419_vm3, %v10278_v10  ;;  %8916 = vmatprep.mubr.msk.f32.mxu1 %vm419_vm3, %v10384_v56 }
  0x57   : > { %8851 = vmatmul.mubr.msk.f32.gmra.mrb[6].mxu0 %vm419_vm3, %v10282_v12  ;;  %8917 = vmatmul.mubr.msk.f32.gmra.mrb[14].mxu1 %vm419_vm3, %v10405_v1 }
  0x58   : > { %8853 = vmatprep.mubr.msk.f32.mxu0 %vm419_vm3, %v10311_v31  ;;  %8921 = vmatprep.mubr.msk.f32.mxu1 %vm419_vm3, %v10369_v50 }
  0x5b   : > { %8854 = vmatmul.mubr.msk.f32.gmra.mrb[8].mxu0 %vm419_vm3, %v10329_v37  ;;  %8922 = vmatmul.mubr.msk.f32.vlgmr.msra.gmra.mrb[4].mxu1 %vm419_vm3, %v10397_v61 }
  0x5c   : > { %8856 = vmatprep.mubr.msk.f32.mxu0 %vm419_vm3, %v10627_v18  ;;  %8940 = vmatpush3.msk.msra.mxu1 %vm444_vm0, %v7805_v46  ;;  %v876_v46 = vrot.slane %v10627_v18, 1 }
  0x5d   : > { %8924 = vmatprep.mubr.msk.f32.mxu1 %vm419_vm3, %v10408_v2  ;;  %9039 = vmatprep.subr.msk.mxu1 %vm444_vm0, %v7876_v19 }
  0x5e   : > { %v10677_v28 = vsel %vm388_vm2, %v876_v46, %v877_v7  ;;  %v7875_v7 = vld [vmem:[%s12056_s1 + $0x30] sm:$0xf] }
  0x5f   : > { %8857 = vmatmul.mubr.msk.f32.gmra.mrb[10].mxu0 %vm419_vm3, %v10470_v44  ;;  %8925 = vmatmul.mubr.msk.f32.gmra.mrb[6].mxu1 %vm419_vm3, %v10428_v23 }
  0x60   : > { %8861 = vmatprep.mubr.msk.f32.mxu0 %vm419_vm3, %v10369_v50  ;;  %8927 = vmatprep.mubr.msk.f32.mxu1 %vm419_vm3, %v10437_v29 }
  0x63   : > { %8862 = vmatmul.mubr.msk.f32.vlgmr.msra.gmra.mrb[0].mxu0 %vm419_vm3, %v10397_v61  ;;  %8928 = vmatmul.mubr.msk.f32.gmra.mrb[8].mxu1 %vm419_vm3, %v10446_v41 }
  0x64   : > { %8864 = vmatprep.mubr.msk.f32.mxu0 %vm419_vm3, %v10408_v2  ;;  %8930 = vmatprep.mubr.msk.f32.mxu1 %vm419_vm3, %v10322_v34 }
  0x65   : > { %8960 = vmatpush3.msk.msra.mxu0 %vm444_vm0, %v7820_v53  ;;  %v1528_v53 = vrot.slane %v10627_v18, 2 }
  0x66   : > { %8979 = vmatprep.subr.msk.mxu0 %vm444_vm0, %v7819_v39 }
  0x67   : > { %8865 = vmatmul.mubr.msk.f32.gmra.mrb[2].mxu0 %vm419_vm3, %v10428_v23  ;;  %8931 = vmatmul.mubr.msk.f32.gmra.mrb[10].mxu1 %vm419_vm3, %v10344_v40  ;;  %v10742_v5 = vsel %vm1073_vm4, %v1528_v53, %v1529_v62 }
  0x68   : > { %8867 = vmatprep.mubr.msk.f32.mxu0 %vm419_vm3, %v10437_v29  ;;  %8933 = vmatprep.mubr.msk.f32.mxu1 %vm419_vm3, %v10384_v56 }
  0x6b   : > { %8868 = vmatmul.mubr.msk.f32.gmra.mrb[4].mxu0 %vm419_vm3, %v10446_v41  ;;  %8934 = vmatmul.mubr.msk.f32.gmra.mrb[12].mxu1 %vm419_vm3, %v10405_v1 }
  0x6c   : > { %8870 = vmatprep.mubr.msk.f32.mxu0 %vm419_vm3, %v10322_v34  ;;  %8936 = vmatprep.mubr.msk.f32.mxu1 %vm419_vm3, %v10677_v28 }
  0x6f   : > { %8871 = vmatmul.mubr.msk.f32.gmra.mrb[6].mxu0 %vm419_vm3, %v10344_v40  ;;  %8937 = vmatmul.mubr.msk.f32.gmra.mrb[14].mxu1 %vm419_vm3, %v10498_v15 }
  0x70   : > { %8873 = vmatprep.mubr.msk.f32.mxu0 %vm419_vm3, %v10384_v56  ;;  %8941 = vmatprep.mubr.msk.f32.mxu1 %vm419_vm3, %v10431_v24 }
  0x73   : > { %8874 = vmatmul.mubr.msk.f32.gmra.mrb[8].mxu0 %vm419_vm3, %v10405_v1  ;;  %8942 = vmatmul.mubr.msk.f32.vlgmr.msra.gmra.mrb[4].mxu1 %vm419_vm3, %v10452_v42 }
  0x74   : > { %8876 = vmatprep.mubr.msk.f32.mxu0 %vm419_vm3, %v10677_v28  ;;  %9040 = vmatpush3.msk.msra.mxu1 %vm444_vm0, %v7876_v19 }
  0x75   : > { %8944 = vmatprep.mubr.msk.f32.mxu1 %vm419_vm3, %v10459_v52  ;;  %9059 = vmatprep.subr.msk.mxu1 %vm444_vm0, %v7875_v7 }
  0x77   : > { %8877 = vmatmul.mubr.msk.f32.gmra.mrb[10].mxu0 %vm419_vm3, %v10498_v15  ;;  %8945 = vmatmul.mubr.msk.f32.gmra.mrb[6].mxu1 %vm419_vm3, %v10476_v59 }
  0x78   : > { %8961 = vmatprep.mubr.msk.f32.mxu0 %vm419_vm3, %v10369_v50  ;;  %8947 = vmatprep.mubr.msk.f32.mxu1 %vm419_vm3, %v10480_v0 }
  0x7b   : > { %8962 = vmatmul.mubr.msk.f32.vlgmr.msra.gmra.mrb[12].mxu0 %vm419_vm3, %v10397_v61  ;;  %8948 = vmatmul.mubr.msk.f32.gmra.mrb[8].mxu1 %vm419_vm3, %v10503_v8 }
  0x7c   : > { %8964 = vmatprep.mubr.msk.f32.mxu0 %vm419_vm3, %v10408_v2  ;;  %8950 = vmatprep.mubr.msk.f32.mxu1 %vm419_vm3, %v10510_v17 }
  0x7d   : > { %8980 = vmatpush3.msk.msra.mxu0 %vm444_vm0, %v7819_v39 }
  0x7e   : > { %8999 = vmatprep.subr.msk.mxu0 %vm444_vm0, %v7847_v43 }
  0x7f   : > { %8965 = vmatmul.mubr.msk.f32.gmra.mrb[14].mxu0 %vm419_vm3, %v10428_v23  ;;  %8951 = vmatmul.mubr.msk.f32.gmra.mrb[10].mxu1 %vm419_vm3, %v10524_v20 }
  0x80   : > { %8967 = vmatprep.mubr.msk.f32.mxu0 %vm419_vm3, %v10437_v29  ;;  %8953 = vmatprep.mubr.msk.f32.mxu1 %vm419_vm3, %v10529_v25 }
  0x83   : > { %8968 = vmatmul.mubr.msk.f32.gmra.mrb[16].mxu0 %vm419_vm3, %v10446_v41  ;;  %8954 = vmatmul.mubr.msk.f32.gmra.mrb[12].mxu1 %vm419_vm3, %v10540_v27 }
  0x84   : > { %8970 = vmatprep.mubr.msk.f32.mxu0 %vm419_vm3, %v10322_v34  ;;  %8956 = vmatprep.mubr.msk.f32.mxu1 %vm419_vm3, %v10742_v5 }
  0x87   : > { %8971 = vmatmul.mubr.msk.f32.gmra.mrb[18].mxu0 %vm419_vm3, %v10344_v40  ;;  %8957 = vmatmul.mubr.msk.f32.gmra.mrb[14].mxu1 %vm419_vm3, %v10753_v13 }
  0x88   : > { %8973 = vmatprep.mubr.msk.f32.mxu0 %vm419_vm3, %v10384_v56  ;;  %9041 = vmatprep.mubr.msk.f32.mxu1 %vm419_vm3, %v10431_v24  ;;  %v7861_v24 = vld [vmem:[%s12056_s1 + $0x2c] sm:$0xf] }
  0x8b   : > { %8974 = vmatmul.mubr.msk.f32.gmra.mrb[20].mxu0 %vm419_vm3, %v10405_v1  ;;  %9042 = vmatmul.mubr.msk.f32.vlgmr.msra.gmra.mrb[16].mxu1 %vm419_vm3, %v10452_v42 }
  0x8c   : > { %8976 = vmatprep.mubr.msk.f32.mxu0 %vm419_vm3, %v10677_v28  ;;  %9060 = vmatpush3.msk.msra.mxu1 %vm444_vm0, %v7875_v7 }
  0x8d   : > { %9044 = vmatprep.mubr.msk.f32.mxu1 %vm419_vm3, %v10459_v52  ;;  %9079 = vmatprep.subr.msk.mxu1 %vm444_vm0, %v7903_v51 }
  0x8f   : > { %8977 = vmatmul.mubr.msk.f32.gmra.mrb[22].mxu0 %vm419_vm3, %v10498_v15  ;;  %9045 = vmatmul.mubr.msk.f32.gmra.mrb[18].mxu1 %vm419_vm3, %v10476_v59 }
  0x90   : > { %8981 = vmatprep.mubr.msk.f32.mxu0 %vm419_vm3, %v10300_v26  ;;  %9047 = vmatprep.mubr.msk.f32.mxu1 %vm419_vm3, %v10480_v0  ;;  %v7917_v26 = vld [vmem:[%s12056_s1 + $0x3c] sm:$0xf] }
  0x93   : > { %8982 = vmatmul.mubr.msk.f32.vlgmr.msra.gmra.mrb[12].mxu0 %vm419_vm3, %v10308_v30  ;;  %9048 = vmatmul.mubr.msk.f32.gmra.mrb[20].mxu1 %vm419_vm3, %v10503_v8  ;;  %v2718_v30 = vrot.slane %v365_v57, 2 }
  0x94   : > { %8984 = vmatprep.mubr.msk.f32.mxu0 %vm419_vm3, %v10356_v47  ;;  %9050 = vmatprep.mubr.msk.f32.mxu1 %vm419_vm3, %v10510_v17 }
  0x95   : > { %9000 = vmatpush3.msk.msra.mxu0 %vm444_vm0, %v7847_v43 }
  0x96   : > { %9019 = vmatprep.subr.msk.mxu0 %vm444_vm0, %v7861_v24 }
  0x97   : > { %8985 = vmatmul.mubr.msk.f32.gmra.mrb[14].mxu0 %vm419_vm3, %v10359_v48  ;;  %9051 = vmatmul.mubr.msk.f32.gmra.mrb[22].mxu1 %vm419_vm3, %v10524_v20 }
  0x98   : > { %8987 = vmatprep.mubr.msk.f32.mxu0 %vm419_vm3, %v10411_v3  ;;  %9053 = vmatprep.mubr.msk.f32.mxu1 %vm419_vm3, %v10529_v25 }
  0x9b   : > { %8988 = vmatmul.mubr.msk.f32.gmra.mrb[16].mxu0 %vm419_vm3, %v10414_v4  ;;  %9054 = vmatmul.mubr.msk.f32.gmra.mrb[24].mxu1 %vm419_vm3, %v10540_v27 }
  0x9c   : > { %8990 = vmatprep.mubr.msk.f32.mxu0 %vm419_vm3, %v10278_v10  ;;  %9056 = vmatprep.mubr.msk.f32.mxu1 %vm419_vm3, %v10742_v5 }
  0x9f   : > { %8991 = vmatmul.mubr.msk.f32.gmra.mrb[18].mxu0 %vm419_vm3, %v10282_v12  ;;  %9057 = vmatmul.mubr.msk.f32.gmra.mrb[26].mxu1 %vm419_vm3, %v10753_v13 }
  0xa0   : > { %8993 = vmatprep.mubr.msk.f32.mxu0 %vm419_vm3, %v10311_v31  ;;  %9061 = vmatprep.mubr.msk.f32.mxu1 %vm419_vm3, %v10369_v50  ;;  %v10959_v50 = vld [vmem:[%s12059_s4] ss:$0 sm:$0xff] }
  0xa3   : > { %8994 = vmatmul.mubr.msk.f32.gmra.mrb[20].mxu0 %vm419_vm3, %v10329_v37  ;;  %9062 = vmatmul.mubr.msk.f32.vlgmr.msra.gmra.mrb[16].mxu1 %vm419_vm3, %v10397_v61 }
  0xa4   : > { %8996 = vmatprep.mubr.msk.f32.mxu0 %vm419_vm3, %v10627_v18  ;;  %9080 = vmatpush3.msk.msra.mxu1 %vm444_vm0, %v7903_v51 }
  0xa5   : > { %9064 = vmatprep.mubr.msk.f32.mxu1 %vm419_vm3, %v10408_v2  ;;  %9099 = vmatprep.subr.msk.mxu1 %vm444_vm0, %v7917_v26 }
  0xa7   : > { %8997 = vmatmul.mubr.msk.f32.gmra.mrb[22].mxu0 %vm419_vm3, %v10470_v44  ;;  %9065 = vmatmul.mubr.msk.f32.gmra.mrb[18].mxu1 %vm419_vm3, %v10428_v23 }
  0xa8   : > { %9001 = vmatprep.mubr.msk.f32.mxu0 %vm419_vm3, %v10356_v47  ;;  %9067 = vmatprep.mubr.msk.f32.mxu1 %vm419_vm3, %v10437_v29 }
  0xab   : > { %9002 = vmatmul.mubr.msk.f32.vlgmr.msra.gmra.mrb[12].mxu0 %vm419_vm3, %v10359_v48  ;;  %9068 = vmatmul.mubr.msk.f32.gmra.mrb[20].mxu1 %vm419_vm3, %v10446_v41 }
  0xac   : > { %9004 = vmatprep.mubr.msk.f32.mxu0 %vm419_vm3, %v10411_v3  ;;  %9070 = vmatprep.mubr.msk.f32.mxu1 %vm419_vm3, %v10322_v34 }
  0xad   : > { %9020 = vmatpush3.msk.msra.mxu0 %vm444_vm0, %v7861_v24 }
  0xaf   : > { %9005 = vmatmul.mubr.msk.f32.gmra.mrb[14].mxu0 %vm419_vm3, %v10414_v4  ;;  %9071 = vmatmul.mubr.msk.f32.gmra.mrb[22].mxu1 %vm419_vm3, %v10344_v40 }
  0xb0   : > { %9007 = vmatprep.mubr.msk.f32.mxu0 %vm419_vm3, %v10278_v10  ;;  %9073 = vmatprep.mubr.msk.f32.mxu1 %vm419_vm3, %v10384_v56  ;;  %v2715_v10 = vrot.slane %v10573_v35, 2 }
  0xb3   : > { %9008 = vmatmul.mubr.msk.f32.gmra.mrb[16].mxu0 %vm419_vm3, %v10282_v12  ;;  %9074 = vmatmul.mubr.msk.f32.gmra.mrb[24].mxu1 %vm419_vm3, %v10405_v1  ;;  %v2716_v12 = vrot.slane %v10575_v36, 2 }
  0xb4   : > { %9010 = vmatprep.mubr.msk.f32.mxu0 %vm419_vm3, %v10311_v31  ;;  %9076 = vmatprep.mubr.msk.f32.mxu1 %vm419_vm3, %v10677_v28 }
  0xb5   : > { %v2717_v31 = vsel %vm1073_vm4, %v2715_v10, %v2716_v12 }
  0xb7   : > { %9011 = vmatmul.mubr.msk.f32.gmra.mrb[18].mxu0 %vm419_vm3, %v10329_v37  ;;  %9077 = vmatmul.mubr.msk.f32.gmra.mrb[26].mxu1 %vm419_vm3, %v10498_v15 }
  0xb8   : > { %9013 = vmatprep.mubr.msk.f32.mxu0 %vm419_vm3, %v10627_v18  ;;  %9081 = vmatprep.mubr.msk.f32.mxu1 %vm419_vm3, %v10408_v2 }
  0xbb   : > { %9014 = vmatmul.mubr.msk.f32.gmra.mrb[20].mxu0 %vm419_vm3, %v10470_v44  ;;  %9082 = vmatmul.mubr.msk.f32.vlgmr.msra.gmra.mrb[16].mxu1 %vm419_vm3, %v10428_v23 }
  0xbc   : > { %9016 = vmatprep.mubr.msk.f32.mxu0 %vm419_vm3, %v10573_v35  ;;  %9100 = vmatpush3.msk.msra.mxu1 %vm444_vm0, %v7917_v26 }
  0xbd   : > { %9084 = vmatprep.mubr.msk.f32.mxu1 %vm419_vm3, %v10437_v29 }
  0xbf   : > { %9017 = vmatmul.mubr.msk.f32.gmra.mrb[22].mxu0 %vm419_vm3, %v10575_v36  ;;  %9085 = vmatmul.mubr.msk.f32.gmra.mrb[18].mxu1 %vm419_vm3, %v10446_v41 }
  0xc0   : > { %9021 = vmatprep.mubr.msk.f32.mxu0 %vm419_vm3, %v10408_v2  ;;  %9087 = vmatprep.mubr.msk.f32.mxu1 %vm419_vm3, %v10322_v34 }
  0xc3   : > { %9022 = vmatmul.mubr.msk.f32.vlgmr.msra.gmra.mrb[12].mxu0 %vm419_vm3, %v10428_v23  ;;  %9088 = vmatmul.mubr.msk.f32.gmra.mrb[20].mxu1 %vm419_vm3, %v10344_v40 }
  0xc4   : > { %9024 = vmatprep.mubr.msk.f32.mxu0 %vm419_vm3, %v10437_v29  ;;  %9090 = vmatprep.mubr.msk.f32.mxu1 %vm419_vm3, %v10384_v56 }
  0xc7   : > { %9025 = vmatmul.mubr.msk.f32.gmra.mrb[14].mxu0 %vm419_vm3, %v10446_v41  ;;  %9091 = vmatmul.mubr.msk.f32.gmra.mrb[22].mxu1 %vm419_vm3, %v10405_v1 }
  0xc8   : > { %9027 = vmatprep.mubr.msk.f32.mxu0 %vm419_vm3, %v10322_v34  ;;  %9093 = vmatprep.mubr.msk.f32.mxu1 %vm419_vm3, %v10677_v28  ;;  %v2719_v34 = vsel %vm1073_vm4, %v2716_v12, %v2718_v30 }
  0xcb   : > { %9028 = vmatmul.mubr.msk.f32.gmra.mrb[16].mxu0 %vm419_vm3, %v10344_v40  ;;  %9094 = vmatmul.mubr.msk.f32.gmra.mrb[24].mxu1 %vm419_vm3, %v10498_v15 }
  0xcc   : > { %9030 = vmatprep.mubr.msk.f32.mxu0 %vm419_vm3, %v10384_v56  ;;  %9096 = vmatprep.mubr.msk.f32.mxu1 %vm419_vm3, %v10599_v11 }
  0xcf   : > { %9031 = vmatmul.mubr.msk.f32.gmra.mrb[18].mxu0 %vm419_vm3, %v10405_v1  ;;  %9097 = vmatmul.mubr.msk.f32.gmra.mrb[26].mxu1 %vm419_vm3, %v10604_v16 }
  0xd0   : > { %9033 = vmatprep.mubr.msk.f32.mxu0 %vm419_vm3, %v10677_v28  ;;  %9101 = vmatprep.mubr.msk.f32.mxu1 %vm419_vm3, %v10459_v52 }
  0xd3   : > { %9034 = vmatmul.mubr.msk.f32.gmra.mrb[20].mxu0 %vm419_vm3, %v10498_v15  ;;  %9102 = vmatmul.mubr.msk.f32.vlgmr.msra.gmra.mrb[16].mxu1 %vm419_vm3, %v10476_v59 }
  0xd4   : > { %9036 = vmatprep.mubr.msk.f32.mxu0 %vm419_vm3, %v10599_v11  ;;  %9104 = vmatprep.mubr.msk.f32.mxu1 %vm419_vm3, %v10480_v0 }
  0xd7   : > { %9037 = vmatmul.mubr.msk.f32.gmra.mrb[22].mxu0 %vm419_vm3, %v10604_v16  ;;  %9105 = vmatmul.mubr.msk.f32.gmra.mrb[18].mxu1 %vm419_vm3, %v10503_v8 }
  0xd8   : > { %9107 = vmatprep.mubr.msk.f32.mxu1 %vm419_vm3, %v10510_v17 }
  0xdb   : > { %9108 = vmatmul.mubr.msk.f32.gmra.mrb[20].mxu1 %vm419_vm3, %v10524_v20 }
  0xdc   : > { %9110 = vmatprep.mubr.msk.f32.mxu1 %vm419_vm3, %v10529_v25 }
  0xdf   : > { %9111 = vmatmul.mubr.msk.f32.gmra.mrb[22].mxu1 %vm419_vm3, %v10540_v27 }
  0xe0   : > { %9113 = vmatprep.mubr.msk.f32.mxu1 %vm419_vm3, %v10742_v5 }
  0xe3   : > { %9114 = vmatmul.mubr.msk.f32.gmra.mrb[24].mxu1 %vm419_vm3, %v10753_v13 }
  0xe4   : > { %9116 = vmatprep.mubr.msk.f32.mxu1 %vm419_vm3, %v2717_v31 }
  0xe7   : > { %9117 = vmatmul.mubr.msk.f32.gmra.mrb[26].mxu1 %vm419_vm3, %v2719_v34 }
  0xf6   : > { %v8815_v37 = vpop.f32.mrb[0].mxu1 }
  0xf7   : > { %v554_v40 = vpop.f32.mrb[1].mxu1 }
  0xfa   : > { %v8818_v47 = vpop.f32.mrb[2].mxu1 }
  0xfb   : > { %v564_v48 = vpop.f32.mrb[3].mxu1 }
 0x136   : > { %v8863_v56 = vpop.f32.mrb[0].mxu0 }
 0x137   : > { %v954_v61 = vpop.f32.mrb[1].mxu0 }
 0x13a   : > { %v8866_v1 = vpop.f32.mrb[2].mxu0 }
 0x13b   : > { %v1034_v2 = vadd.f32 %v8866_v1, %v10959_v50  ;;  %v964_v3 = vpop.f32.mrb[3].mxu0 }
 0x13c   : > { %v1033_v4 = vadd.f32 %v10959_v50, %v964_v3 }
 0x13d   : > { %1047 = vst.msk [vmem:[#allocation2 + $0x21] sm:$0xff] %vm1043_vm5, %v1034_v2 }
 0x13e   : > { %1046 = vst.msk [vmem:[#allocation2 + $0x19] sm:$0xff] %vm1043_vm5, %v1033_v4  ;;  %v8869_v23 = vpop.f32.mrb[4].mxu0 }
 0x13f   : > { %v1036_v29 = vadd.f32 %v8869_v23, %v10959_v50  ;;  %v974_v41 = vpop.f32.mrb[5].mxu0 }
 0x140   : > { %v1035_v42 = vadd.f32 %v10959_v50, %v974_v41 }
 0x141   : > { %1049 = vst.msk [vmem:[#allocation2 + $0x39] sm:$0xff] %vm1043_vm5, %v1036_v29 }
 0x142   : > { %1048 = vst.msk [vmem:[#allocation2 + $0x31] sm:$0xff] %vm1043_vm5, %v1035_v42  ;;  %v8872_v52 = vpop.f32.mrb[6].mxu0 }
 0x143   : > { %v1038_v44 = vadd.f32 %v8872_v52, %v10959_v50  ;;  %v984_v58 = vpop.f32.mrb[7].mxu0 }
 0x144   : > { %v1037_v59 = vadd.f32 %v10959_v50, %v984_v58 }
 0x145   : > { %1051 = vst.msk [vmem:[#allocation2 + $0x51] sm:$0xff] %vm1043_vm5, %v1038_v44 }
 0x146   : > { %1050 = vst.msk [vmem:[#allocation2 + $0x49] sm:$0xff] %vm1043_vm5, %v1037_v59  ;;  %v8875_v0 = vpop.f32.mrb[8].mxu0  ;;  %v8943_v8 = vpop.f32.mrb[4].mxu1 }
 0x147   : > { %v9639_v15 = vadd.f32 %v8875_v0, %v8815_v37  ;;  %v994_v17 = vpop.f32.mrb[9].mxu0  ;;  %v1606_v25 = vpop.f32.mrb[5].mxu1 }
 0x148   : > { %v9640_v20 = vadd.f32 %v994_v17, %v554_v40 }
 0x149   : > { %v1040_v27 = vadd.f32 %v9639_v15, %v10959_v50 }
 0x14a   : > { %v1039_v35 = vadd.f32 %v9640_v20, %v10959_v50  ;;  %v8878_v36 = vpop.f32.mrb[10].mxu0  ;;  %v8946_v57 = vpop.f32.mrb[6].mxu1 }
 0x14b   : > { %1053 = vst.msk [vmem:[#allocation2 + $0x69] sm:$0xff] %vm1043_vm5, %v1040_v27  ;;  %v9641_v45 = vadd.f32 %v8878_v36, %v8818_v47  ;;  %v1004_v11 = vpop.f32.mrb[11].mxu0  ;;  %v1680_v16 = vadd.f32 %v8946_v57, %v10959_v50  ;;  %v1616_v19 = vpop.f32.mrb[7].mxu1 }
 0x14c   : > { %1052 = vst.msk [vmem:[#allocation2 + $0x61] sm:$0xff] %vm1043_vm5, %v1039_v35  ;;  %v9642_v18 = vadd.f32 %v1004_v11, %v564_v48  ;;  %v1679_v46 = vadd.f32 %v10959_v50, %v1616_v19 }
 0x14d   : > { %v1042_v39 = vadd.f32 %v9641_v45, %v10959_v50  ;;  %1693 = vst.msk [vmem:[#allocation2 + $0xb1] sm:$0xff] %vm1043_vm5, %v1680_v16 }
 0x14e   : > { %v1041_v28 = vadd.f32 %v9642_v18, %v10959_v50  ;;  %1692 = vst.msk [vmem:[#allocation2 + $0xa9] sm:$0xff] %vm1043_vm5, %v1679_v46  ;;  %v8949_v7 = vpop.f32.mrb[8].mxu1 }
 0x14f   : > { %1055 = vst.msk [vmem:[#allocation2 + $0x81] sm:$0xff] %vm1043_vm5, %v1042_v39  ;;  %v1682_v43 = vadd.f32 %v8949_v7, %v10959_v50  ;;  %v1626_v53 = vpop.f32.mrb[9].mxu1 }
 0x150   : > { %1054 = vst.msk [vmem:[#allocation2 + $0x79] sm:$0xff] %vm1043_vm5, %v1041_v28  ;;  %v1681_v62 = vadd.f32 %v10959_v50, %v1626_v53 }
 0x151   : > { %1695 = vst.msk [vmem:[#allocation2 + $0xc9] sm:$0xff] %vm1043_vm5, %v1682_v43 }
 0x152   : > { %1694 = vst.msk [vmem:[#allocation2 + $0xc1] sm:$0xff] %vm1043_vm5, %v1681_v62  ;;  %v8952_v63 = vpop.f32.mrb[10].mxu1 }
 0x153   : > { %v1684_v5 = vadd.f32 %v8952_v63, %v10959_v50  ;;  %v1636_v13 = vpop.f32.mrb[11].mxu1 }
 0x154   : > { %v1683_v51 = vadd.f32 %v10959_v50, %v1636_v13 }
 0x155   : > { %1697 = vst.msk [vmem:[#allocation2 + $0xe1] sm:$0xff] %vm1043_vm5, %v1684_v5 }
 0x156   : > { %1696 = vst.msk [vmem:[#allocation2 + $0xd9] sm:$0xff] %vm1043_vm5, %v1683_v51  ;;  %v8955_v24 = vpop.f32.mrb[12].mxu1 }
 0x157   : > { %v1686_v26 = vadd.f32 %v8955_v24, %v10959_v50  ;;  %v1646_v10 = vpop.f32.mrb[13].mxu1 }
 0x158   : > { %v1685_v12 = vadd.f32 %v10959_v50, %v1646_v10 }
 0x159   : > { %1699 = vst.msk [vmem:[#allocation2 + $0xf9] sm:$0xff] %vm1043_vm5, %v1686_v26  ;;  %v10126_v26 = vmov (!%p7931_p8), 0.0  }
 0x15a   : > { %1698 = vst.msk [vmem:[#allocation2 + $0xf1] sm:$0xff] %vm1043_vm5, %v1685_v12  ;;  %v8958_v30 = vpop.f32.mrb[14].mxu1 }
 0x15b   : > { %v1688_v31 = vadd.f32 %v8958_v30, %v10959_v50  ;;  %v1656_v34 = vpop.f32.mrb[15].mxu1 }
 0x15c   : > { %v1687_v37 = vadd.f32 %v10959_v50, %v1656_v34 }
 0x15d   : > { %1701 = vst.msk [vmem:[#allocation2 + $0x111] sm:$0xff] %vm1043_vm5, %v1688_v31 }
 0x15e   : > { %1700 = vst.msk [vmem:[#allocation2 + $0x109] sm:$0xff] %vm1043_vm5, %v1687_v37 }
 0x196   : > { %v9023_v40 = vpop.f32.mrb[12].mxu0 }
 0x197   : > { %v2275_v47 = vadd.f32 %v9023_v40, %v10959_v50  ;;  %v2203_v48 = vpop.f32.mrb[13].mxu0 }
 0x198   : > { %v2274_v56 = vadd.f32 %v10959_v50, %v2203_v48 }
 0x199   : > { %2288 = vst.msk [vmem:[#allocation2 + $0x129] sm:$0xff] %vm1043_vm5, %v2275_v47 }
 0x19a   : > { %2287 = vst.msk [vmem:[#allocation2 + $0x121] sm:$0xff] %vm1043_vm5, %v2274_v56  ;;  %v9026_v61 = vpop.f32.mrb[14].mxu0 }
 0x19b   : > { %v2277_v1 = vadd.f32 %v9026_v61, %v10959_v50  ;;  %v2213_v2 = vpop.f32.mrb[15].mxu0  ;;  %2912 = vst.msk [vmem:[#allocation2 + $0x120] sm:$0xff] (!%p7931_p8), %vm1043_vm5, %v10126_v26  ;;  %2913 = vst.msk [vmem:[#allocation2 + $0x128] sm:$0xff] (!%p7931_p8), %vm1043_vm5, %v10126_v26 }
 0x19c   : > { %v2276_v3 = vadd.f32 %v10959_v50, %v2213_v2  ;;  %2914 = vst.msk [vmem:[#allocation2 + $0x130] sm:$0x3] (!%p7931_p8), %vm2907_vm6, %v10126_v26 }
 0x19d   : > { %2290 = vst.msk [vmem:[#allocation2 + $0x141] sm:$0xff] %vm1043_vm5, %v2277_v1 }
 0x19e   : > { %2289 = vst.msk [vmem:[#allocation2 + $0x139] sm:$0xff] %vm1043_vm5, %v2276_v3  ;;  %v9029_v4 = vpop.f32.mrb[16].mxu0 }
 0x19f   : > { %v2279_v23 = vadd.f32 %v9029_v4, %v10959_v50  ;;  %v2223_v29 = vpop.f32.mrb[17].mxu0 }
 0x1a0   : > { %v2278_v41 = vadd.f32 %v10959_v50, %v2223_v29 }
 0x1a1   : > { %2292 = vst.msk [vmem:[#allocation2 + $0x159] sm:$0xff] %vm1043_vm5, %v2279_v23 }
 0x1a2   : > { %2291 = vst.msk [vmem:[#allocation2 + $0x151] sm:$0xff] %vm1043_vm5, %v2278_v41  ;;  %v9032_v42 = vpop.f32.mrb[18].mxu0 }
 0x1a3   : > { %v2281_v52 = vadd.f32 %v9032_v42, %v10959_v50  ;;  %v2233_v44 = vpop.f32.mrb[19].mxu0 }
 0x1a4   : > { %v2280_v58 = vadd.f32 %v10959_v50, %v2233_v44 }
 0x1a5   : > { %2294 = vst.msk [vmem:[#allocation2 + $0x171] sm:$0xff] %vm1043_vm5, %v2281_v52 }
 0x1a6   : > { %2293 = vst.msk [vmem:[#allocation2 + $0x169] sm:$0xff] %vm1043_vm5, %v2280_v58  ;;  %v9035_v59 = vpop.f32.mrb[20].mxu0  ;;  %v9103_v15 = vpop.f32.mrb[16].mxu1 }
 0x1a7   : > { %v2283_v0 = vadd.f32 %v9035_v59, %v10959_v50  ;;  %v2243_v8 = vpop.f32.mrb[21].mxu0  ;;  %v2865_v17 = vadd.f32 %v9103_v15, %v10959_v50  ;;  %v2793_v25 = vpop.f32.mrb[17].mxu1 }
 0x1a8   : > { %v2282_v20 = vadd.f32 %v10959_v50, %v2243_v8  ;;  %v2864_v27 = vadd.f32 %v10959_v50, %v2793_v25 }
 0x1a9   : > { %2296 = vst.msk [vmem:[#allocation2 + $0x189] sm:$0xff] %vm1043_vm5, %v2283_v0  ;;  %2878 = vst.msk [vmem:[#allocation2 + $0x1b9] sm:$0xff] %vm1043_vm5, %v2865_v17 }
 0x1aa   : > { %2295 = vst.msk [vmem:[#allocation2 + $0x181] sm:$0xff] %vm1043_vm5, %v2282_v20  ;;  %v9038_v35 = vpop.f32.mrb[22].mxu0  ;;  %2877 = vst.msk [vmem:[#allocation2 + $0x1b1] sm:$0xff] %vm1043_vm5, %v2864_v27  ;;  %v9106_v36 = vpop.f32.mrb[18].mxu1 }
 0x1ab   : > { %v2253_v45 = vpop.f32.mrb[23].mxu0  ;;  %v2867_v57 = vadd.f32 %v9106_v36, %v10959_v50  ;;  %v2803_v11 = vpop.f32.mrb[19].mxu1  ;;  %2915 = vst.msk [vmem:[#allocation2 + $0x1b0] sm:$0xff] (!%p7931_p8), %vm1043_vm5, %v10126_v26  ;;  %2916 = vst.msk [vmem:[#allocation2 + $0x1b8] sm:$0xff] (!%p7931_p8), %vm1043_vm5, %v10126_v26 }
 0x1ac   : > { %v2866_v16 = vadd.f32 %v10959_v50, %v2803_v11  ;;  %2917 = vst.msk [vmem:[#allocation2 + $0x1c0] sm:$0x3] (!%p7931_p8), %vm2907_vm6, %v10126_v26 }
 0x1ad   : > { %2880 = vst.msk [vmem:[#allocation2 + $0x1d1] sm:$0xff] %vm1043_vm5, %v2867_v57 }
 0x1ae   : > { %2879 = vst.msk [vmem:[#allocation2 + $0x1c9] sm:$0xff] %vm1043_vm5, %v2866_v16  ;;  %v9109_v18 = vpop.f32.mrb[20].mxu1 }
 0x1af   : > { %v2869_v19 = vadd.f32 %v9109_v18, %v10959_v50  ;;  %v2813_v39 = vpop.f32.mrb[21].mxu1 }
 0x1b0   : > { %v2868_v46 = vadd.f32 %v10959_v50, %v2813_v39 }
 0x1b1   : > { %2882 = vst.msk [vmem:[#allocation2 + $0x1e9] sm:$0xff] %vm1043_vm5, %v2869_v19 }
 0x1b2   : > { %2881 = vst.msk [vmem:[#allocation2 + $0x1e1] sm:$0xff] %vm1043_vm5, %v2868_v46  ;;  %v9112_v28 = vpop.f32.mrb[22].mxu1 }
 0x1b3   : > { %v2871_v7 = vadd.f32 %v9112_v28, %v10959_v50  ;;  %v2823_v43 = vpop.f32.mrb[23].mxu1 }
 0x1b4   : > { %v2870_v53 = vadd.f32 %v10959_v50, %v2823_v43 }
 0x1b5   : > { %2884 = vst.msk [vmem:[#allocation2 + $0x201] sm:$0xff] %vm1043_vm5, %v2871_v7  ;;  %2904 = sbr.rel (%p7931_p8) target bundleno = 444 (0x1bc), region = 52 }
 0x1b6   : > { %2883 = vst.msk [vmem:[#allocation2 + $0x1f9] sm:$0xff] %vm1043_vm5, %v2870_v53  ;;  %v9115_v62 = vpop.f32.mrb[24].mxu1 }
 0x1b7   : > { %v2873_v63 = vadd.f32 %v9115_v62, %v10959_v50  ;;  %v2833_v5 = vpop.f32.mrb[25].mxu1 }
 0x1b8   : > { %v2872_v13 = vadd.f32 %v10959_v50, %v2833_v5 }
 0x1b9   : > { %2886 = vst.msk [vmem:[#allocation2 + $0x219] sm:$0xff] %vm1043_vm5, %v2873_v63 }
 0x1ba   : > { %2885 = vst.msk [vmem:[#allocation2 + $0x211] sm:$0xff] %vm1043_vm5, %v2872_v13  ;;  %v9118_v51 = vpop.f32.mrb[26].mxu1 }
 0x1bb   : > { %v2843_v24 = vpop.f32.mrb[27].mxu1 }
 0x1bc PF: > { %p7932_p9 = scmp.ne.s32.totalorder %s10111_s25, 3 }
 0x1bd   : > { %vm2925_vm7 = vcmask (!%p7932_p9), 58368   ;;  %v10127_v50 = vmov (!%p7932_p9), 0.0  }
 0x1be   : > { %2921 = sbr.rel (%p7932_p9) target bundleno = 453 (0x1c5), region = 56  ;;  %2923 = vst.msk [vmem:[#allocation2 + $0x78] sm:$0xff] (!%p7932_p9), %vm1043_vm5, %v10127_v50  ;;  %2924 = vst.msk [vmem:[#allocation2 + $0x80] sm:$0xff] (!%p7932_p9), %vm1043_vm5, %v10127_v50 }
 0x1bf   : > { %2928 = vst.msk [vmem:[#allocation2 + $0x108] sm:$0xff] (!%p7932_p9), %vm1043_vm5, %v10127_v50  ;;  %2929 = vst.msk [vmem:[#allocation2 + $0x110] sm:$0xff] (!%p7932_p9), %vm1043_vm5, %v10127_v50 }
 0x1c0   : > { %2926 = vst.msk [vmem:[#allocation2 + $0x88] sm:$0x3] (!%p7932_p9), %vm2925_vm7, %v10127_v50  ;;  %2930 = vst.msk [vmem:[#allocation2 + $0x118] sm:$0x3] (!%p7932_p9), %vm2925_vm7, %v10127_v50 }
 0x1c5 PF: > { %v2971_v10 = vld [vmem:[%s12058_s3] sm:$0xf]  ;;  %v11057_v12 = vld [vmem:[%s12057_s2 + $0x8] sm:$0xff]  ;;  %v2951_v31 = vrot.slane %v10317_v33, 1  ;;  %v2952_v34 = vrot.slane %v10332_v38, 1  ;;  %v2954_v40 = vrot.slane %v10362_v49, 1 }
 0x1c6   : > { %v11059_v30 = vld [vmem:[#allocation2 + $0x121] sm:$0xff]  ;;  %9119 = vmatprep.subr.msk.mxu0 %vm444_vm0, %v2971_v10  ;;  %9133 = vmatprep.subr.mxu1 %v11057_v12  ;;  %v11065_v37 = vld [vmem:[#allocation2 + $0x129] sm:$0xff]  ;;  %v2956_v47 = vrot.slane %v10374_v54, 1  ;;  %v2957_v48 = vrot.slane %v10377_v55, 1  ;;  %v11073_v56 = vld [vmem:[#allocation2 + $0x139] sm:$0xff]  ;;  %v2959_v38 = vrot.slane %v10392_v60, 1 }
 0x1c7   : > { %9120 = vmatpush3.msk.msra.mxu0 %vm444_vm0, %v2971_v10  ;;  %9134 = vmatpush3.msra.mxu1 %v11057_v12  ;;  %v2953_v33 = vsel %vm388_vm2, %v2951_v31, %v2952_v34  ;;  %v2955_v49 = vsel %vm388_vm2, %v2952_v34, %v2954_v40  ;;  %v2961_v55 = vrot.slane %v10263_v6, 1  ;;  %v2962_v61 = vrot.slane %v10275_v9, 1  ;;  %v11089_v60 = vld [vmem:[%s12057_s2] sm:$0xff]  ;;  %v11099_v9 = vld [vmem:[#allocation2 + $0x151] sm:$0xff]  ;;  %v11141_v15 = vld [vmem:[#allocation2 + $0x1c8] sm:$0xff]  ;;  %s10128_s15 = smov 8  }
 0x1c8   : > { %9135 = vmatprep.mubr.msk.f32.mxu1 %vm1043_vm5, %v11059_v30  ;;  %9121 = vmatprep.mubr.msk.f32.mxu0 %vm419_vm3, %v2953_v33  ;;  %v2958_v54 = vsel %vm388_vm2, %v2956_v47, %v2957_v48  ;;  %v11094_v1 = vld [vmem:[#allocation2 + $0x141] sm:$0xff]  ;;  %v2960_v6 = vsel %vm388_vm2, %v2957_v48, %v2959_v38  ;;  %12078 = vst [vmem:[#allocation3_spill] sm:$0xff] %v11099_v9  ;;  %v2964_v2 = vrot.slane %v10285_v14, 1  ;;  %v2966_v4 = vrot.slane %v10294_v21, 1  ;;  %v11112_v29 = vld [vmem:[#allocation2 + $0x159] sm:$0xff]  ;;  %v11117_v14 = vld [vmem:[%s12057_s2 + $0x10] sm:$0xff] }
 0x1c9   : > { %9136 = vmatmul.mubr.msk.f32.vlgmr.msra.gmra.mrb[28].mxu1 %vm1043_vm5, %v11065_v37  ;;  %9259 = vmatprep.subr.mxu0 %v11057_v12  ;;  %v2963_v3 = vsel %vm388_vm2, %v2961_v55, %v2962_v61  ;;  %v2967_v23 = vrot.slane %v10297_v22, 1  ;;  %v11121_v22 = vld [vmem:[#allocation2 + $0x169] sm:$0xff]  ;;  %v2969_v41 = vrot.slane %v10314_v32, 1  ;;  %v11132_v52 = vld [vmem:[#allocation2 + $0x171] sm:$0xff]  ;;  %v3189_v0 = vld [vmem:[#allocation2 + $0x1b9] sm:$0xff]  ;;  %vm5489_vm8 = vcmask 130048  }
 0x1ca   : > { %9122 = vmatmul.mubr.msk.f32.vlgmr.msra.gmra.mrb[24].mxu0 %vm419_vm3, %v2955_v49  ;;  %9138 = vmatprep.mubr.msk.f32.mxu1 %vm1043_vm5, %v11073_v56  ;;  %v2965_v21 = vsel %vm388_vm2, %v2962_v61, %v2964_v2  ;;  %v3178_v44 = vld [vmem:[#allocation2 + $0x1b0] sm:$0xff]  ;;  %v3179_v59 = vld [vmem:[#allocation2 + $0x1b8] sm:$0xff]  ;;  %v11161_v27 = vld [vmem:[#allocation2 + $0x1e0] sm:$0xff] }
 0x1cb   : > { %9260 = vmatpush3.msra.mxu0 %v11057_v12  ;;  %9124 = vmatprep.mubr.msk.f32.mxu0 %vm419_vm3, %v2958_v54  ;;  %v2968_v42 = vsel %vm388_vm2, %v2966_v4, %v2967_v23  ;;  %v2970_v32 = vsel %vm388_vm2, %v2967_v23, %v2969_v41  ;;  %v3188_v58 = vld [vmem:[#allocation2 + $0x1b1] sm:$0xff]  ;;  %v11143_v8 = vld [vmem:[#allocation2 + $0x1c9] sm:$0xff]  ;;  %v11163_v35 = vld [vmem:[#allocation2 + $0x1e1] sm:$0xff] }
 0x1cc   : > { %9147 = vmatprep.subr.mxu1 %v11089_v60  ;;  %9273 = vmatprep.subr.mxu0 %v11089_v60  ;;  %v11149_v17 = vld [vmem:[#allocation2 + $0x1d0] sm:$0xff]  ;;  %v11154_v20 = vld [vmem:[%s12057_s2 + $0x18] sm:$0xff]  ;;  %12079 = vst [vmem:[#allocation4_spill] sm:$0xff] %v11163_v35  ;;  %v11174_v36 = vld [vmem:[#allocation2 + $0x1e8] sm:$0xff] }
 0x1cd   : > { %9139 = vmatmul.mubr.msk.f32.gmra.mrb[30].mxu1 %vm1043_vm5, %v11094_v1  ;;  %v11159_v25 = vld [vmem:[#allocation2 + $0x1d1] sm:$0xff]  ;;  %v11178_v45 = vld [vmem:[#allocation2 + $0x1e9] sm:$0xff]  ;;  %v11182_v11 = vld [vmem:[#allocation2 + $0x1f9] sm:$0xff] }
 0x1ce   : > { %9125 = vmatmul.mubr.msk.f32.gmra.mrb[26].mxu0 %vm419_vm3, %v2960_v6  ;;  %9141 = vmatprep.mubr.msk.f32.mxu1 %vm1043_vm5, %v11099_v9  ;;  %v11180_v57 = vld [vmem:[#allocation2 + $0x1f8] sm:$0xff]  ;;  %v11190_v16 = vld [vmem:[#allocation2 + $0x200] sm:$0xff]  ;;  %v11235_v39 = vld [vmem:[#allocation2 + $0xa8] sm:$0xff] }
 0x1cf   : > { %9127 = vmatprep.mubr.msk.f32.mxu0 %vm419_vm3, %v2963_v3  ;;  %9148 = vmatpush3.msra.mxu1 %v11089_v60  ;;  %v11194_v18 = vld [vmem:[#allocation2 + $0x201] sm:$0xff]  ;;  %v11243_v28 = vld [vmem:[#allocation2 + $0xb0] sm:$0xff]  ;;  %v11267_v13 = vld [vmem:[#allocation2 + $0xd8] sm:$0xff] }
 0x1d0   : > { %9161 = vmatprep.subr.mxu1 %v11117_v14  ;;  %v11211_v19 = vld [vmem:[%s12057_s2 + $0x20] sm:$0xff]  ;;  %v3169_v7 = vld [vmem:[#allocation2 + $0x12a] sm:$0xff]  ;;  %v11269_v51 = vld [vmem:[#allocation2 + $0x152] sm:$0xff] }
 0x1d1   : > { %9142 = vmatmul.mubr.msk.f32.gmra.mrb[32].mxu1 %vm1043_vm5, %v11112_v29  ;;  %v3168_v46 = vld [vmem:[#allocation2 + $0x122] sm:$0xff]  ;;  %v11248_v53 = vld [vmem:[#allocation2 + $0x13a] sm:$0xff]  ;;  %v11286_v50 = vld [vmem:[#allocation2 + $0xf0] sm:$0xff] }
 0x1d2   : > { %9128 = vmatmul.mubr.msk.f32.gmra.mrb[28].mxu0 %vm419_vm3, %v2965_v21  ;;  %9144 = vmatprep.mubr.msk.f32.mxu1 %vm1043_vm5, %v11121_v22  ;;  %v11246_v43 = vld [vmem:[#allocation2 + $0xc0] sm:$0xff]  ;;  %v11255_v62 = vld [vmem:[#allocation2 + $0xc8] sm:$0xff]  ;;  %v11300_v31 = vld [vmem:[#allocation2 + $0x172] sm:$0xff] }
 0x1d3   : > { %9130 = vmatprep.mubr.msk.f32.mxu0 %vm419_vm3, %v2968_v42  ;;  %v11260_v63 = vld [vmem:[%s12057_s2 + $0x28] sm:$0xff]  ;;  %v11280_v24 = vld [vmem:[#allocation2 + $0xe0] sm:$0xff]  ;;  %v11314_v40 = vld [vmem:[#allocation2 + $0x31] sm:$0xff] }
 0x1d4   : > { %v11265_v5 = vld [vmem:[#allocation2 + $0x142] sm:$0xff]  ;;  %v11284_v26 = vld [vmem:[#allocation2 + $0x15a] sm:$0xff]  ;;  %v11288_v10 = vld [vmem:[#allocation2 + $0x16a] sm:$0xff] }
 0x1d5   : > { %9145 = vmatmul.mubr.msk.f32.gmra.mrb[34].mxu1 %vm1043_vm5, %v11132_v52  ;;  %12080 = vst [vmem:[#allocation5_spill] sm:$0xff] %v11284_v26  ;;  %v11302_v34 = vld [vmem:[#allocation2 + $0x19] sm:$0xff]  ;;  %v11327_v48 = vld [vmem:[%s12057_s2 + $0x30] sm:$0xff]  ;;  %v11347_v49 = vld [vmem:[#allocation2 + $0x61] sm:$0xff] }
 0x1d6   : > { %9131 = vmatmul.mubr.msk.f32.gmra.mrb[30].mxu0 %vm419_vm3, %v2970_v32  ;;  %9149 = vmatprep.mubr.msk.f32.mxu1 %vm1043_vm5, %v3178_v44  ;;  %v11322_v47 = vld [vmem:[#allocation2 + $0x39] sm:$0xff]  ;;  %12081 = vst [vmem:[#allocation6_spill] sm:$0xff] %v11327_v48  ;;  %v11332_v33 = vld [vmem:[#allocation2 + $0x49] sm:$0xff]  ;;  %v11343_v38 = vld [vmem:[#allocation2 + $0x51] sm:$0xff] }
 0x1d7   : > { %9261 = vmatprep.mubr.msk.f32.mxu0 %vm1043_vm5, %v3188_v58  ;;  %v11355_v54 = vld [vmem:[#allocation2 + $0x69] sm:$0xff]  ;;  %v11367_v61 = vld [vmem:[#allocation2 + $0xb1] sm:$0xff]  ;;  %v11371_v6 = vld [vmem:[#allocation2 + $0xc1] sm:$0xff] }
 0x1d8   : > { %v11359_v55 = vld [vmem:[#allocation2 + $0xa9] sm:$0xff]  ;;  %v11384_v3 = vld [vmem:[%s12057_s2 + $0x38] sm:$0xff]  ;;  %v11400_v23 = vld [vmem:[#allocation2 + $0xe1] sm:$0xff] }
 0x1d9   : > { %9150 = vmatmul.mubr.msk.f32.vlgmr.msra.gmra.mrb[28].mxu1 %vm1043_vm5, %v3179_v59  ;;  %v11379_v2 = vld [vmem:[#allocation2 + $0xc9] sm:$0xff]  ;;  %12082 = vst [vmem:[#allocation7_spill] sm:$0xff] %v11384_v3  ;;  %v11389_v4 = vld [vmem:[#allocation2 + $0xd9] sm:$0xff]  ;;  %v11404_v21 = vld [vmem:[#allocation2 + $0xf1] sm:$0xff] }
 0x1da   : > { %9262 = vmatmul.mubr.msk.f32.vlgmr.msra.gmra.mrb[32].mxu0 %vm1043_vm5, %v3189_v0  ;;  %9152 = vmatprep.mubr.msk.f32.mxu1 %vm1043_vm5, %v11141_v15  ;;  %v11412_v41 = vld [vmem:[#allocation2 + $0xf9] sm:$0xff]  ;;  %v11426_v32 = vld [vmem:[#allocation2 + $0x22] sm:$0xff] }
 0x1db   : > { %9274 = vmatpush3.msra.mxu0 %v11089_v60  ;;  %9264 = vmatprep.mubr.msk.f32.mxu0 %vm1043_vm5, %v11143_v8  ;;  %v11416_v42 = vld [vmem:[#allocation2 + $0x1a] sm:$0xff]  ;;  %v11428_v44 = vld [vmem:[#allocation2 + $0x32] sm:$0xff] }
 0x1dc   : > { %9162 = vmatpush3.msra.mxu1 %v11117_v14  ;;  %9287 = vmatprep.subr.mxu0 %v11117_v14  ;;  %v11444_v59 = vld [vmem:[#allocation2 + $0x3a] sm:$0xff] }
 0x1dd   : > { %9153 = vmatmul.mubr.msk.f32.gmra.mrb[30].mxu1 %vm1043_vm5, %v11149_v17  ;;  %9175 = vmatprep.subr.mxu1 %v11154_v20  ;;  %12084 = vst [vmem:[#allocation9_spill] sm:$0xff] %v11444_v59 }
 0x1de   : > { %9265 = vmatmul.mubr.msk.f32.gmra.mrb[34].mxu0 %vm1043_vm5, %v11159_v25  ;;  %9155 = vmatprep.mubr.msk.f32.mxu1 %vm1043_vm5, %v11161_v27 }
 0x1df   : > { %9267 = vmatprep.mubr.msk.f32.mxu0 %vm1043_vm5, %v11163_v35 }
 0x1e1   : > { %9156 = vmatmul.mubr.msk.f32.gmra.mrb[32].mxu1 %vm1043_vm5, %v11174_v36 }
 0x1e2   : > { %9268 = vmatmul.mubr.msk.f32.gmra.mrb[36].mxu0 %vm1043_vm5, %v11178_v45  ;;  %9158 = vmatprep.mubr.msk.f32.mxu1 %vm1043_vm5, %v11180_v57 }
 0x1e3   : > { %9270 = vmatprep.mubr.msk.f32.mxu0 %vm1043_vm5, %v11182_v11 }
 0x1e5   : > { %9159 = vmatmul.mubr.msk.f32.gmra.mrb[34].mxu1 %vm1043_vm5, %v11190_v16 }
 0x1e6   : > { %9271 = vmatmul.mubr.msk.f32.gmra.mrb[38].mxu0 %vm1043_vm5, %v11194_v18  ;;  %9163 = vmatprep.mubr.msk.f32.mxu1 %vm1043_vm5, %v3188_v58  ;;  %v11439_v58 = vld [vmem:[%s12057_s2 + $0x40] sm:$0xff] }
 0x1e7   : > { %9275 = vmatprep.mubr.msk.f32.mxu0 %vm1043_vm5, %v11059_v30  ;;  %v11296_v30 = vld [vmem:[#allocation2 + $0xf8] sm:$0xff]  ;;  %12083 = vst [vmem:[#allocation8_spill] sm:$0xff] %v11439_v58 }
 0x1e9   : > { %9164 = vmatmul.mubr.msk.f32.vlgmr.msra.gmra.mrb[28].mxu1 %vm1043_vm5, %v3189_v0  ;;  %v11446_v0 = vld [vmem:[#allocation2 + $0x4a] sm:$0xff] }
 0x1ea   : > { %9276 = vmatmul.mubr.msk.f32.vlgmr.msra.gmra.mrb[32].mxu0 %vm1043_vm5, %v11065_v37  ;;  %9166 = vmatprep.mubr.msk.f32.mxu1 %vm1043_vm5, %v11143_v8  ;;  %v11310_v37 = vld [vmem:[#allocation2 + $0x21] sm:$0xff]  ;;  %12085 = vst [vmem:[#allocation10_spill] sm:$0xff] %v11446_v0 }
 0x1eb   : > { %9288 = vmatpush3.msra.mxu0 %v11117_v14  ;;  %9278 = vmatprep.mubr.msk.f32.mxu0 %vm1043_vm5, %v11073_v56 }
 0x1ec   : > { %9176 = vmatpush3.msra.mxu1 %v11154_v20  ;;  %9301 = vmatprep.subr.mxu0 %v11154_v20 }
 0x1ed   : > { %9167 = vmatmul.mubr.msk.f32.gmra.mrb[30].mxu1 %vm1043_vm5, %v11159_v25  ;;  %9189 = vmatprep.subr.mxu1 %v11211_v19 }
 0x1ee   : > { %9279 = vmatmul.mubr.msk.f32.gmra.mrb[34].mxu0 %vm1043_vm5, %v11094_v1  ;;  %9169 = vmatprep.mubr.msk.f32.mxu1 %vm1043_vm5, %v11163_v35 }
 0x1ef   : > { %9281 = vmatprep.mubr.msk.f32.mxu0 %vm1043_vm5, %v11099_v9 }
 0x1f1   : > { %9170 = vmatmul.mubr.msk.f32.gmra.mrb[32].mxu1 %vm1043_vm5, %v11178_v45 }
 0x1f2   : > { %9282 = vmatmul.mubr.msk.f32.gmra.mrb[36].mxu0 %vm1043_vm5, %v11112_v29  ;;  %9172 = vmatprep.mubr.msk.f32.mxu1 %vm1043_vm5, %v11182_v11 }
 0x1f3   : > { %9284 = vmatprep.mubr.msk.f32.mxu0 %vm1043_vm5, %v11121_v22 }
 0x1f5   : > { %9173 = vmatmul.mubr.msk.f32.gmra.mrb[34].mxu1 %vm1043_vm5, %v11194_v18 }
 0x1f6   : > { %9285 = vmatmul.mubr.msk.f32.gmra.mrb[38].mxu0 %vm1043_vm5, %v11132_v52  ;;  %9177 = vmatprep.mubr.msk.f32.mxu1 %vm1043_vm5, %v11235_v39 }
 0x1f7   : > { %9289 = vmatprep.mubr.msk.f32.mxu0 %vm1043_vm5, %v3168_v46  ;;  %v11459_v46 = vld [vmem:[#allocation2 + $0x52] sm:$0xff] }
 0x1f9   : > { %9178 = vmatmul.mubr.msk.f32.vlgmr.msra.gmra.mrb[28].mxu1 %vm1043_vm5, %v11243_v28 }
 0x1fa   : > { %9290 = vmatmul.mubr.msk.f32.vlgmr.msra.gmra.mrb[32].mxu0 %vm1043_vm5, %v3169_v7  ;;  %9180 = vmatprep.mubr.msk.f32.mxu1 %vm1043_vm5, %v11246_v43  ;;  %v11461_v7 = vld [vmem:[#allocation2 + $0x210] sm:$0xff] }
 0x1fb   : > { %9302 = vmatpush3.msra.mxu0 %v11154_v20  ;;  %9292 = vmatprep.mubr.msk.f32.mxu0 %vm1043_vm5, %v11248_v53 }
 0x1fc   : > { %9190 = vmatpush3.msra.mxu1 %v11211_v19  ;;  %9315 = vmatprep.subr.mxu0 %v11211_v19 }
 0x1fd   : > { %9181 = vmatmul.mubr.msk.f32.gmra.mrb[30].mxu1 %vm1043_vm5, %v11255_v62  ;;  %9203 = vmatprep.subr.mxu1 %v11260_v63 }
 0x1fe   : > { %9293 = vmatmul.mubr.msk.f32.gmra.mrb[34].mxu0 %vm1043_vm5, %v11265_v5  ;;  %9183 = vmatprep.mubr.msk.f32.mxu1 %vm1043_vm5, %v11267_v13 }
 0x1ff   : > { %9295 = vmatprep.mubr.msk.f32.mxu0 %vm1043_vm5, %v11269_v51 }
 0x201   : > { %9184 = vmatmul.mubr.msk.f32.gmra.mrb[32].mxu1 %vm1043_vm5, %v11280_v24 }
 0x202   : > { %9296 = vmatmul.mubr.msk.f32.gmra.mrb[36].mxu0 %vm1043_vm5, %v11284_v26  ;;  %9186 = vmatprep.mubr.msk.f32.mxu1 %vm1043_vm5, %v11286_v50 }
 0x203   : > { %9298 = vmatprep.mubr.msk.f32.mxu0 %vm1043_vm5, %v11288_v10 }
 0x205   : > { %9187 = vmatmul.mubr.msk.f32.gmra.mrb[34].mxu1 %vm1043_vm5, %v11296_v30 }
 0x206   : > { %9299 = vmatmul.mubr.msk.f32.gmra.mrb[38].mxu0 %vm1043_vm5, %v11300_v31  ;;  %9191 = vmatprep.mubr.msk.f32.mxu1 %vm1043_vm5, %v11302_v34 }
 0x207   : > { %9303 = vmatprep.mubr.msk.f32.mxu0 %vm1043_vm5, %v11302_v34 }
 0x209   : > { %9192 = vmatmul.mubr.msk.f32.vlgmr.msra.gmra.mrb[28].mxu1 %vm1043_vm5, %v11310_v37 }
 0x20a   : > { %9304 = vmatmul.mubr.msk.f32.vlgmr.msra.gmra.mrb[32].mxu0 %vm1043_vm5, %v11310_v37  ;;  %9194 = vmatprep.mubr.msk.f32.mxu1 %vm1043_vm5, %v11314_v40 }
 0x20b   : > { %9316 = vmatpush3.msra.mxu0 %v11211_v19  ;;  %9306 = vmatprep.mubr.msk.f32.mxu0 %vm1043_vm5, %v11314_v40 }
 0x20c   : > { %9204 = vmatpush3.msra.mxu1 %v11260_v63  ;;  %9329 = vmatprep.subr.mxu0 %v11260_v63 }
 0x20d   : > { %9195 = vmatmul.mubr.msk.f32.gmra.mrb[30].mxu1 %vm1043_vm5, %v11322_v47  ;;  %9217 = vmatprep.subr.mxu1 %v11327_v48 }
 0x20e   : > { %9307 = vmatmul.mubr.msk.f32.gmra.mrb[34].mxu0 %vm1043_vm5, %v11322_v47  ;;  %9197 = vmatprep.mubr.msk.f32.mxu1 %vm1043_vm5, %v11332_v33 }
 0x20f   : > { %9309 = vmatprep.mubr.msk.f32.mxu0 %vm1043_vm5, %v11332_v33 }
 0x211   : > { %9198 = vmatmul.mubr.msk.f32.gmra.mrb[32].mxu1 %vm1043_vm5, %v11343_v38 }
 0x212   : > { %9310 = vmatmul.mubr.msk.f32.gmra.mrb[36].mxu0 %vm1043_vm5, %v11343_v38  ;;  %9200 = vmatprep.mubr.msk.f32.mxu1 %vm1043_vm5, %v11347_v49 }
 0x213   : > { %9312 = vmatprep.mubr.msk.f32.mxu0 %vm1043_vm5, %v11347_v49 }
 0x215   : > { %9201 = vmatmul.mubr.msk.f32.gmra.mrb[34].mxu1 %vm1043_vm5, %v11355_v54 }
 0x216   : > { %9313 = vmatmul.mubr.msk.f32.gmra.mrb[38].mxu0 %vm1043_vm5, %v11355_v54  ;;  %9205 = vmatprep.mubr.msk.f32.mxu1 %vm1043_vm5, %v11359_v55 }
 0x217   : > { %9317 = vmatprep.mubr.msk.f32.mxu0 %vm1043_vm5, %v11359_v55 }
 0x219   : > { %9206 = vmatmul.mubr.msk.f32.vlgmr.msra.gmra.mrb[28].mxu1 %vm1043_vm5, %v11367_v61 }
 0x21a   : > { %9318 = vmatmul.mubr.msk.f32.vlgmr.msra.gmra.mrb[32].mxu0 %vm1043_vm5, %v11367_v61  ;;  %9208 = vmatprep.mubr.msk.f32.mxu1 %vm1043_vm5, %v11371_v6 }
 0x21b   : > { %9330 = vmatpush3.msra.mxu0 %v11260_v63  ;;  %9320 = vmatprep.mubr.msk.f32.mxu0 %vm1043_vm5, %v11371_v6 }
 0x21c   : > { %9218 = vmatpush3.msra.mxu1 %v11327_v48  ;;  %9343 = vmatprep.subr.mxu0 %v11327_v48 }
 0x21d   : > { %9209 = vmatmul.mubr.msk.f32.gmra.mrb[30].mxu1 %vm1043_vm5, %v11379_v2  ;;  %9231 = vmatprep.subr.mxu1 %v11384_v3 }
 0x21e   : > { %9321 = vmatmul.mubr.msk.f32.gmra.mrb[34].mxu0 %vm1043_vm5, %v11379_v2  ;;  %9211 = vmatprep.mubr.msk.f32.mxu1 %vm1043_vm5, %v11389_v4 }
 0x21f   : > { %9323 = vmatprep.mubr.msk.f32.mxu0 %vm1043_vm5, %v11389_v4 }
 0x221   : > { %9212 = vmatmul.mubr.msk.f32.gmra.mrb[32].mxu1 %vm1043_vm5, %v11400_v23 }
 0x222   : > { %9324 = vmatmul.mubr.msk.f32.gmra.mrb[36].mxu0 %vm1043_vm5, %v11400_v23  ;;  %9214 = vmatprep.mubr.msk.f32.mxu1 %vm1043_vm5, %v11404_v21 }
 0x223   : > { %9326 = vmatprep.mubr.msk.f32.mxu0 %vm1043_vm5, %v11404_v21 }
 0x225   : > { %9215 = vmatmul.mubr.msk.f32.gmra.mrb[34].mxu1 %vm1043_vm5, %v11412_v41 }
 0x226   : > { %9327 = vmatmul.mubr.msk.f32.gmra.mrb[38].mxu0 %vm1043_vm5, %v11412_v41  ;;  %9219 = vmatprep.mubr.msk.f32.mxu1 %vm1043_vm5, %v11141_v15 }
 0x227   : > { %9331 = vmatprep.mubr.msk.f32.mxu0 %vm1043_vm5, %v11416_v42 }
 0x229   : > { %9220 = vmatmul.mubr.msk.f32.vlgmr.msra.gmra.mrb[28].mxu1 %vm1043_vm5, %v11149_v17 }
 0x22a   : > { %9332 = vmatmul.mubr.msk.f32.vlgmr.msra.gmra.mrb[32].mxu0 %vm1043_vm5, %v11426_v32  ;;  %9222 = vmatprep.mubr.msk.f32.mxu1 %vm1043_vm5, %v11161_v27 }
 0x22b   : > { %9344 = vmatpush3.msra.mxu0 %v11327_v48  ;;  %9334 = vmatprep.mubr.msk.f32.mxu0 %vm1043_vm5, %v11428_v44  ;;  %v11463_v48 = vld [vmem:[#allocation2 + $0x62] sm:$0xff] }
 0x22c   : > { %9232 = vmatpush3.msra.mxu1 %v11384_v3  ;;  %9357 = vmatprep.subr.mxu0 %v11384_v3 }
 0x22d   : > { %9223 = vmatmul.mubr.msk.f32.gmra.mrb[30].mxu1 %vm1043_vm5, %v11174_v36  ;;  %9245 = vmatprep.subr.mxu1 %v11439_v58 }
 0x22e   : > { %9335 = vmatmul.mubr.msk.f32.gmra.mrb[34].mxu0 %vm1043_vm5, %v11444_v59  ;;  %9225 = vmatprep.mubr.msk.f32.mxu1 %vm1043_vm5, %v11180_v57  ;;  %v11471_v59 = vld [vmem:[#allocation2 + $0x218] sm:$0xff] }
 0x22f   : > { %9337 = vmatprep.mubr.msk.f32.mxu0 %vm1043_vm5, %v11446_v0  ;;  %v11475_v0 = vld [vmem:[#allocation2 + $0x6a] sm:$0xff] }
 0x231   : > { %9226 = vmatmul.mubr.msk.f32.gmra.mrb[32].mxu1 %vm1043_vm5, %v11190_v16 }
 0x232   : > { %9338 = vmatmul.mubr.msk.f32.gmra.mrb[36].mxu0 %vm1043_vm5, %v11459_v46  ;;  %9228 = vmatprep.mubr.msk.f32.mxu1 %vm1043_vm5, %v11461_v7 }
 0x233   : > { %9340 = vmatprep.mubr.msk.f32.mxu0 %vm1043_vm5, %v11463_v48 }
 0x235   : > { %9229 = vmatmul.mubr.msk.f32.gmra.mrb[34].mxu1 %vm1043_vm5, %v11471_v59 }
 0x236   : > { %9341 = vmatmul.mubr.msk.f32.gmra.mrb[38].mxu0 %vm1043_vm5, %v11475_v0  ;;  %9233 = vmatprep.mubr.msk.f32.mxu1 %vm1043_vm5, %v11073_v56 }
 0x237   : > { %9345 = vmatprep.mubr.msk.f32.mxu0 %vm1043_vm5, %v11073_v56 }
 0x239   : > { %9234 = vmatmul.mubr.msk.f32.vlgmr.msra.gmra.mrb[28].mxu1 %vm1043_vm5, %v11094_v1 }
 0x23a   : > { %9346 = vmatmul.mubr.msk.f32.vlgmr.msra.gmra.mrb[32].mxu0 %vm1043_vm5, %v11094_v1  ;;  %9236 = vmatprep.mubr.msk.f32.mxu1 %vm1043_vm5, %v11099_v9 }
 0x23b   : > { %9358 = vmatpush3.msra.mxu0 %v11384_v3  ;;  %9348 = vmatprep.mubr.msk.f32.mxu0 %vm1043_vm5, %v11099_v9  ;;  %v11505_v3 = vld [vmem:[#allocation2 + $0x181] sm:$0xff]  ;;  %v11513_v9 = vld [vmem:[#allocation2 + $0x189] sm:$0xff] }
 0x23c   : > { %9246 = vmatpush3.msra.mxu1 %v11439_v58  ;;  %9371 = vmatprep.subr.mxu0 %v11439_v58 }
 0x23d   : > { %9237 = vmatmul.mubr.msk.f32.gmra.mrb[30].mxu1 %vm1043_vm5, %v11112_v29  ;;  %9385 = vmatprep.subr.mxu1 %v11057_v12 }
 0x23e   : > { %9349 = vmatmul.mubr.msk.f32.gmra.mrb[34].mxu0 %vm1043_vm5, %v11112_v29  ;;  %9239 = vmatprep.mubr.msk.f32.mxu1 %vm1043_vm5, %v11121_v22 }
 0x23f   : > { %9351 = vmatprep.mubr.msk.f32.mxu0 %vm1043_vm5, %v11121_v22 }
 0x241   : > { %9240 = vmatmul.mubr.msk.f32.gmra.mrb[32].mxu1 %vm1043_vm5, %v11132_v52 }
 0x242   : > { %9352 = vmatmul.mubr.msk.f32.gmra.mrb[36].mxu0 %vm1043_vm5, %v11132_v52  ;;  %9242 = vmatprep.mubr.msk.f32.mxu1 %vm1043_vm5, %v11505_v3 }
 0x243   : > { %9354 = vmatprep.mubr.msk.f32.mxu0 %vm1043_vm5, %v11505_v3 }
 0x245   : > { %9243 = vmatmul.mubr.msk.f32.gmra.mrb[34].mxu1 %vm1043_vm5, %v11513_v9 }
 0x246   : > { %9355 = vmatmul.mubr.msk.f32.gmra.mrb[38].mxu0 %vm1043_vm5, %v11513_v9  ;;  %9247 = vmatprep.mubr.msk.f32.mxu1 %vm1043_vm5, %v11143_v8 }
 0x247   : > { %9359 = vmatprep.mubr.msk.f32.mxu0 %vm1043_vm5, %v11143_v8 }
 0x249   : > { %9248 = vmatmul.mubr.msk.f32.vlgmr.msra.gmra.mrb[28].mxu1 %vm1043_vm5, %v11159_v25 }
 0x24a   : > { %9360 = vmatmul.mubr.msk.f32.vlgmr.msra.gmra.mrb[32].mxu0 %vm1043_vm5, %v11159_v25  ;;  %9250 = vmatprep.mubr.msk.f32.mxu1 %vm1043_vm5, %v11163_v35 }
 0x24b   : > { %9372 = vmatpush3.msra.mxu0 %v11439_v58  ;;  %9362 = vmatprep.mubr.msk.f32.mxu0 %vm1043_vm5, %v11163_v35  ;;  %v11545_v58 = vld [vmem:[#allocation2 + $0x211] sm:$0xff]  ;;  %v11553_v35 = vld [vmem:[#allocation2 + $0x219] sm:$0xff] }
 0x24c   : > { %9386 = vmatpush3.msra.mxu1 %v11057_v12  ;;  %9511 = vmatprep.subr.mxu0 %v11057_v12 }
 0x24d   : > { %9251 = vmatmul.mubr.msk.f32.gmra.mrb[30].mxu1 %vm1043_vm5, %v11178_v45  ;;  %9399 = vmatprep.subr.mxu1 %v11089_v60 }
 0x24e   : > { %9363 = vmatmul.mubr.msk.f32.gmra.mrb[34].mxu0 %vm1043_vm5, %v11178_v45  ;;  %9253 = vmatprep.mubr.msk.f32.mxu1 %vm1043_vm5, %v11182_v11 }
 0x24f   : > { %9365 = vmatprep.mubr.msk.f32.mxu0 %vm1043_vm5, %v11182_v11 }
 0x251   : > { %9254 = vmatmul.mubr.msk.f32.gmra.mrb[32].mxu1 %vm1043_vm5, %v11194_v18 }
 0x252   : > { %9366 = vmatmul.mubr.msk.f32.gmra.mrb[36].mxu0 %vm1043_vm5, %v11194_v18  ;;  %9256 = vmatprep.mubr.msk.f32.mxu1 %vm1043_vm5, %v11545_v58 }
 0x253   : > { %9368 = vmatprep.mubr.msk.f32.mxu0 %vm1043_vm5, %v11545_v58 }
 0x255   : > { %9257 = vmatmul.mubr.msk.f32.gmra.mrb[34].mxu1 %vm1043_vm5, %v11553_v35 }
 0x256   : > { %9369 = vmatmul.mubr.msk.f32.gmra.mrb[38].mxu0 %vm1043_vm5, %v11553_v35  ;;  %9387 = vmatprep.mubr.msk.f32.mxu1 %vm1043_vm5, %v11302_v34 }
 0x257   : > { %9373 = vmatprep.mubr.msk.f32.mxu0 %vm1043_vm5, %v11248_v53 }
 0x259   : > { %9388 = vmatmul.mubr.msk.f32.vlgmr.msra.gmra.mrb[36].mxu1 %vm1043_vm5, %v11310_v37 }
 0x25a   : > { %9374 = vmatmul.mubr.msk.f32.vlgmr.msra.gmra.mrb[32].mxu0 %vm1043_vm5, %v11265_v5  ;;  %9390 = vmatprep.mubr.msk.f32.mxu1 %vm1043_vm5, %v11314_v40 }
 0x25b   : > { %9512 = vmatpush3.msra.mxu0 %v11057_v12  ;;  %9376 = vmatprep.mubr.msk.f32.mxu0 %vm1043_vm5, %v11269_v51  ;;  %v11585_v12 = vld [vmem:[#allocation2 + $0x182] sm:$0xff] }
 0x25c   : > { %9400 = vmatpush3.msra.mxu1 %v11089_v60  ;;  %9525 = vmatprep.subr.mxu0 %v11089_v60 }
 0x25d   : > { %9391 = vmatmul.mubr.msk.f32.gmra.mrb[38].mxu1 %vm1043_vm5, %v11322_v47  ;;  %9413 = vmatprep.subr.mxu1 %v11117_v14 }
 0x25e   : > { %9377 = vmatmul.mubr.msk.f32.gmra.mrb[34].mxu0 %vm1043_vm5, %v11284_v26  ;;  %9393 = vmatprep.mubr.msk.f32.mxu1 %vm1043_vm5, %v11332_v33  ;;  %v11595_v26 = vld [vmem:[#allocation2 + $0x18a] sm:$0xff] }
 0x25f   : > { %9379 = vmatprep.mubr.msk.f32.mxu0 %vm1043_vm5, %v11288_v10 }
 0x261   : > { %9394 = vmatmul.mubr.msk.f32.gmra.mrb[40].mxu1 %vm1043_vm5, %v11343_v38 }
 0x262   : > { %9380 = vmatmul.mubr.msk.f32.gmra.mrb[36].mxu0 %vm1043_vm5, %v11300_v31  ;;  %9396 = vmatprep.mubr.msk.f32.mxu1 %vm1043_vm5, %v11347_v49 }
 0x263   : > { %9382 = vmatprep.mubr.msk.f32.mxu0 %vm1043_vm5, %v11585_v12 }
 0x265   : > { %9397 = vmatmul.mubr.msk.f32.gmra.mrb[42].mxu1 %vm1043_vm5, %v11355_v54 }
 0x266   : > { %9383 = vmatmul.mubr.msk.f32.gmra.mrb[38].mxu0 %vm1043_vm5, %v11595_v26  ;;  %9401 = vmatprep.mubr.msk.f32.mxu1 %vm1043_vm5, %v11235_v39  ;;  %v3136_v39 = vld [vmem:[#allocation2 + $0x7a] sm:$0xff] }
 0x267   : > { %9513 = vmatprep.mubr.msk.f32.mxu0 %vm1043_vm5, %v11359_v55 }
 0x269   : > { %9402 = vmatmul.mubr.msk.f32.vlgmr.msra.gmra.mrb[36].mxu1 %vm1043_vm5, %v11243_v28  ;;  %v3137_v28 = vld [vmem:[#allocation2 + $0x82] sm:$0xff] }
 0x26a   : > { %9514 = vmatmul.mubr.msk.f32.vlgmr.msra.gmra.mrb[40].mxu0 %vm1043_vm5, %v11367_v61  ;;  %9404 = vmatprep.mubr.msk.f32.mxu1 %vm1043_vm5, %v11246_v43 }
 0x26b   : > { %9526 = vmatpush3.msra.mxu0 %v11089_v60  ;;  %9516 = vmatprep.mubr.msk.f32.mxu0 %vm1043_vm5, %v11371_v6  ;;  %v12086_v60 = vld [vmem:[#allocation9_spill] sm:$0xff] }
 0x26c   : > { %9414 = vmatpush3.msra.mxu1 %v11117_v14  ;;  %9539 = vmatprep.subr.mxu0 %v11117_v14 }
 0x26d   : > { %9405 = vmatmul.mubr.msk.f32.gmra.mrb[38].mxu1 %vm1043_vm5, %v11255_v62  ;;  %9427 = vmatprep.subr.mxu1 %v11154_v20 }
 0x26e   : > { %9517 = vmatmul.mubr.msk.f32.gmra.mrb[42].mxu0 %vm1043_vm5, %v11379_v2  ;;  %9407 = vmatprep.mubr.msk.f32.mxu1 %vm1043_vm5, %v11267_v13 }
 0x26f   : > { %9519 = vmatprep.mubr.msk.f32.mxu0 %vm1043_vm5, %v11389_v4 }
 0x271   : > { %9408 = vmatmul.mubr.msk.f32.gmra.mrb[40].mxu1 %vm1043_vm5, %v11280_v24 }
 0x272   : > { %9520 = vmatmul.mubr.msk.f32.gmra.mrb[44].mxu0 %vm1043_vm5, %v11400_v23  ;;  %9410 = vmatprep.mubr.msk.f32.mxu1 %vm1043_vm5, %v11286_v50 }
 0x273   : > { %9522 = vmatprep.mubr.msk.f32.mxu0 %vm1043_vm5, %v11404_v21 }
 0x275   : > { %9411 = vmatmul.mubr.msk.f32.gmra.mrb[42].mxu1 %vm1043_vm5, %v11296_v30 }
 0x276   : > { %9523 = vmatmul.mubr.msk.f32.gmra.mrb[46].mxu0 %vm1043_vm5, %v11412_v41  ;;  %9415 = vmatprep.mubr.msk.f32.mxu1 %vm1043_vm5, %v11359_v55 }
 0x277   : > { %9527 = vmatprep.mubr.msk.f32.mxu0 %vm1043_vm5, %v11302_v34 }
 0x279   : > { %9416 = vmatmul.mubr.msk.f32.vlgmr.msra.gmra.mrb[36].mxu1 %vm1043_vm5, %v11367_v61 }
 0x27a   : > { %9528 = vmatmul.mubr.msk.f32.vlgmr.msra.gmra.mrb[40].mxu0 %vm1043_vm5, %v11310_v37  ;;  %9418 = vmatprep.mubr.msk.f32.mxu1 %vm1043_vm5, %v11371_v6 }
 0x27b   : > { %9540 = vmatpush3.msra.mxu0 %v11117_v14  ;;  %9530 = vmatprep.mubr.msk.f32.mxu0 %vm1043_vm5, %v11314_v40  ;;  %v12087_v14 = vld [vmem:[#allocation10_spill] sm:$0xff] }
 0x27c   : > { %9428 = vmatpush3.msra.mxu1 %v11154_v20  ;;  %9553 = vmatprep.subr.mxu0 %v11154_v20 }
 0x27d   : > { %9419 = vmatmul.mubr.msk.f32.gmra.mrb[38].mxu1 %vm1043_vm5, %v11379_v2  ;;  %9441 = vmatprep.subr.mxu1 %v11211_v19 }
 0x27e   : > { %9531 = vmatmul.mubr.msk.f32.gmra.mrb[42].mxu0 %vm1043_vm5, %v11322_v47  ;;  %9421 = vmatprep.mubr.msk.f32.mxu1 %vm1043_vm5, %v11389_v4 }
 0x27f   : > { %9533 = vmatprep.mubr.msk.f32.mxu0 %vm1043_vm5, %v11332_v33 }
 0x281   : > { %9422 = vmatmul.mubr.msk.f32.gmra.mrb[40].mxu1 %vm1043_vm5, %v11400_v23 }
 0x282   : > { %9534 = vmatmul.mubr.msk.f32.gmra.mrb[44].mxu0 %vm1043_vm5, %v11343_v38  ;;  %9424 = vmatprep.mubr.msk.f32.mxu1 %vm1043_vm5, %v11404_v21 }
 0x283   : > { %9536 = vmatprep.mubr.msk.f32.mxu0 %vm1043_vm5, %v11347_v49 }
 0x285   : > { %9425 = vmatmul.mubr.msk.f32.gmra.mrb[42].mxu1 %vm1043_vm5, %v11412_v41 }
 0x286   : > { %9537 = vmatmul.mubr.msk.f32.gmra.mrb[46].mxu0 %vm1043_vm5, %v11355_v54  ;;  %9429 = vmatprep.mubr.msk.f32.mxu1 %vm1043_vm5, %v11141_v15  ;;  %v12088_v15 = vld [vmem:[#allocation3_spill] sm:$0xff] }
 0x287   : > { %9541 = vmatprep.mubr.msk.f32.mxu0 %vm1043_vm5, %v11416_v42 }
 0x289   : > { %9430 = vmatmul.mubr.msk.f32.vlgmr.msra.gmra.mrb[36].mxu1 %vm1043_vm5, %v11149_v17 }
 0x28a   : > { %9542 = vmatmul.mubr.msk.f32.vlgmr.msra.gmra.mrb[40].mxu0 %vm1043_vm5, %v11426_v32  ;;  %9432 = vmatprep.mubr.msk.f32.mxu1 %vm1043_vm5, %v11161_v27 }
 0x28b   : > { %9554 = vmatpush3.msra.mxu0 %v11154_v20  ;;  %9544 = vmatprep.mubr.msk.f32.mxu0 %vm1043_vm5, %v11428_v44 }
 0x28c   : > { %9442 = vmatpush3.msra.mxu1 %v11211_v19  ;;  %9567 = vmatprep.subr.mxu0 %v11211_v19 }
 0x28d   : > { %9433 = vmatmul.mubr.msk.f32.gmra.mrb[38].mxu1 %vm1043_vm5, %v11174_v36  ;;  %9455 = vmatprep.subr.mxu1 %v11260_v63 }
 0x28e   : > { %9545 = vmatmul.mubr.msk.f32.gmra.mrb[42].mxu0 %vm1043_vm5, %v12086_v60  ;;  %9435 = vmatprep.mubr.msk.f32.mxu1 %vm1043_vm5, %v11180_v57  ;;  %v12090_v57 = vld [vmem:[#allocation4_spill] sm:$0xff] }
 0x28f   : > { %9547 = vmatprep.mubr.msk.f32.mxu0 %vm1043_vm5, %v12087_v14 }
 0x291   : > { %9436 = vmatmul.mubr.msk.f32.gmra.mrb[40].mxu1 %vm1043_vm5, %v11190_v16  ;;  %v3127_v16 = vld [vmem:[#allocation2 + $0x81] sm:$0xff] }
 0x292   : > { %9548 = vmatmul.mubr.msk.f32.gmra.mrb[44].mxu0 %vm1043_vm5, %v11459_v46  ;;  %9438 = vmatprep.mubr.msk.f32.mxu1 %vm1043_vm5, %v11461_v7 }
 0x293   : > { %9550 = vmatprep.mubr.msk.f32.mxu0 %vm1043_vm5, %v11463_v48 }
 0x295   : > { %9439 = vmatmul.mubr.msk.f32.gmra.mrb[42].mxu1 %vm1043_vm5, %v11471_v59 }
 0x296   : > { %9551 = vmatmul.mubr.msk.f32.gmra.mrb[46].mxu0 %vm1043_vm5, %v11475_v0  ;;  %9443 = vmatprep.mubr.msk.f32.mxu1 %vm1043_vm5, %v11073_v56 }
 0x297   : > { %9555 = vmatprep.mubr.msk.f32.mxu0 %vm1043_vm5, %v11073_v56  ;;  %v12089_v56 = vld [vmem:[#allocation6_spill] sm:$0xff] }
 0x299   : > { %9444 = vmatmul.mubr.msk.f32.vlgmr.msra.gmra.mrb[36].mxu1 %vm1043_vm5, %v11094_v1 }
 0x29a   : > { %9556 = vmatmul.mubr.msk.f32.vlgmr.msra.gmra.mrb[40].mxu0 %vm1043_vm5, %v11094_v1  ;;  %9446 = vmatprep.mubr.msk.f32.mxu1 %vm1043_vm5, %v12088_v15 }
 0x29b   : > { %9568 = vmatpush3.msra.mxu0 %v11211_v19  ;;  %9558 = vmatprep.mubr.msk.f32.mxu0 %vm1043_vm5, %v12088_v15  ;;  %v3157_v19 = vld [vmem:[#allocation2 + $0x111] sm:$0xff] }
 0x29c   : > { %9456 = vmatpush3.msra.mxu1 %v11260_v63  ;;  %9581 = vmatprep.subr.mxu0 %v11260_v63 }
 0x29d   : > { %v11724_v17 = vpop.f32.mrb[24].mxu0  ;;  %9447 = vmatmul.mubr.msk.f32.gmra.mrb[38].mxu1 %vm1043_vm5, %v11112_v29  ;;  %9469 = vmatprep.subr.mxu1 %v12089_v56 }
 0x29e   : > { %v11729_v1 = vpop.f32.mrb[25].mxu0  ;;  %9559 = vmatmul.mubr.msk.f32.gmra.mrb[42].mxu0 %vm1043_vm5, %v11112_v29  ;;  %9449 = vmatprep.mubr.msk.f32.mxu1 %vm1043_vm5, %v11121_v22 }
 0x29f   : > { %9561 = vmatprep.mubr.msk.f32.mxu0 %vm1043_vm5, %v11121_v22 }
 0x2a1   : > { %v11737_v20 = vpop.f32.mrb[26].mxu0  ;;  %9450 = vmatmul.mubr.msk.f32.gmra.mrb[40].mxu1 %vm1043_vm5, %v11132_v52 }
 0x2a2   : > { %v11741_v27 = vpop.f32.mrb[27].mxu0  ;;  %9562 = vmatmul.mubr.msk.f32.gmra.mrb[44].mxu0 %vm1043_vm5, %v11132_v52  ;;  %9452 = vmatprep.mubr.msk.f32.mxu1 %vm1043_vm5, %v11505_v3 }
 0x2a3   : > { %9564 = vmatprep.mubr.msk.f32.mxu0 %vm1043_vm5, %v11505_v3 }
 0x2a5   : > { %v11749_v29 = vpop.f32.mrb[28].mxu0  ;;  %9453 = vmatmul.mubr.msk.f32.gmra.mrb[42].mxu1 %vm1043_vm5, %v11513_v9 }
 0x2a6   : > { %v11753_v22 = vpop.f32.mrb[29].mxu0  ;;  %9565 = vmatmul.mubr.msk.f32.gmra.mrb[46].mxu0 %vm1043_vm5, %v11513_v9  ;;  %9457 = vmatprep.mubr.msk.f32.mxu1 %vm1043_vm5, %v11143_v8  ;;  %v12091_v9 = vld [vmem:[#allocation7_spill] sm:$0xff] }
 0x2a7   : > { %9569 = vmatprep.mubr.msk.f32.mxu0 %vm1043_vm5, %v11143_v8  ;;  %v12092_v8 = vld [vmem:[#allocation8_spill] sm:$0xff] }
 0x2a9   : > { %v11761_v52 = vpop.f32.mrb[30].mxu0  ;;  %9458 = vmatmul.mubr.msk.f32.vlgmr.msra.gmra.mrb[36].mxu1 %vm1043_vm5, %v11159_v25 }
 0x2aa   : > { %v11765_v36 = vpop.f32.mrb[31].mxu0  ;;  %9570 = vmatmul.mubr.msk.f32.vlgmr.msra.gmra.mrb[40].mxu0 %vm1043_vm5, %v11159_v25  ;;  %9460 = vmatprep.mubr.msk.f32.mxu1 %vm1043_vm5, %v12090_v57  ;;  %v12093_v25 = vld [vmem:[#allocation5_spill] sm:$0xff] }
 0x2ab   : > { %9582 = vmatpush3.msra.mxu0 %v11260_v63  ;;  %9572 = vmatprep.mubr.msk.f32.mxu0 %vm1043_vm5, %v12090_v57 }
 0x2ac   : > { %9470 = vmatpush3.msra.mxu1 %v12089_v56  ;;  %9595 = vmatprep.subr.mxu0 %v12089_v56 }
 0x2ad   : > { %9461 = vmatmul.mubr.msk.f32.gmra.mrb[38].mxu1 %vm1043_vm5, %v11178_v45  ;;  %9483 = vmatprep.subr.mxu1 %v12091_v9 }
 0x2ae   : > { %9573 = vmatmul.mubr.msk.f32.gmra.mrb[42].mxu0 %vm1043_vm5, %v11178_v45  ;;  %9463 = vmatprep.mubr.msk.f32.mxu1 %vm1043_vm5, %v11182_v11  ;;  %v3147_v45 = vld [vmem:[#allocation2 + $0x110] sm:$0xff] }
 0x2af   : > { %9575 = vmatprep.mubr.msk.f32.mxu0 %vm1043_vm5, %v11182_v11  ;;  %v3126_v11 = vld [vmem:[#allocation2 + $0x79] sm:$0xff] }
 0x2b1   : > { %9464 = vmatmul.mubr.msk.f32.gmra.mrb[40].mxu1 %vm1043_vm5, %v11194_v18 }
 0x2b2   : > { %9576 = vmatmul.mubr.msk.f32.gmra.mrb[44].mxu0 %vm1043_vm5, %v11194_v18  ;;  %9466 = vmatprep.mubr.msk.f32.mxu1 %vm1043_vm5, %v11545_v58  ;;  %v3156_v18 = vld [vmem:[#allocation2 + $0x109] sm:$0xff] }
 0x2b3   : > { %9578 = vmatprep.mubr.msk.f32.mxu0 %vm1043_vm5, %v11545_v58 }
 0x2b5   : > { %9467 = vmatmul.mubr.msk.f32.gmra.mrb[42].mxu1 %vm1043_vm5, %v11553_v35 }
 0x2b6   : > { %9579 = vmatmul.mubr.msk.f32.gmra.mrb[46].mxu0 %vm1043_vm5, %v11553_v35  ;;  %9471 = vmatprep.mubr.msk.f32.mxu1 %vm1043_vm5, %v11246_v43  ;;  %v3146_v35 = vld [vmem:[#allocation2 + $0x108] sm:$0xff] }
 0x2b7   : > { %9583 = vmatprep.mubr.msk.f32.mxu0 %vm1043_vm5, %v11248_v53 }
 0x2b9   : > { %9472 = vmatmul.mubr.msk.f32.vlgmr.msra.gmra.mrb[36].mxu1 %vm1043_vm5, %v11255_v62 }
 0x2ba   : > { %9584 = vmatmul.mubr.msk.f32.vlgmr.msra.gmra.mrb[40].mxu0 %vm1043_vm5, %v11265_v5  ;;  %9474 = vmatprep.mubr.msk.f32.mxu1 %vm1043_vm5, %v11267_v13  ;;  %v7933_v13 = vld [vmem:[%s12061_s6] ss:$0 sm:$0xff] }
 0x2bb   : > { %9596 = vmatpush3.msra.mxu0 %v12089_v56  ;;  %9586 = vmatprep.mubr.msk.f32.mxu0 %vm1043_vm5, %v11269_v51  ;;  %v3080_v34 = vadd.f32 %v11737_v20, %v7933_v13  ;;  %v3090_v3 = vadd.f32 %v11749_v29, %v7933_v13  ;;  %v3100_v58 = vadd.f32 %v11761_v52, %v7933_v13 }
 0x2bc   : > { %9484 = vmatpush3.msra.mxu1 %v12091_v9  ;;  %9609 = vmatprep.subr.mxu0 %v12091_v9 }
 0x2bd   : > { %9475 = vmatmul.mubr.msk.f32.gmra.mrb[38].mxu1 %vm1043_vm5, %v11280_v24  ;;  %9497 = vmatprep.subr.mxu1 %v12092_v8  ;;  %v3070_v24 = vadd.f32 %v11724_v17, %v7933_v13 }
 0x2be   : > { %9587 = vmatmul.mubr.msk.f32.gmra.mrb[42].mxu0 %vm1043_vm5, %v12093_v25  ;;  %9477 = vmatprep.mubr.msk.f32.mxu1 %vm1043_vm5, %v11286_v50  ;;  %v7943_v50 = vld [vmem:[%s12060_s5] ss:$0 sm:$0xff] }
 0x2bf   : > { %9589 = vmatprep.mubr.msk.f32.mxu0 %vm1043_vm5, %v11288_v10 }
 0x2c1   : > { %9478 = vmatmul.mubr.msk.f32.gmra.mrb[40].mxu1 %vm1043_vm5, %v11296_v30  ;;  %v11918_v30 = vadd.f32 %v7943_v50, %v3070_v24 }
 0x2c2   : > { %9590 = vmatmul.mubr.msk.f32.gmra.mrb[44].mxu0 %vm1043_vm5, %v11300_v31  ;;  %9480 = vmatprep.mubr.msk.f32.mxu1 %vm1043_vm5, %v3146_v35  ;;  %v3065_v31 = vadd.f32 %v7933_v13, %v11729_v1 }
 0x2c3   : > { %9592 = vmatprep.mubr.msk.f32.mxu0 %vm1043_vm5, %v11585_v12 }
 0x2c5   : > { %9481 = vmatmul.mubr.msk.f32.gmra.mrb[42].mxu1 %vm1043_vm5, %v3147_v45 }
 0x2c6   : > { %9593 = vmatmul.mubr.msk.f32.gmra.mrb[46].mxu0 %vm1043_vm5, %v11595_v26  ;;  %9485 = vmatprep.mubr.msk.f32.mxu1 %vm1043_vm5, %v11314_v40 }
 0x2c7   : > { %9597 = vmatprep.mubr.msk.f32.mxu0 %vm1043_vm5, %v11314_v40 }
 0x2c9   : > { %9486 = vmatmul.mubr.msk.f32.vlgmr.msra.gmra.mrb[36].mxu1 %vm1043_vm5, %v11322_v47 }
 0x2ca   : > { %9598 = vmatmul.mubr.msk.f32.vlgmr.msra.gmra.mrb[40].mxu0 %vm1043_vm5, %v11322_v47  ;;  %9488 = vmatprep.mubr.msk.f32.mxu1 %vm1043_vm5, %v11332_v33 }
 0x2cb   : > { %9610 = vmatpush3.msra.mxu0 %v12091_v9  ;;  %9600 = vmatprep.mubr.msk.f32.mxu0 %vm1043_vm5, %v11332_v33  ;;  %v11925_v33 = vadd.f32 %v7943_v50, %v3080_v34 }
 0x2cc   : > { %9498 = vmatpush3.msra.mxu1 %v12092_v8  ;;  %9623 = vmatprep.subr.mxu0 %v12092_v8 }
 0x2cd   : > { %9489 = vmatmul.mubr.msk.f32.gmra.mrb[38].mxu1 %vm1043_vm5, %v11343_v38 }
 0x2ce   : > { %9601 = vmatmul.mubr.msk.f32.gmra.mrb[42].mxu0 %vm1043_vm5, %v11343_v38  ;;  %9491 = vmatprep.mubr.msk.f32.mxu1 %vm1043_vm5, %v11347_v49  ;;  %v3075_v38 = vadd.f32 %v7933_v13, %v11741_v27 }
 0x2cf   : > { %9603 = vmatprep.mubr.msk.f32.mxu0 %vm1043_vm5, %v11347_v49  ;;  %v3085_v49 = vadd.f32 %v7933_v13, %v11753_v22 }
 0x2d1   : > { %9492 = vmatmul.mubr.msk.f32.gmra.mrb[40].mxu1 %vm1043_vm5, %v11355_v54 }
 0x2d2   : > { %9604 = vmatmul.mubr.msk.f32.gmra.mrb[44].mxu0 %vm1043_vm5, %v11355_v54  ;;  %9494 = vmatprep.mubr.msk.f32.mxu1 %vm1043_vm5, %v3126_v11 }
 0x2d3   : > { %9606 = vmatprep.mubr.msk.f32.mxu0 %vm1043_vm5, %v3126_v11 }
 0x2d5   : > { %9495 = vmatmul.mubr.msk.f32.gmra.mrb[42].mxu1 %vm1043_vm5, %v3127_v16 }
 0x2d6   : > { %9607 = vmatmul.mubr.msk.f32.gmra.mrb[46].mxu0 %vm1043_vm5, %v3127_v16  ;;  %9499 = vmatprep.mubr.msk.f32.mxu1 %vm1043_vm5, %v11371_v6 }
 0x2d7   : > { %9611 = vmatprep.mubr.msk.f32.mxu0 %vm1043_vm5, %v11371_v6 }
 0x2d9   : > { %9500 = vmatmul.mubr.msk.f32.vlgmr.msra.gmra.mrb[36].mxu1 %vm1043_vm5, %v11379_v2 }
 0x2da   : > { %9612 = vmatmul.mubr.msk.f32.vlgmr.msra.gmra.mrb[40].mxu0 %vm1043_vm5, %v11379_v2  ;;  %9502 = vmatprep.mubr.msk.f32.mxu1 %vm1043_vm5, %v11389_v4  ;;  %v11932_v2 = vadd.f32 %v7943_v50, %v3075_v38 }
 0x2db   : > { %9624 = vmatpush3.msra.mxu0 %v12092_v8  ;;  %9614 = vmatprep.mubr.msk.f32.mxu0 %vm1043_vm5, %v11389_v4  ;;  %v11937_v4 = vadd.f32 %v7943_v50, %v3085_v49 }
 0x2dd   : > { %9503 = vmatmul.mubr.msk.f32.gmra.mrb[38].mxu1 %vm1043_vm5, %v11400_v23 }
 0x2de   : > { %9615 = vmatmul.mubr.msk.f32.gmra.mrb[42].mxu0 %vm1043_vm5, %v11400_v23  ;;  %9505 = vmatprep.mubr.msk.f32.mxu1 %vm1043_vm5, %v11404_v21  ;;  %v3095_v23 = vadd.f32 %v7933_v13, %v11765_v36 }
 0x2df   : > { %9617 = vmatprep.mubr.msk.f32.mxu0 %vm1043_vm5, %v11404_v21 }
 0x2e0   : > { %v11946_v59 = vadd.f32 %v7943_v50, %v3095_v23 }
 0x2e1   : > { %9506 = vmatmul.mubr.msk.f32.gmra.mrb[40].mxu1 %vm1043_vm5, %v11412_v41 }
 0x2e2   : > { %9618 = vmatmul.mubr.msk.f32.gmra.mrb[44].mxu0 %vm1043_vm5, %v11412_v41  ;;  %9508 = vmatprep.mubr.msk.f32.mxu1 %vm1043_vm5, %v3156_v18 }
 0x2e3   : > { %9620 = vmatprep.mubr.msk.f32.mxu0 %vm1043_vm5, %v3156_v18 }
 0x2e5   : > { %9509 = vmatmul.mubr.msk.f32.gmra.mrb[42].mxu1 %vm1043_vm5, %v3157_v19 }
 0x2e6   : > { %9621 = vmatmul.mubr.msk.f32.gmra.mrb[46].mxu0 %vm1043_vm5, %v3157_v19 }
 0x2e7   : > { %9625 = vmatprep.mubr.msk.f32.mxu0 %vm1043_vm5, %v11428_v44  ;;  %v11942_v44 = vadd.f32 %v7943_v50, %v3090_v3 }
 0x2ea   : > { %9626 = vmatmul.mubr.msk.f32.vlgmr.msra.gmra.mrb[40].mxu0 %vm1043_vm5, %v12086_v60  ;;  %v11951_v60 = vadd.f32 %v7943_v50, %v3100_v58 }
 0x2eb   : > { %9628 = vmatprep.mubr.msk.f32.mxu0 %vm1043_vm5, %v12087_v14 }
 0x2ee   : > { %9629 = vmatmul.mubr.msk.f32.gmra.mrb[42].mxu0 %vm1043_vm5, %v11459_v46 }
 0x2ef   : > { %9631 = vmatprep.mubr.msk.f32.mxu0 %vm1043_vm5, %v11463_v48  ;;  %v11923_v48 = vadd.f32 %v7943_v50, %v3065_v31 }
 0x2f2   : > { %9632 = vmatmul.mubr.msk.f32.gmra.mrb[44].mxu0 %vm1043_vm5, %v11475_v0 }
 0x2f3   : > { %9634 = vmatprep.mubr.msk.f32.mxu0 %vm1043_vm5, %v3136_v39 }
 0x2f6   : > { %9635 = vmatmul.mubr.msk.f32.gmra.mrb[46].mxu0 %vm1043_vm5, %v3137_v28 }
 0x31c   : > { %v9249_v43 = vpop.f32.mrb[28].mxu1 }
 0x31d   : > { %v4331_v53 = vpop.f32.mrb[29].mxu1  ;;  %v4379_v15 = vadd.f32 %v9249_v43, %v11918_v30 }
 0x31e   : > { %v4378_v1 = vadd.f32 %v4331_v53, %v11923_v48 }
 0x320   : > { %v9252_v62 = vpop.f32.mrb[30].mxu1 }
 0x321   : > { %v4341_v63 = vpop.f32.mrb[31].mxu1  ;;  %v4381_v20 = vadd.f32 %v9252_v62, %v11925_v33 }
 0x322   : > { %v4380_v36 = vadd.f32 %v4341_v63, %v11932_v2 }
 0x324   : > { %v11905_v5 = vpop.f32.mrb[32].mxu1 }
 0x325   : > { %v4351_v51 = vpop.f32.mrb[33].mxu1  ;;  %v4383_v11 = vadd.f32 %v11905_v5, %v11942_v44 }
 0x326   : > { %v4382_v57 = vadd.f32 %v4351_v51, %v11937_v4 }
 0x328   : > { %v11911_v26 = vpop.f32.mrb[34].mxu1 }
 0x329   : > { %v11916_v10 = vpop.f32.mrb[35].mxu1  ;;  %v4385_v62 = vadd.f32 %v11911_v26, %v11951_v60 }
 0x32a   : > { %v4384_v18 = vadd.f32 %v11916_v10, %v11946_v59 }
 0x32d   : > { %v9375_v37 = vpop.f32.mrb[32].mxu0 }
 0x32e   : > { %v5442_v40 = vadd.f32 %v9375_v37, %v11918_v30  ;;  %v5394_v47 = vpop.f32.mrb[33].mxu0 }
 0x32f   : > { %v5441_v55 = vadd.f32 %v5394_v47, %v11923_v48 }
 0x330   : > { %5459 = vrot.lane.b32.xlu0 %v5442_v40, %s10128_s15 }
 0x331   : > { %v9378_v54 = vpop.f32.mrb[34].mxu0 }
 0x332   : > { %v5444_v61 = vadd.f32 %v9378_v54, %v11925_v33  ;;  %v5404_v6 = vpop.f32.mrb[35].mxu0 }
 0x333   : > { %v5443_v41 = vadd.f32 %v5404_v6, %v11932_v2 }
 0x334   : > { %5463 = vrot.lane.b32.xlu1 %v5444_v61, %s10128_s15  ;;  %5457 = vrot.lane.b32.xlu0 %v5441_v55, %s10128_s15 }
 0x335   : > { %v9381_v21 = vpop.f32.mrb[36].mxu0 }
 0x336   : > { %v5414_v42 = vpop.f32.mrb[37].mxu0  ;;  %v5446_v46 = vadd.f32 %v9381_v21, %v11942_v44 }
 0x337   : > { %v5445_v32 = vadd.f32 %v5414_v42, %v11937_v4 }
 0x338   : > { %5461 = vrot.lane.b32.xlu1 %v5443_v41, %s10128_s15 }
 0x339   : > { %v9384_v0 = vpop.f32.mrb[38].mxu0  ;;  %5465 = vrot.lane.b32.xlu0 %v5445_v32, %s10128_s15 }
 0x33a   : > { %v5424_v7 = vpop.f32.mrb[39].mxu0  ;;  %v5448_v14 = vadd.f32 %v9384_v0, %v11951_v60 }
 0x33b   : > { %v5447_v12 = vadd.f32 %v5424_v7, %v11946_v59 }
 0x33c   : > { %5467 = vrot.lane.b32.xlu1 %v5446_v46, %s10128_s15 }
 0x33d   : > { %5469 = vrot.lane.b32.xlu0 %v5447_v12, %s10128_s15 }
 0x340   : > { %5471 = vrot.lane.b32.xlu1 %v5448_v14, %s10128_s15 }
 0x3a2   : > { %v5460_v17 = vpop.permute.xlu0 %5459 }
 0x3a3   : > { %v5482_v56 = vsel %vm1043_vm5, %v4379_v15, %v5460_v17 }
 0x3a4   : > { %5491 = vst.msk [vmem:[%s10268_s12 + $0x8] sm:$0xff] %vm5489_vm8, %v5482_v56 }
 0x3a6   : > { %v5464_v27 = vpop.permute.xlu1 %5463  ;;  %v5458_v29 = vpop.permute.xlu0 %5457 }
 0x3a7   : > { %v5484_v22 = vsel %vm1043_vm5, %v4381_v20, %v5464_v27  ;;  %v5481_v52 = vsel %vm1043_vm5, %v4378_v1, %v5458_v29 }
 0x3a8   : > { %5493 = vst.msk [vmem:[%s10268_s12 + $0x28] sm:$0xff] %vm5489_vm8, %v5484_v22  ;;  %5490 = vst.msk [vmem:[%s10268_s12] sm:$0xff] %vm5489_vm8, %v5481_v52 }
 0x3aa   : > { %v5462_v9 = vpop.permute.xlu1 %5461 }
 0x3ab   : > { %v5483_v8 = vsel %vm1043_vm5, %v4380_v36, %v5462_v9  ;;  %v5466_v25 = vpop.permute.xlu0 %5465 }
 0x3ac   : > { %5492 = vst.msk [vmem:[%s10268_s12 + $0x20] sm:$0xff] %vm5489_vm8, %v5483_v8  ;;  %v5485_v35 = vsel %vm1043_vm5, %v4382_v57, %v5466_v25  ;;  %v9501_v45 = vpop.f32.mrb[36].mxu1 }
 0x3ad   : > { %5494 = vst.msk [vmem:[%s10268_s12 + $0x40] sm:$0xff] %vm5489_vm8, %v5485_v35  ;;  %v6479_v16 = vpop.f32.mrb[37].mxu1  ;;  %v6527_v42 = vadd.f32 %v9501_v45, %v11918_v30 }
 0x3ae   : > { %v5468_v19 = vpop.permute.xlu1 %5467  ;;  %v6526_v32 = vadd.f32 %v6479_v16, %v11923_v48 }
 0x3af   : > { %v5486_v39 = vsel %vm1043_vm5, %v4383_v11, %v5468_v19  ;;  %v5470_v28 = vpop.permute.xlu0 %5469 }
 0x3b0   : > { %5495 = vst.msk [vmem:[%s10268_s12 + $0x48] sm:$0xff] %vm5489_vm8, %v5486_v39  ;;  %v5487_v43 = vsel %vm1043_vm5, %v4384_v18, %v5470_v28  ;;  %v9504_v53 = vpop.f32.mrb[38].mxu1 }
 0x3b1   : > { %5496 = vst.msk [vmem:[%s10268_s12 + $0x60] sm:$0xff] %vm5489_vm8, %v5487_v43  ;;  %v6489_v63 = vpop.f32.mrb[39].mxu1  ;;  %v6529_v12 = vadd.f32 %v9504_v53, %v11925_v33 }
 0x3b2   : > { %v5472_v5 = vpop.permute.xlu1 %5471  ;;  %v6528_v14 = vadd.f32 %v6489_v63, %v11932_v2 }
 0x3b3   : > { %v5488_v13 = vsel %vm1043_vm5, %v4385_v62, %v5472_v5 }
 0x3b4   : > { %5497 = vst.msk [vmem:[%s10268_s12 + $0x68] sm:$0xff] %vm5489_vm8, %v5488_v13  ;;  %v9507_v51 = vpop.f32.mrb[40].mxu1 }
 0x3b5   : > { %v6499_v24 = vpop.f32.mrb[41].mxu1  ;;  %v6531_v56 = vadd.f32 %v9507_v51, %v11942_v44 }
 0x3b8   : > { %v9510_v50 = vpop.f32.mrb[42].mxu1 }
 0x3b9   : > { %v6509_v10 = vpop.f32.mrb[43].mxu1  ;;  %v6533_v29 = vadd.f32 %v9510_v50, %v11951_v60 }
 0x3ba   : > { %v6532_v22 = vadd.f32 %v6509_v10, %v11946_v59 }
 0x3bd   : > { %v9627_v31 = vpop.f32.mrb[40].mxu0 }
 0x3be   : > { %v7542_v34 = vadd.f32 %v9627_v31, %v11918_v30  ;;  %v7494_v37 = vpop.f32.mrb[41].mxu0 }
 0x3bf   : > { %v7541_v40 = vadd.f32 %v7494_v37, %v11923_v48 }
 0x3c0   : > { %7559 = vrot.lane.b32.xlu1 %v7542_v34, %s10128_s15 }
 0x3c1   : > { %v9630_v26 = vpop.f32.mrb[42].mxu0  ;;  %7557 = vrot.lane.b32.xlu0 %v7541_v40, %s10128_s15 }
 0x3c2   : > { %v7544_v47 = vadd.f32 %v9630_v26, %v11925_v33  ;;  %v7504_v38 = vpop.f32.mrb[43].mxu0  ;;  %v6530_v33 = vadd.f32 %v6499_v24, %v11937_v4 }
 0x3c3   : > { %v7543_v49 = vadd.f32 %v7504_v38, %v11932_v2 }
 0x3c4   : > { %7563 = vrot.lane.b32.xlu1 %v7544_v47, %s10128_s15 }
 0x3c5   : > { %v9633_v54 = vpop.f32.mrb[44].mxu0  ;;  %7561 = vrot.lane.b32.xlu0 %v7543_v49, %s10128_s15 }
 0x3c6   : > { %v7546_v55 = vadd.f32 %v9633_v54, %v11942_v44  ;;  %v7514_v61 = vpop.f32.mrb[45].mxu0 }
 0x3c7   : > { %v7545_v6 = vadd.f32 %v7514_v61, %v11937_v4 }
 0x3c8   : > { %7567 = vrot.lane.b32.xlu1 %v7546_v55, %s10128_s15 }
 0x3c9   : > { %v9636_v3 = vpop.f32.mrb[46].mxu0  ;;  %7565 = vrot.lane.b32.xlu0 %v7545_v6, %s10128_s15 }
 0x3ca   : > { %v7548_v23 = vadd.f32 %v9636_v3, %v11951_v60  ;;  %v7524_v21 = vpop.f32.mrb[47].mxu0 }
 0x3cb   : > { %v7547_v41 = vadd.f32 %v7524_v21, %v11946_v59 }
 0x3cc   : > { %7571 = vrot.lane.b32.xlu1 %v7548_v23, %s10128_s15 }
 0x3cd   : > { %7569 = vrot.lane.b32.xlu0 %v7547_v41, %s10128_s15 }
 0x432   : > { %v7560_v58 = vpop.permute.xlu1 %7559 }
 0x433   : > { %v7582_v0 = vsel %vm1043_vm5, %v6527_v42, %v7560_v58  ;;  %v7558_v46 = vpop.permute.xlu0 %7557 }
 0x434   : > { %8249 = vst.msk [vmem:[%s10268_s12 + $0x18] sm:$0xff] %vm5489_vm8, %v7582_v0  ;;  %v7581_v7 = vsel %vm1043_vm5, %v6526_v32, %v7558_v46 }
 0x435   : > { %8248 = vst.msk [vmem:[%s10268_s12 + $0x10] sm:$0xff] %vm5489_vm8, %v7581_v7 }
 0x436   : > { %v7564_v30 = vpop.permute.xlu1 %7563 }
 0x437   : > { %v7584_v15 = vsel %vm1043_vm5, %v6529_v12, %v7564_v30  ;;  %v7562_v48 = vpop.permute.xlu0 %7561 }
 0x438   : > { %8251 = vst.msk [vmem:[%s10268_s12 + $0x38] sm:$0xff] %vm5489_vm8, %v7584_v15  ;;  %v7583_v17 = vsel %vm1043_vm5, %v6528_v14, %v7562_v48 }
 0x439   : > { %8250 = vst.msk [vmem:[%s10268_s12 + $0x30] sm:$0xff] %vm5489_vm8, %v7583_v17 }
 0x43a   : > { %v7568_v1 = vpop.permute.xlu1 %7567 }
 0x43b   : > { %v7586_v20 = vsel %vm1043_vm5, %v6531_v56, %v7568_v1  ;;  %v7566_v2 = vpop.permute.xlu0 %7565 }
 0x43c   : > { %8253 = vst.msk [vmem:[%s10268_s12 + $0x58] sm:$0xff] %vm5489_vm8, %v7586_v20  ;;  %v7585_v27 = vsel %vm1043_vm5, %v6530_v33, %v7566_v2 }
 0x43d   : > { %8252 = vst.msk [vmem:[%s10268_s12 + $0x50] sm:$0xff] %vm5489_vm8, %v7585_v27 }
 0x43e   : > { %v7572_v44 = vpop.permute.xlu1 %7571 }
 0x43f   : > { %v7588_v52 = vsel %vm1043_vm5, %v6533_v29, %v7572_v44  ;;  %v7570_v36 = vpop.permute.xlu0 %7569 }
 0x440   : > { %8255 = vst.msk [vmem:[%s10268_s12 + $0x78] sm:$0xff] %vm5489_vm8, %v7588_v52  ;;  %v7587_v4 = vsel %vm1043_vm5, %v6532_v22, %v7570_v36 }
 0x441   : > { %8254 = vst.msk [vmem:[%s10268_s12 + $0x70] sm:$0xff] %vm5489_vm8, %v7587_v4 }
 0x442 PF: > { %s17_s28 = sadd.s32 1, %s10123_s28   ;;  %s12094_s24 = smov %s10115_s26 }
 0x443   : > { %p14_p10 = scmp.ge.s32.totalorder %s17_s28, 10   ;;  %s12095_s25 = smov %s10119_s27 }
 0x444   : > { %s12096_s26 = smov %s12099_s29  ;;  %s12097_s27 = smov %s12103_s30 }
 0x445   :  { %16 = sbr.rel (!%p14_p10) target bundleno = 3 (0x3), region = 117 }

</bundles_post_ra>
